<compile_context>
chip_gen: v7x
topology: tpu7x:2x2x1
jax: 0.10.0
libtpu: 0.0.40
codegen_flags: <defaults>
</compile_context>

<pallas_src>
import functools
import numpy as np
import jax
import jax.numpy as jnp
from jax.experimental import pallas as pl
from jax.experimental.pallas import tpu as pltpu


# ----------------------------------------------------------------------------
# Blur weights.  The reference gaussian_kernel() is exactly separable:
# kernel3d = outer(g, g, g) / sum, so only the 1-D taps are needed.
# NOTE: we mirror the reference formula verbatim (it squares an already-squared
# term, i.e. exp(-(x-c)^4 / (8 sigma^2))) -- normalisation hides the scale.
# ----------------------------------------------------------------------------
def gaussian_taps_1d(sigma: float) -> np.ndarray:
    window = int(np.round(sigma * 3) * 2 + 1)          # sigma=0.2 -> 3 taps
    center = (window - 1) / 2.0
    m = -0.5 * (np.arange(window, dtype=np.float64) - center) ** 2
    g = np.exp(-(m ** 2) / (2.0 * sigma ** 2))
    return (g / g.sum()).astype(np.float32)


def _band_matrix(n: int, w0: float, w1: float) -> np.ndarray:
    """Tridiagonal band matrix implementing a 3-tap 1-D conv with zero padding."""
    m = np.zeros((n, n), np.float32)
    i = np.arange(n)
    m[i, i] = w1
    m[i[:-1], i[:-1] + 1] = w0
    m[i[1:], i[1:] - 1] = w0
    return m


# ----------------------------------------------------------------------------
# Pass 1: LUT intensity + streamed noise + separable blur + per-slab min/max
# ----------------------------------------------------------------------------
def _synth_blur_kernel(lut_ref, w_ref, mh_ref, mw_ref, labels_ref, noise_ref,
                       blur_ref, mn_ref, mx_ref, acc_ref,
                       *, n_lut, TD, TDH, H, W):
    # hoist SMEM scalar loads out of the per-plane path
    lut_vals = [lut_ref[i] for i in range(n_lut)]
    w0 = w_ref[0]          # == w[2] (symmetric Gaussian), asserted in wrapper
    w1 = w_ref[1]

    # ---- 1) LUT + noise, fused with the 3-tap D blur (plane by plane) -------
    for p in range(TDH):
        lab = labels_ref[p].astype(jnp.int32)                    # (H, W)
        # n_lut is small -> where-chain is cheapest.
        # TODO(synk): for large label sets switch to a one-hot (tile, n_lut) @
        # (n_lut, 1) MXU matmul to offload the VALU slot.
        plane = jnp.zeros((H, W), jnp.float32)
        for i in range(n_lut):
            plane = jnp.where(lab == i, lut_vals[i], plane)
        # noise is pre-scaled by sigma and pre-zeroed on the D-pad planes
        img = plane + noise_ref[p].astype(jnp.float32)
        img_w0 = w0 * img                                        # reused (symmetry)
        if p < TD:
            acc_ref[p] = img_w0                                  # first tap: init
        if 0 <= p - 1 < TD:
            acc_ref[p - 1] = acc_ref[p - 1] + w1 * img           # centre tap
        if 0 <= p - 2 < TD:
            acc_ref[p - 2] = acc_ref[p - 2] + img_w0             # last tap

    # ---- 2) H / W blur passes as banded matmuls on the idle MXU -------------
    MH = mh_ref[...]                                             # (H, H) resident
    MW = mw_ref[...]                                             # (W, W) resident
    run_min = None
    run_max = None
    for q in range(TD):
        a = acc_ref[q]                                                   # (H, W)
        ah = jnp.dot(MH, a, preferred_element_type=jnp.float32)          # H pass
        b = jnp.dot(ah, MW, preferred_element_type=jnp.float32)          # W pass
        b16 = b.astype(blur_ref.dtype)
        blur_ref[q] = b16
        # min/max of what is actually stored (keeps [0,255] exact after pass 2)
        bq = b16.astype(jnp.float32)
        pmn = jnp.min(bq, axis=0, keepdims=True)                         # (1, W)
        pmx = jnp.max(bq, axis=0, keepdims=True)
        run_min = pmn if run_min is None else jnp.minimum(run_min, pmn)
        run_max = pmx if run_max is None else jnp.maximum(run_max, pmx)

    # lane-wise partials only; the tiny cross-lane/cross-slab combine is host-side
    mn_ref[...] = run_min.reshape(1, 1, W)
    mx_ref[...] = run_max.reshape(1, 1, W)


# ----------------------------------------------------------------------------
# Pass 2: streamed min-max normalisation to [0, 255] (wide lane-dense tiles)
# ----------------------------------------------------------------------------
def _normalize_kernel(nrm_ref, x_ref, o_ref):
    # TODO(synk): utils.min_max_norm assumed to be (x - min)/(max - min)*(M - m) + m.
    o_ref[...] = (x_ref[...].astype(jnp.float32) - nrm_ref[0]) * nrm_ref[1]


# ----------------------------------------------------------------------------
# Wrapper
# ----------------------------------------------------------------------------
def _largest_divisor_leq(n, target, multiple_of=1):
    best = multiple_of
    d = multiple_of
    while d <= min(n, target):
        if n % d == 0:
            best = d
        d += multiple_of
    return best


def _pick_slab_depth(D, H, W, max_slab_d, vmem_budget_bytes):
    """Largest divisor of D (<= max_slab_d) whose per-slab working set fits the
    VMEM budget (double-buffered streamed blocks + scratch + temporaries).
    Budget default (40 MiB) is sized for v7x's 64 MiB VMEM; v5e/v6e (128 MiB)
    can raise it / max_slab_d for fewer grid steps and less halo re-work."""
    def footprint(td):
        tdh = td + 2
        lab = tdh * H * W * 1 * 2      # int8 labels, double buffered
        noi = tdh * H * W * 2 * 2      # bf16 noise, double buffered
        out = td * H * W * 2 * 2       # bf16 blur block, double buffered
        acc = td * H * W * 4           # f32 D-pass accumulator scratch
        mats = (H * H + W * W) * 4     # resident band matrices
        temps = 8 * H * W * 4          # per-plane value temporaries (margin)
        return lab + noi + out + acc + mats + temps
    best = 1
    for td in range(1, min(D, max_slab_d) + 1):
        if D % td == 0 and footprint(td) <= vmem_budget_bytes:
            best = td
    return best


def labels_to_image(labels_ncdhw, lut, taps_1d, noise_dhw, sigma, *,
                    max_slab_d=32, vmem_budget=40 * 1024 * 1024):
    """Pallas forward pass of _LabelsToImage.

    labels_ncdhw : (1, 1, D, H, W) integer label map (raw labels)
    lut          : (n_lut,) f32 intensity per RAW label value
                   (IOdict remap + synthesized means folded together)
    taps_1d      : (3,) f32 separable blur taps (blur_std = 0.2)
    noise_dhw    : (D, H, W) standard-normal noise (host RNG)
    sigma        : noise std-dev, drawn by the caller as sigma ~ U(0, noise_std)
    """
    N, C, D, H, W = labels_ncdhw.shape
    assert N == 1 and C == 1, "module's blur conv is single channel"
    assert W % 128 == 0 and H % 8 == 0, "keep lane/sublane dims aligned"
    taps = np.asarray(taps_1d, np.float32)
    assert taps.shape[0] == 3, "Pallas path written for the 3-tap blur (blur_std=0.2)"
    assert np.allclose(taps[0], taps[2]), "Gaussian taps must be symmetric"
    P = 1
    n_lut = int(lut.shape[0])

    # Slab depth from a VMEM budget (for v7x prefer an even num_slabs so the
    # "parallel" grid axis balances across its two TensorCores).
    TD = _pick_slab_depth(D, H, W, max_slab_d, vmem_budget)
    num_slabs = D // TD
    TDH = TD + 2 * P

    # labels travel as int8 (1 B/voxel); D padded with an out-of-range label -> 0
    lab_dtype = jnp.int8 if n_lut <= 126 else jnp.int32
    labels3 = labels_ncdhw.reshape(D, H, W).astype(lab_dtype)
    labels_pad = jnp.pad(labels3, ((P, P), (0, 0), (0, 0)), constant_values=n_lut)

    # noise pre-scaled by sigma, bf16, zero on the D-pad planes
    noise3 = (noise_dhw.astype(jnp.float32) *
              jnp.asarray(sigma, jnp.float32)).astype(jnp.bfloat16)
    noise_pad = jnp.pad(noise3, ((P, P), (0, 0), (0, 0)))

    # gather overlapping D-slabs so each slab carries its own 1-plane halo
    plane_idx = jnp.asarray(np.arange(num_slabs)[:, None] * TD
                            + np.arange(TDH)[None, :])
    labels_halo = labels_pad[plane_idx]        # (slabs, TDH, H, W) int8
    noise_halo = noise_pad[plane_idx]          # (slabs, TDH, H, W) bf16

    w0 = float(taps[0])
    w1 = float(taps[1])
    w01 = jnp.asarray([w0, w1], jnp.float32)
    lut_arr = jnp.asarray(lut, jnp.float32)
    MH = jnp.asarray(_band_matrix(H, w0, w1))  # H-pass band matrix (zero padding)
    MW = jnp.asarray(_band_matrix(W, w0, w1))  # W-pass band matrix (zero padding)

    smem = pltpu.MemorySpace.SMEM
    cparams = pltpu.CompilerParams(
        dimension_semantics=("parallel",),     # megacore: split slabs across TCs
        vmem_limit_bytes=64 * 1024 * 1024,
    )

    kernel1 = functools.partial(_synth_blur_kernel, n_lut=n_lut, TD=TD, TDH=TDH,
                                H=H, W=W)
    blur16, mins, maxs = pl.pallas_call(
        kernel1,
        grid=(num_slabs,),
        out_shape=(
            jax.ShapeDtypeStruct((D, H, W), jnp.bfloat16),          # bf16 intermediate
            jax.ShapeDtypeStruct((num_slabs, 1, W), jnp.float32),
            jax.ShapeDtypeStruct((num_slabs, 1, W), jnp.float32),
        ),
        in_specs=[
            pl.BlockSpec((n_lut,), lambda s: (0,), memory_space=smem),   # LUT
            pl.BlockSpec((2,), lambda s: (0,), memory_space=smem),       # (w0, w1)
            pl.BlockSpec((H, H), lambda s: (0, 0)),                      # H band matrix
            pl.BlockSpec((W, W), lambda s: (0, 0)),                      # W band matrix
            pl.BlockSpec((None, TDH, H, W), lambda s: (s, 0, 0, 0)),     # labels slab
            pl.BlockSpec((None, TDH, H, W), lambda s: (s, 0, 0, 0)),     # noise slab
        ],
        out_specs=(
            pl.BlockSpec((TD, H, W), lambda s: (s, 0, 0)),
            pl.BlockSpec((1, 1, W), lambda s: (s, 0, 0)),
            pl.BlockSpec((1, 1, W), lambda s: (s, 0, 0)),
        ),
        scratch_shapes=[pltpu.VMEM((TD, H, W), jnp.float32)],
        compiler_params=cparams,
    )(lut_arr, w01, MH, MW, labels_halo, noise_halo)

    # tiny global combine + divide-by-zero guard, then a cheap wide second pass
    mn = jnp.min(mins)
    mx = jnp.max(maxs)
    scale = jnp.where(mx > mn, 255.0 / (mx - mn), 0.0)
    nrm = jnp.stack([mn, scale]).astype(jnp.float32)

    # pass-2 tiling decoupled from pass 1: flatten to (D*H, W), wide row tiles.
    # (input_output_aliases not used: bf16 input vs f32 output dtypes differ.)
    R = D * H
    TR = _largest_divisor_leq(R, 1024, multiple_of=8)
    out = pl.pallas_call(
        _normalize_kernel,
        grid=(R // TR,),
        out_shape=jax.ShapeDtypeStruct((R, W), jnp.float32),
        in_specs=[
            pl.BlockSpec((2,), lambda r: (0,), memory_space=smem),
            pl.BlockSpec((TR, W), lambda r: (r, 0)),
        ],
        out_specs=pl.BlockSpec((TR, W), lambda r: (r, 0)),
        compiler_params=cparams,
    )(nrm, blur16.reshape(R, W))

    return out.reshape(N, C, D, H, W)


# ----------------------------------------------------------------------------
# Main
# ----------------------------------------------------------------------------
if __name__ == "__main__":
    key = jax.random.PRNGKey(0)
    k_lab, k_mean, k_sigma, k_noise = jax.random.split(key, 4)

    # Module config (deterministic, in-script)
    D, H, W = 16, 16, 128
    in_shape = (1, 1, D, H, W)                      # NCDHW, single channel
    IOdict = {0: 0, 1: 1, 2: 2, 3: 3, 4: 2, 5: 5}   # remap label 4 -> 2
    bg_labels = [0]
    max_intensity = 255
    blur_std = 0.2
    noise_std = 0.15

    # input label map (raw labels)
    n_raw = 6
    y = jax.random.randint(k_lab, in_shape, 0, n_raw, dtype=jnp.int32)

    # ---- fold _convert_labels + _synthesize_intensities into one LUT ---------
    conv_map = np.array([IOdict.get(l, l) for l in range(n_raw)], dtype=np.int32)
    y_np = np.asarray(y)
    converted_present = set(np.unique(conv_map[y_np]).tolist())
    fg = sorted(converted_present ^ set(bg_labels))   # symmetric diff, as in module
    means = np.asarray(jax.random.uniform(k_mean, (len(fg),))) * max_intensity

    max_conv = int(max(int(conv_map.max()), max(bg_labels)))
    intensity_of_conv = np.zeros(max_conv + 1, dtype=np.float32)
    for lab_v, m in zip(fg, means):
        intensity_of_conv[lab_v] = m                  # bg labels stay at 0
    lut = jnp.asarray(intensity_of_conv[conv_map])    # intensity per RAW label

    # ---- noise (sigma ~ U(0, noise_std), standard-normal volume) --------------
    sigma = jax.random.uniform(k_sigma, ()) * noise_std
    noise = jax.random.normal(k_noise, (D, H, W), dtype=jnp.float32)

    # ---- separable Gaussian blur taps (3 taps for blur_std = 0.2) -------------
    taps = gaussian_taps_1d(blur_std)

    out = labels_to_image(y, lut, taps, noise, sigma)
    jax.block_until_ready(out)
    assert out.shape == in_shape and out.dtype == jnp.float32
    assert bool(jnp.isfinite(out).all())
    print("KERNEL_OK")
</pallas_src>

<mosaic_0001>
module attributes {stable_mosaic.version = 11 : i64} {
  func.func @_synth_blur_kernel(%arg0: i32, %arg1: memref<6xf32, #tpu.memory_space<smem>>, %arg2: memref<2xf32, #tpu.memory_space<smem>>, %arg3: memref<16x16xf32, #tpu.memory_space<vmem>>, %arg4: memref<128x128xf32, #tpu.memory_space<vmem>>, %arg5: memref<1x18x16x128xi8, #tpu.memory_space<vmem>>, %arg6: memref<1x18x16x128xbf16, #tpu.memory_space<vmem>>, %arg7: memref<16x16x128xbf16, #tpu.memory_space<vmem>>, %arg8: memref<1x1x128xf32, #tpu.memory_space<vmem>>, %arg9: memref<1x1x128xf32, #tpu.memory_space<vmem>>, %arg10: memref<16x16x128xf32, #tpu.memory_space<vmem>>) attributes {dimension_semantics = [#tpu.dimension_semantics<parallel>], iteration_bounds = array<i64: 1>, scalar_prefetch = 0 : i64, scratch_operands = 1 : i64, tpu.core_type = #tpu.core_type<tc>, window_params = [{transform_indices = @transform_0, window_bounds = array<i64: 6>}, {transform_indices = @transform_1, window_bounds = array<i64: 2>}, {pipeline_mode = #tpu.pipeline_mode<synchronous>, transform_indices = @transform_2, window_bounds = array<i64: 16, 16>}, {pipeline_mode = #tpu.pipeline_mode<synchronous>, transform_indices = @transform_3, window_bounds = array<i64: 128, 128>}, {transform_indices = @transform_4, window_bounds = array<i64: 1, 18, 16, 128>}, {transform_indices = @transform_5, window_bounds = array<i64: 1, 18, 16, 128>}, {transform_indices = @transform_6, window_bounds = array<i64: 16, 16, 128>}, {transform_indices = @transform_7, window_bounds = array<i64: 1, 1, 128>}, {transform_indices = @transform_8, window_bounds = array<i64: 1, 1, 128>}]} {
    %c0 = arith.constant 0 : index
    %0 = memref.load %arg1[%c0] : memref<6xf32, #tpu.memory_space<smem>>
    %c1 = arith.constant 1 : index
    %1 = memref.load %arg1[%c1] : memref<6xf32, #tpu.memory_space<smem>>
    %c2 = arith.constant 2 : index
    %2 = memref.load %arg1[%c2] : memref<6xf32, #tpu.memory_space<smem>>
    %c3 = arith.constant 3 : index
    %3 = memref.load %arg1[%c3] : memref<6xf32, #tpu.memory_space<smem>>
    %c4 = arith.constant 4 : index
    %4 = memref.load %arg1[%c4] : memref<6xf32, #tpu.memory_space<smem>>
    %c5 = arith.constant 5 : index
    %5 = memref.load %arg1[%c5] : memref<6xf32, #tpu.memory_space<smem>>
    %c0_0 = arith.constant 0 : index
    %6 = memref.load %arg2[%c0_0] : memref<2xf32, #tpu.memory_space<smem>>
    %c1_1 = arith.constant 1 : index
    %7 = memref.load %arg2[%c1_1] : memref<2xf32, #tpu.memory_space<smem>>
    %c0_2 = arith.constant 0 : index
    %c0_3 = arith.constant 0 : index
    %c0_4 = arith.constant 0 : index
    %c0_5 = arith.constant 0 : index
    %8 = vector.load %arg5[%c0_2, %c0_3, %c0_4, %c0_5] : memref<1x18x16x128xi8, #tpu.memory_space<vmem>>, vector<1x1x16x128xi8>
    %9 = vector.shape_cast %8 : vector<1x1x16x128xi8> to vector<16x128xi8>
    %10 = arith.extsi %9 : vector<16x128xi8> to vector<16x128xi32>
    %cst = arith.constant 0.000000e+00 : f32
    %11 = vector.broadcast %cst : f32 to vector<16x128xf32>
    %c0_i32 = arith.constant 0 : i32
    %12 = vector.broadcast %c0_i32 : i32 to vector<16x128xi32>
    %13 = arith.cmpi eq, %10, %12 : vector<16x128xi32>
    %14 = vector.broadcast %0 : f32 to vector<16x128xf32>
    %15 = arith.select %13, %14, %11 : vector<16x128xi1>, vector<16x128xf32>
    %c1_i32 = arith.constant 1 : i32
    %16 = vector.broadcast %c1_i32 : i32 to vector<16x128xi32>
    %17 = arith.cmpi eq, %10, %16 : vector<16x128xi32>
    %18 = vector.broadcast %1 : f32 to vector<16x128xf32>
    %19 = arith.select %17, %18, %15 : vector<16x128xi1>, vector<16x128xf32>
    %c2_i32 = arith.constant 2 : i32
    %20 = vector.broadcast %c2_i32 : i32 to vector<16x128xi32>
    %21 = arith.cmpi eq, %10, %20 : vector<16x128xi32>
    %22 = vector.broadcast %2 : f32 to vector<16x128xf32>
    %23 = arith.select %21, %22, %19 : vector<16x128xi1>, vector<16x128xf32>
    %c3_i32 = arith.constant 3 : i32
    %24 = vector.broadcast %c3_i32 : i32 to vector<16x128xi32>
    %25 = arith.cmpi eq, %10, %24 : vector<16x128xi32>
    %26 = vector.broadcast %3 : f32 to vector<16x128xf32>
    %27 = arith.select %25, %26, %23 : vector<16x128xi1>, vector<16x128xf32>
    %c4_i32 = arith.constant 4 : i32
    %28 = vector.broadcast %c4_i32 : i32 to vector<16x128xi32>
    %29 = arith.cmpi eq, %10, %28 : vector<16x128xi32>
    %30 = vector.broadcast %4 : f32 to vector<16x128xf32>
    %31 = arith.select %29, %30, %27 : vector<16x128xi1>, vector<16x128xf32>
    %c5_i32 = arith.constant 5 : i32
    %32 = vector.broadcast %c5_i32 : i32 to vector<16x128xi32>
    %33 = arith.cmpi eq, %10, %32 : vector<16x128xi32>
    %34 = vector.broadcast %5 : f32 to vector<16x128xf32>
    %35 = arith.select %33, %34, %31 : vector<16x128xi1>, vector<16x128xf32>
    %c0_6 = arith.constant 0 : index
    %c0_7 = arith.constant 0 : index
    %c0_8 = arith.constant 0 : index
    %c0_9 = arith.constant 0 : index
    %36 = vector.load %arg6[%c0_6, %c0_7, %c0_8, %c0_9] : memref<1x18x16x128xbf16, #tpu.memory_space<vmem>>, vector<1x1x16x128xbf16>
    %37 = vector.shape_cast %36 : vector<1x1x16x128xbf16> to vector<16x128xbf16>
    %38 = arith.extf %37 : vector<16x128xbf16> to vector<16x128xf32>
    %39 = arith.addf %35, %38 : vector<16x128xf32>
    %40 = vector.broadcast %6 : f32 to vector<16x128xf32>
    %41 = arith.mulf %40, %39 : vector<16x128xf32>
    %c0_10 = arith.constant 0 : index
    %c0_11 = arith.constant 0 : index
    %c0_12 = arith.constant 0 : index
    %42 = vector.load %arg10[%c0_10, %c0_11, %c0_12] : memref<16x16x128xf32, #tpu.memory_space<vmem>>, vector<1x16x128xf32>
    %43 = vector.shape_cast %42 : vector<1x16x128xf32> to vector<16x128xf32>
    %44 = vector.shape_cast %41 : vector<16x128xf32> to vector<1x16x128xf32>
    tpu.vector_store %arg10[%c0_10, %c0_11, %c0_12], %44 {strides = array<i32>} : memref<16x16x128xf32, #tpu.memory_space<vmem>>, vector<1x16x128xf32>,
    %c0_13 = arith.constant 0 : index
    %c1_14 = arith.constant 1 : index
    %c0_15 = arith.constant 0 : index
    %c0_16 = arith.constant 0 : index
    %45 = vector.load %arg5[%c0_13, %c1_14, %c0_15, %c0_16] : memref<1x18x16x128xi8, #tpu.memory_space<vmem>>, vector<1x1x16x128xi8>
    %46 = vector.shape_cast %45 : vector<1x1x16x128xi8> to vector<16x128xi8>
    %47 = arith.extsi %46 : vector<16x128xi8> to vector<16x128xi32>
    %cst_17 = arith.constant 0.000000e+00 : f32
    %48 = vector.broadcast %cst_17 : f32 to vector<16x128xf32>
    %c0_i32_18 = arith.constant 0 : i32
    %49 = vector.broadcast %c0_i32_18 : i32 to vector<16x128xi32>
    %50 = arith.cmpi eq, %47, %49 : vector<16x128xi32>
    %51 = vector.broadcast %0 : f32 to vector<16x128xf32>
    %52 = arith.select %50, %51, %48 : vector<16x128xi1>, vector<16x128xf32>
    %c1_i32_19 = arith.constant 1 : i32
    %53 = vector.broadcast %c1_i32_19 : i32 to vector<16x128xi32>
    %54 = arith.cmpi eq, %47, %53 : vector<16x128xi32>
    %55 = vector.broadcast %1 : f32 to vector<16x128xf32>
    %56 = arith.select %54, %55, %52 : vector<16x128xi1>, vector<16x128xf32>
    %c2_i32_20 = arith.constant 2 : i32
    %57 = vector.broadcast %c2_i32_20 : i32 to vector<16x128xi32>
    %58 = arith.cmpi eq, %47, %57 : vector<16x128xi32>
    %59 = vector.broadcast %2 : f32 to vector<16x128xf32>
    %60 = arith.select %58, %59, %56 : vector<16x128xi1>, vector<16x128xf32>
    %c3_i32_21 = arith.constant 3 : i32
    %61 = vector.broadcast %c3_i32_21 : i32 to vector<16x128xi32>
    %62 = arith.cmpi eq, %47, %61 : vector<16x128xi32>
    %63 = vector.broadcast %3 : f32 to vector<16x128xf32>
    %64 = arith.select %62, %63, %60 : vector<16x128xi1>, vector<16x128xf32>
    %c4_i32_22 = arith.constant 4 : i32
    %65 = vector.broadcast %c4_i32_22 : i32 to vector<16x128xi32>
    %66 = arith.cmpi eq, %47, %65 : vector<16x128xi32>
    %67 = vector.broadcast %4 : f32 to vector<16x128xf32>
    %68 = arith.select %66, %67, %64 : vector<16x128xi1>, vector<16x128xf32>
    %c5_i32_23 = arith.constant 5 : i32
    %69 = vector.broadcast %c5_i32_23 : i32 to vector<16x128xi32>
    %70 = arith.cmpi eq, %47, %69 : vector<16x128xi32>
    %71 = vector.broadcast %5 : f32 to vector<16x128xf32>
    %72 = arith.select %70, %71, %68 : vector<16x128xi1>, vector<16x128xf32>
    %c0_24 = arith.constant 0 : index
    %c1_25 = arith.constant 1 : index
    %c0_26 = arith.constant 0 : index
    %c0_27 = arith.constant 0 : index
    %73 = vector.load %arg6[%c0_24, %c1_25, %c0_26, %c0_27] : memref<1x18x16x128xbf16, #tpu.memory_space<vmem>>, vector<1x1x16x128xbf16>
    %74 = vector.shape_cast %73 : vector<1x1x16x128xbf16> to vector<16x128xbf16>
    %75 = arith.extf %74 : vector<16x128xbf16> to vector<16x128xf32>
    %76 = arith.addf %72, %75 : vector<16x128xf32>
    %77 = vector.broadcast %6 : f32 to vector<16x128xf32>
    %78 = arith.mulf %77, %76 : vector<16x128xf32>
    %c1_28 = arith.constant 1 : index
    %c0_29 = arith.constant 0 : index
    %c0_30 = arith.constant 0 : index
    %79 = vector.load %arg10[%c1_28, %c0_29, %c0_30] : memref<16x16x128xf32, #tpu.memory_space<vmem>>, vector<1x16x128xf32>
    %80 = vector.shape_cast %79 : vector<1x16x128xf32> to vector<16x128xf32>
    %81 = vector.shape_cast %78 : vector<16x128xf32> to vector<1x16x128xf32>
    tpu.vector_store %arg10[%c1_28, %c0_29, %c0_30], %81 {strides = array<i32>} : memref<16x16x128xf32, #tpu.memory_space<vmem>>, vector<1x16x128xf32>,
    %c0_31 = arith.constant 0 : index
    %c0_32 = arith.constant 0 : index
    %c0_33 = arith.constant 0 : index
    %82 = vector.load %arg10[%c0_31, %c0_32, %c0_33] : memref<16x16x128xf32, #tpu.memory_space<vmem>>, vector<1x16x128xf32>
    %83 = vector.shape_cast %82 : vector<1x16x128xf32> to vector<16x128xf32>
    %84 = vector.broadcast %7 : f32 to vector<16x128xf32>
    %85 = arith.mulf %84, %76 : vector<16x128xf32>
    %86 = arith.addf %83, %85 : vector<16x128xf32>
    %c0_34 = arith.constant 0 : index
    %c0_35 = arith.constant 0 : index
    %c0_36 = arith.constant 0 : index
    %87 = vector.load %arg10[%c0_34, %c0_35, %c0_36] : memref<16x16x128xf32, #tpu.memory_space<vmem>>, vector<1x16x128xf32>
    %88 = vector.shape_cast %87 : vector<1x16x128xf32> to vector<16x128xf32>
    %89 = vector.shape_cast %86 : vector<16x128xf32> to vector<1x16x128xf32>
    tpu.vector_store %arg10[%c0_34, %c0_35, %c0_36], %89 {strides = array<i32>} : memref<16x16x128xf32, #tpu.memory_space<vmem>>, vector<1x16x128xf32>,
    %c0_37 = arith.constant 0 : index
    %c2_38 = arith.constant 2 : index
    %c0_39 = arith.constant 0 : index
    %c0_40 = arith.constant 0 : index
    %90 = vector.load %arg5[%c0_37, %c2_38, %c0_39, %c0_40] : memref<1x18x16x128xi8, #tpu.memory_space<vmem>>, vector<1x1x16x128xi8>
    %91 = vector.shape_cast %90 : vector<1x1x16x128xi8> to vector<16x128xi8>
    %92 = arith.extsi %91 : vector<16x128xi8> to vector<16x128xi32>
    %cst_41 = arith.constant 0.000000e+00 : f32
    %93 = vector.broadcast %cst_41 : f32 to vector<16x128xf32>
    %c0_i32_42 = arith.constant 0 : i32
    %94 = vector.broadcast %c0_i32_42 : i32 to vector<16x128xi32>
    %95 = arith.cmpi eq, %92, %94 : vector<16x128xi32>
    %96 = vector.broadcast %0 : f32 to vector<16x128xf32>
    %97 = arith.select %95, %96, %93 : vector<16x128xi1>, vector<16x128xf32>
    %c1_i32_43 = arith.constant 1 : i32
    %98 = vector.broadcast %c1_i32_43 : i32 to vector<16x128xi32>
    %99 = arith.cmpi eq, %92, %98 : vector<16x128xi32>
    %100 = vector.broadcast %1 : f32 to vector<16x128xf32>
    %101 = arith.select %99, %100, %97 : vector<16x128xi1>, vector<16x128xf32>
    %c2_i32_44 = arith.constant 2 : i32
    %102 = vector.broadcast %c2_i32_44 : i32 to vector<16x128xi32>
    %103 = arith.cmpi eq, %92, %102 : vector<16x128xi32>
    %104 = vector.broadcast %2 : f32 to vector<16x128xf32>
    %105 = arith.select %103, %104, %101 : vector<16x128xi1>, vector<16x128xf32>
    %c3_i32_45 = arith.constant 3 : i32
    %106 = vector.broadcast %c3_i32_45 : i32 to vector<16x128xi32>
    %107 = arith.cmpi eq, %92, %106 : vector<16x128xi32>
    %108 = vector.broadcast %3 : f32 to vector<16x128xf32>
    %109 = arith.select %107, %108, %105 : vector<16x128xi1>, vector<16x128xf32>
    %c4_i32_46 = arith.constant 4 : i32
    %110 = vector.broadcast %c4_i32_46 : i32 to vector<16x128xi32>
    %111 = arith.cmpi eq, %92, %110 : vector<16x128xi32>
    %112 = vector.broadcast %4 : f32 to vector<16x128xf32>
    %113 = arith.select %111, %112, %109 : vector<16x128xi1>, vector<16x128xf32>
    %c5_i32_47 = arith.constant 5 : i32
    %114 = vector.broadcast %c5_i32_47 : i32 to vector<16x128xi32>
    %115 = arith.cmpi eq, %92, %114 : vector<16x128xi32>
    %116 = vector.broadcast %5 : f32 to vector<16x128xf32>
    %117 = arith.select %115, %116, %113 : vector<16x128xi1>, vector<16x128xf32>
    %c0_48 = arith.constant 0 : index
    %c2_49 = arith.constant 2 : index
    %c0_50 = arith.constant 0 : index
    %c0_51 = arith.constant 0 : index
    %118 = vector.load %arg6[%c0_48, %c2_49, %c0_50, %c0_51] : memref<1x18x16x128xbf16, #tpu.memory_space<vmem>>, vector<1x1x16x128xbf16>
    %119 = vector.shape_cast %118 : vector<1x1x16x128xbf16> to vector<16x128xbf16>
    %120 = arith.extf %119 : vector<16x128xbf16> to vector<16x128xf32>
    %121 = arith.addf %117, %120 : vector<16x128xf32>
    %122 = vector.broadcast %6 : f32 to vector<16x128xf32>
    %123 = arith.mulf %122, %121 : vector<16x128xf32>
    %c2_52 = arith.constant 2 : index
    %c0_53 = arith.constant 0 : index
    %c0_54 = arith.constant 0 : index
    %124 = vector.load %arg10[%c2_52, %c0_53, %c0_54] : memref<16x16x128xf32, #tpu.memory_space<vmem>>, vector<1x16x128xf32>
    %125 = vector.shape_cast %124 : vector<1x16x128xf32> to vector<16x128xf32>
    %126 = vector.shape_cast %123 : vector<16x128xf32> to vector<1x16x128xf32>
    tpu.vector_store %arg10[%c2_52, %c0_53, %c0_54], %126 {strides = array<i32>} : memref<16x16x128xf32, #tpu.memory_space<vmem>>, vector<1x16x128xf32>,
    %c1_55 = arith.constant 1 : index
    %c0_56 = arith.constant 0 : index
    %c0_57 = arith.constant 0 : index
    %127 = vector.load %arg10[%c1_55, %c0_56, %c0_57] : memref<16x16x128xf32, #tpu.memory_space<vmem>>, vector<1x16x128xf32>
    %128 = vector.shape_cast %127 : vector<1x16x128xf32> to vector<16x128xf32>
    %129 = vector.broadcast %7 : f32 to vector<16x128xf32>
    %130 = arith.mulf %129, %121 : vector<16x128xf32>
    %131 = arith.addf %128, %130 : vector<16x128xf32>
    %c1_58 = arith.constant 1 : index
    %c0_59 = arith.constant 0 : index
    %c0_60 = arith.constant 0 : index
    %132 = vector.load %arg10[%c1_58, %c0_59, %c0_60] : memref<16x16x128xf32, #tpu.memory_space<vmem>>, vector<1x16x128xf32>
    %133 = vector.shape_cast %132 : vector<1x16x128xf32> to vector<16x128xf32>
    %134 = vector.shape_cast %131 : vector<16x128xf32> to vector<1x16x128xf32>
    tpu.vector_store %arg10[%c1_58, %c0_59, %c0_60], %134 {strides = array<i32>} : memref<16x16x128xf32, #tpu.memory_space<vmem>>, vector<1x16x128xf32>,
    %c0_61 = arith.constant 0 : index
    %c0_62 = arith.constant 0 : index
    %c0_63 = arith.constant 0 : index
    %135 = vector.load %arg10[%c0_61, %c0_62, %c0_63] : memref<16x16x128xf32, #tpu.memory_space<vmem>>, vector<1x16x128xf32>
    %136 = vector.shape_cast %135 : vector<1x16x128xf32> to vector<16x128xf32>
    %137 = arith.addf %136, %123 : vector<16x128xf32>
    %c0_64 = arith.constant 0 : index
    %c0_65 = arith.constant 0 : index
    %c0_66 = arith.constant 0 : index
    %138 = vector.load %arg10[%c0_64, %c0_65, %c0_66] : memref<16x16x128xf32, #tpu.memory_space<vmem>>, vector<1x16x128xf32>
    %139 = vector.shape_cast %138 : vector<1x16x128xf32> to vector<16x128xf32>
    %140 = vector.shape_cast %137 : vector<16x128xf32> to vector<1x16x128xf32>
    tpu.vector_store %arg10[%c0_64, %c0_65, %c0_66], %140 {strides = array<i32>} : memref<16x16x128xf32, #tpu.memory_space<vmem>>, vector<1x16x128xf32>,
    %c0_67 = arith.constant 0 : index
    %c3_68 = arith.constant 3 : index
    %c0_69 = arith.constant 0 : index
    %c0_70 = arith.constant 0 : index
    %141 = vector.load %arg5[%c0_67, %c3_68, %c0_69, %c0_70] : memref<1x18x16x128xi8, #tpu.memory_space<vmem>>, vector<1x1x16x128xi8>
    %142 = vector.shape_cast %141 : vector<1x1x16x128xi8> to vector<16x128xi8>
    %143 = arith.extsi %142 : vector<16x128xi8> to vector<16x128xi32>
    %cst_71 = arith.constant 0.000000e+00 : f32
    %144 = vector.broadcast %cst_71 : f32 to vector<16x128xf32>
    %c0_i32_72 = arith.constant 0 : i32
    %145 = vector.broadcast %c0_i32_72 : i32 to vector<16x128xi32>
    %146 = arith.cmpi eq, %143, %145 : vector<16x128xi32>
    %147 = vector.broadcast %0 : f32 to vector<16x128xf32>
    %148 = arith.select %146, %147, %144 : vector<16x128xi1>, vector<16x128xf32>
    %c1_i32_73 = arith.constant 1 : i32
    %149 = vector.broadcast %c1_i32_73 : i32 to vector<16x128xi32>
    %150 = arith.cmpi eq, %143, %149 : vector<16x128xi32>
    %151 = vector.broadcast %1 : f32 to vector<16x128xf32>
    %152 = arith.select %150, %151, %148 : vector<16x128xi1>, vector<16x128xf32>
    %c2_i32_74 = arith.constant 2 : i32
    %153 = vector.broadcast %c2_i32_74 : i32 to vector<16x128xi32>
    %154 = arith.cmpi eq, %143, %153 : vector<16x128xi32>
    %155 = vector.broadcast %2 : f32 to vector<16x128xf32>
    %156 = arith.select %154, %155, %152 : vector<16x128xi1>, vector<16x128xf32>
    %c3_i32_75 = arith.constant 3 : i32
    %157 = vector.broadcast %c3_i32_75 : i32 to vector<16x128xi32>
    %158 = arith.cmpi eq, %143, %157 : vector<16x128xi32>
    %159 = vector.broadcast %3 : f32 to vector<16x128xf32>
    %160 = arith.select %158, %159, %156 : vector<16x128xi1>, vector<16x128xf32>
    %c4_i32_76 = arith.constant 4 : i32
    %161 = vector.broadcast %c4_i32_76 : i32 to vector<16x128xi32>
    %162 = arith.cmpi eq, %143, %161 : vector<16x128xi32>
    %163 = vector.broadcast %4 : f32 to vector<16x128xf32>
    %164 = arith.select %162, %163, %160 : vector<16x128xi1>, vector<16x128xf32>
    %c5_i32_77 = arith.constant 5 : i32
    %165 = vector.broadcast %c5_i32_77 : i32 to vector<16x128xi32>
    %166 = arith.cmpi eq, %143, %165 : vector<16x128xi32>
    %167 = vector.broadcast %5 : f32 to vector<16x128xf32>
    %168 = arith.select %166, %167, %164 : vector<16x128xi1>, vector<16x128xf32>
    %c0_78 = arith.constant 0 : index
    %c3_79 = arith.constant 3 : index
    %c0_80 = arith.constant 0 : index
    %c0_81 = arith.constant 0 : index
    %169 = vector.load %arg6[%c0_78, %c3_79, %c0_80, %c0_81] : memref<1x18x16x128xbf16, #tpu.memory_space<vmem>>, vector<1x1x16x128xbf16>
    %170 = vector.shape_cast %169 : vector<1x1x16x128xbf16> to vector<16x128xbf16>
    %171 = arith.extf %170 : vector<16x128xbf16> to vector<16x128xf32>
    %172 = arith.addf %168, %171 : vector<16x128xf32>
    %173 = vector.broadcast %6 : f32 to vector<16x128xf32>
    %174 = arith.mulf %173, %172 : vector<16x128xf32>
    %c3_82 = arith.constant 3 : index
    %c0_83 = arith.constant 0 : index
    %c0_84 = arith.constant 0 : index
    %175 = vector.load %arg10[%c3_82, %c0_83, %c0_84] : memref<16x16x128xf32, #tpu.memory_space<vmem>>, vector<1x16x128xf32>
    %176 = vector.shape_cast %175 : vector<1x16x128xf32> to vector<16x128xf32>
    %177 = vector.shape_cast %174 : vector<16x128xf32> to vector<1x16x128xf32>
    tpu.vector_store %arg10[%c3_82, %c0_83, %c0_84], %177 {strides = array<i32>} : memref<16x16x128xf32, #tpu.memory_space<vmem>>, vector<1x16x128xf32>,
    %c2_85 = arith.constant 2 : index
    %c0_86 = arith.constant 0 : index
    %c0_87 = arith.constant 0 : index
    %178 = vector.load %arg10[%c2_85, %c0_86, %c0_87] : memref<16x16x128xf32, #tpu.memory_space<vmem>>, vector<1x16x128xf32>
    %179 = vector.shape_cast %178 : vector<1x16x128xf32> to vector<16x128xf32>
    %180 = vector.broadcast %7 : f32 to vector<16x128xf32>
    %181 = arith.mulf %180, %172 : vector<16x128xf32>
    %182 = arith.addf %179, %181 : vector<16x128xf32>
    %c2_88 = arith.constant 2 : index
    %c0_89 = arith.constant 0 : index
    %c0_90 = arith.constant 0 : index
    %183 = vector.load %arg10[%c2_88, %c0_89, %c0_90] : memref<16x16x128xf32, #tpu.memory_space<vmem>>, vector<1x16x128xf32>
    %184 = vector.shape_cast %183 : vector<1x16x128xf32> to vector<16x128xf32>
    %185 = vector.shape_cast %182 : vector<16x128xf32> to vector<1x16x128xf32>
    tpu.vector_store %arg10[%c2_88, %c0_89, %c0_90], %185 {strides = array<i32>} : memref<16x16x128xf32, #tpu.memory_space<vmem>>, vector<1x16x128xf32>,
    %c1_91 = arith.constant 1 : index
    %c0_92 = arith.constant 0 : index
    %c0_93 = arith.constant 0 : index
    %186 = vector.load %arg10[%c1_91, %c0_92, %c0_93] : memref<16x16x128xf32, #tpu.memory_space<vmem>>, vector<1x16x128xf32>
    %187 = vector.shape_cast %186 : vector<1x16x128xf32> to vector<16x128xf32>
    %188 = arith.addf %187, %174 : vector<16x128xf32>
    %c1_94 = arith.constant 1 : index
    %c0_95 = arith.constant 0 : index
    %c0_96 = arith.constant 0 : index
    %189 = vector.load %arg10[%c1_94, %c0_95, %c0_96] : memref<16x16x128xf32, #tpu.memory_space<vmem>>, vector<1x16x128xf32>
    %190 = vector.shape_cast %189 : vector<1x16x128xf32> to vector<16x128xf32>
    %191 = vector.shape_cast %188 : vector<16x128xf32> to vector<1x16x128xf32>
    tpu.vector_store %arg10[%c1_94, %c0_95, %c0_96], %191 {strides = array<i32>} : memref<16x16x128xf32, #tpu.memory_space<vmem>>, vector<1x16x128xf32>,
    %c0_97 = arith.constant 0 : index
    %c4_98 = arith.constant 4 : index
    %c0_99 = arith.constant 0 : index
    %c0_100 = arith.constant 0 : index
    %192 = vector.load %arg5[%c0_97, %c4_98, %c0_99, %c0_100] : memref<1x18x16x128xi8, #tpu.memory_space<vmem>>, vector<1x1x16x128xi8>
    %193 = vector.shape_cast %192 : vector<1x1x16x128xi8> to vector<16x128xi8>
    %194 = arith.extsi %193 : vector<16x128xi8> to vector<16x128xi32>
    %cst_101 = arith.constant 0.000000e+00 : f32
    %195 = vector.broadcast %cst_101 : f32 to vector<16x128xf32>
    %c0_i32_102 = arith.constant 0 : i32
    %196 = vector.broadcast %c0_i32_102 : i32 to vector<16x128xi32>
    %197 = arith.cmpi eq, %194, %196 : vector<16x128xi32>
    %198 = vector.broadcast %0 : f32 to vector<16x128xf32>
    %199 = arith.select %197, %198, %195 : vector<16x128xi1>, vector<16x128xf32>
    %c1_i32_103 = arith.constant 1 : i32
    %200 = vector.broadcast %c1_i32_103 : i32 to vector<16x128xi32>
    %201 = arith.cmpi eq, %194, %200 : vector<16x128xi32>
    %202 = vector.broadcast %1 : f32 to vector<16x128xf32>
    %203 = arith.select %201, %202, %199 : vector<16x128xi1>, vector<16x128xf32>
    %c2_i32_104 = arith.constant 2 : i32
    %204 = vector.broadcast %c2_i32_104 : i32 to vector<16x128xi32>
    %205 = arith.cmpi eq, %194, %204 : vector<16x128xi32>
    %206 = vector.broadcast %2 : f32 to vector<16x128xf32>
    %207 = arith.select %205, %206, %203 : vector<16x128xi1>, vector<16x128xf32>
    %c3_i32_105 = arith.constant 3 : i32
    %208 = vector.broadcast %c3_i32_105 : i32 to vector<16x128xi32>
    %209 = arith.cmpi eq, %194, %208 : vector<16x128xi32>
    %210 = vector.broadcast %3 : f32 to vector<16x128xf32>
    %211 = arith.select %209, %210, %207 : vector<16x128xi1>, vector<16x128xf32>
    %c4_i32_106 = arith.constant 4 : i32
    %212 = vector.broadcast %c4_i32_106 : i32 to vector<16x128xi32>
    %213 = arith.cmpi eq, %194, %212 : vector<16x128xi32>
    %214 = vector.broadcast %4 : f32 to vector<16x128xf32>
    %215 = arith.select %213, %214, %211 : vector<16x128xi1>, vector<16x128xf32>
    %c5_i32_107 = arith.constant 5 : i32
    %216 = vector.broadcast %c5_i32_107 : i32 to vector<16x128xi32>
    %217 = arith.cmpi eq, %194, %216 : vector<16x128xi32>
    %218 = vector.broadcast %5 : f32 to vector<16x128xf32>
    %219 = arith.select %217, %218, %215 : vector<16x128xi1>, vector<16x128xf32>
    %c0_108 = arith.constant 0 : index
    %c4_109 = arith.constant 4 : index
    %c0_110 = arith.constant 0 : index
    %c0_111 = arith.constant 0 : index
    %220 = vector.load %arg6[%c0_108, %c4_109, %c0_110, %c0_111] : memref<1x18x16x128xbf16, #tpu.memory_space<vmem>>, vector<1x1x16x128xbf16>
    %221 = vector.shape_cast %220 : vector<1x1x16x128xbf16> to vector<16x128xbf16>
    %222 = arith.extf %221 : vector<16x128xbf16> to vector<16x128xf32>
    %223 = arith.addf %219, %222 : vector<16x128xf32>
    %224 = vector.broadcast %6 : f32 to vector<16x128xf32>
    %225 = arith.mulf %224, %223 : vector<16x128xf32>
    %c4_112 = arith.constant 4 : index
    %c0_113 = arith.constant 0 : index
    %c0_114 = arith.constant 0 : index
    %226 = vector.load %arg10[%c4_112, %c0_113, %c0_114] : memref<16x16x128xf32, #tpu.memory_space<vmem>>, vector<1x16x128xf32>
    %227 = vector.shape_cast %226 : vector<1x16x128xf32> to vector<16x128xf32>
    %228 = vector.shape_cast %225 : vector<16x128xf32> to vector<1x16x128xf32>
    tpu.vector_store %arg10[%c4_112, %c0_113, %c0_114], %228 {strides = array<i32>} : memref<16x16x128xf32, #tpu.memory_space<vmem>>, vector<1x16x128xf32>,
    %c3_115 = arith.constant 3 : index
    %c0_116 = arith.constant 0 : index
    %c0_117 = arith.constant 0 : index
    %229 = vector.load %arg10[%c3_115, %c0_116, %c0_117] : memref<16x16x128xf32, #tpu.memory_space<vmem>>, vector<1x16x128xf32>
    %230 = vector.shape_cast %229 : vector<1x16x128xf32> to vector<16x128xf32>
    %231 = vector.broadcast %7 : f32 to vector<16x128xf32>
    %232 = arith.mulf %231, %223 : vector<16x128xf32>
    %233 = arith.addf %230, %232 : vector<16x128xf32>
    %c3_118 = arith.constant 3 : index
    %c0_119 = arith.constant 0 : index
    %c0_120 = arith.constant 0 : index
    %234 = vector.load %arg10[%c3_118, %c0_119, %c0_120] : memref<16x16x128xf32, #tpu.memory_space<vmem>>, vector<1x16x128xf32>
    %235 = vector.shape_cast %234 : vector<1x16x128xf32> to vector<16x128xf32>
    %236 = vector.shape_cast %233 : vector<16x128xf32> to vector<1x16x128xf32>
    tpu.vector_store %arg10[%c3_118, %c0_119, %c0_120], %236 {strides = array<i32>} : memref<16x16x128xf32, #tpu.memory_space<vmem>>, vector<1x16x128xf32>,
    %c2_121 = arith.constant 2 : index
    %c0_122 = arith.constant 0 : index
    %c0_123 = arith.constant 0 : index
    %237 = vector.load %arg10[%c2_121, %c0_122, %c0_123] : memref<16x16x128xf32, #tpu.memory_space<vmem>>, vector<1x16x128xf32>
    %238 = vector.shape_cast %237 : vector<1x16x128xf32> to vector<16x128xf32>
    %239 = arith.addf %238, %225 : vector<16x128xf32>
    %c2_124 = arith.constant 2 : index
    %c0_125 = arith.constant 0 : index
    %c0_126 = arith.constant 0 : index
    %240 = vector.load %arg10[%c2_124, %c0_125, %c0_126] : memref<16x16x128xf32, #tpu.memory_space<vmem>>, vector<1x16x128xf32>
    %241 = vector.shape_cast %240 : vector<1x16x128xf32> to vector<16x128xf32>
    %242 = vector.shape_cast %239 : vector<16x128xf32> to vector<1x16x128xf32>
    tpu.vector_store %arg10[%c2_124, %c0_125, %c0_126], %242 {strides = array<i32>} : memref<16x16x128xf32, #tpu.memory_space<vmem>>, vector<1x16x128xf32>,
    %c0_127 = arith.constant 0 : index
    %c5_128 = arith.constant 5 : index
    %c0_129 = arith.constant 0 : index
    %c0_130 = arith.constant 0 : index
    %243 = vector.load %arg5[%c0_127, %c5_128, %c0_129, %c0_130] : memref<1x18x16x128xi8, #tpu.memory_space<vmem>>, vector<1x1x16x128xi8>
    %244 = vector.shape_cast %243 : vector<1x1x16x128xi8> to vector<16x128xi8>
    %245 = arith.extsi %244 : vector<16x128xi8> to vector<16x128xi32>
    %cst_131 = arith.constant 0.000000e+00 : f32
    %246 = vector.broadcast %cst_131 : f32 to vector<16x128xf32>
    %c0_i32_132 = arith.constant 0 : i32
    %247 = vector.broadcast %c0_i32_132 : i32 to vector<16x128xi32>
    %248 = arith.cmpi eq, %245, %247 : vector<16x128xi32>
    %249 = vector.broadcast %0 : f32 to vector<16x128xf32>
    %250 = arith.select %248, %249, %246 : vector<16x128xi1>, vector<16x128xf32>
    %c1_i32_133 = arith.constant 1 : i32
    %251 = vector.broadcast %c1_i32_133 : i32 to vector<16x128xi32>
    %252 = arith.cmpi eq, %245, %251 : vector<16x128xi32>
    %253 = vector.broadcast %1 : f32 to vector<16x128xf32>
    %254 = arith.select %252, %253, %250 : vector<16x128xi1>, vector<16x128xf32>
    %c2_i32_134 = arith.constant 2 : i32
    %255 = vector.broadcast %c2_i32_134 : i32 to vector<16x128xi32>
    %256 = arith.cmpi eq, %245, %255 : vector<16x128xi32>
    %257 = vector.broadcast %2 : f32 to vector<16x128xf32>
    %258 = arith.select %256, %257, %254 : vector<16x128xi1>, vector<16x128xf32>
    %c3_i32_135 = arith.constant 3 : i32
    %259 = vector.broadcast %c3_i32_135 : i32 to vector<16x128xi32>
    %260 = arith.cmpi eq, %245, %259 : vector<16x128xi32>
    %261 = vector.broadcast %3 : f32 to vector<16x128xf32>
    %262 = arith.select %260, %261, %258 : vector<16x128xi1>, vector<16x128xf32>
    %c4_i32_136 = arith.constant 4 : i32
    %263 = vector.broadcast %c4_i32_136 : i32 to vector<16x128xi32>
    %264 = arith.cmpi eq, %245, %263 : vector<16x128xi32>
    %265 = vector.broadcast %4 : f32 to vector<16x128xf32>
    %266 = arith.select %264, %265, %262 : vector<16x128xi1>, vector<16x128xf32>
    %c5_i32_137 = arith.constant 5 : i32
    %267 = vector.broadcast %c5_i32_137 : i32 to vector<16x128xi32>
    %268 = arith.cmpi eq, %245, %267 : vector<16x128xi32>
    %269 = vector.broadcast %5 : f32 to vector<16x128xf32>
    %270 = arith.select %268, %269, %266 : vector<16x128xi1>, vector<16x128xf32>
    %c0_138 = arith.constant 0 : index
    %c5_139 = arith.constant 5 : index
    %c0_140 = arith.constant 0 : index
    %c0_141 = arith.constant 0 : index
    %271 = vector.load %arg6[%c0_138, %c5_139, %c0_140, %c0_141] : memref<1x18x16x128xbf16, #tpu.memory_space<vmem>>, vector<1x1x16x128xbf16>
    %272 = vector.shape_cast %271 : vector<1x1x16x128xbf16> to vector<16x128xbf16>
    %273 = arith.extf %272 : vector<16x128xbf16> to vector<16x128xf32>
    %274 = arith.addf %270, %273 : vector<16x128xf32>
    %275 = vector.broadcast %6 : f32 to vector<16x128xf32>
    %276 = arith.mulf %275, %274 : vector<16x128xf32>
    %c5_142 = arith.constant 5 : index
    %c0_143 = arith.constant 0 : index
    %c0_144 = arith.constant 0 : index
    %277 = vector.load %arg10[%c5_142, %c0_143, %c0_144] : memref<16x16x128xf32, #tpu.memory_space<vmem>>, vector<1x16x128xf32>
    %278 = vector.shape_cast %277 : vector<1x16x128xf32> to vector<16x128xf32>
    %279 = vector.shape_cast %276 : vector<16x128xf32> to vector<1x16x128xf32>
    tpu.vector_store %arg10[%c5_142, %c0_143, %c0_144], %279 {strides = array<i32>} : memref<16x16x128xf32, #tpu.memory_space<vmem>>, vector<1x16x128xf32>,
    %c4_145 = arith.constant 4 : index
    %c0_146 = arith.constant 0 : index
    %c0_147 = arith.constant 0 : index
    %280 = vector.load %arg10[%c4_145, %c0_146, %c0_147] : memref<16x16x128xf32, #tpu.memory_space<vmem>>, vector<1x16x128xf32>
    %281 = vector.shape_cast %280 : vector<1x16x128xf32> to vector<16x128xf32>
    %282 = vector.broadcast %7 : f32 to vector<16x128xf32>
    %283 = arith.mulf %282, %274 : vector<16x128xf32>
    %284 = arith.addf %281, %283 : vector<16x128xf32>
    %c4_148 = arith.constant 4 : index
    %c0_149 = arith.constant 0 : index
    %c0_150 = arith.constant 0 : index
    %285 = vector.load %arg10[%c4_148, %c0_149, %c0_150] : memref<16x16x128xf32, #tpu.memory_space<vmem>>, vector<1x16x128xf32>
    %286 = vector.shape_cast %285 : vector<1x16x128xf32> to vector<16x128xf32>
    %287 = vector.shape_cast %284 : vector<16x128xf32> to vector<1x16x128xf32>
    tpu.vector_store %arg10[%c4_148, %c0_149, %c0_150], %287 {strides = array<i32>} : memref<16x16x128xf32, #tpu.memory_space<vmem>>, vector<1x16x128xf32>,
    %c3_151 = arith.constant 3 : index
    %c0_152 = arith.constant 0 : index
    %c0_153 = arith.constant 0 : index
    %288 = vector.load %arg10[%c3_151, %c0_152, %c0_153] : memref<16x16x128xf32, #tpu.memory_space<vmem>>, vector<1x16x128xf32>
    %289 = vector.shape_cast %288 : vector<1x16x128xf32> to vector<16x128xf32>
    %290 = arith.addf %289, %276 : vector<16x128xf32>
    %c3_154 = arith.constant 3 : index
    %c0_155 = arith.constant 0 : index
    %c0_156 = arith.constant 0 : index
    %291 = vector.load %arg10[%c3_154, %c0_155, %c0_156] : memref<16x16x128xf32, #tpu.memory_space<vmem>>, vector<1x16x128xf32>
    %292 = vector.shape_cast %291 : vector<1x16x128xf32> to vector<16x128xf32>
    %293 = vector.shape_cast %290 : vector<16x128xf32> to vector<1x16x128xf32>
    tpu.vector_store %arg10[%c3_154, %c0_155, %c0_156], %293 {strides = array<i32>} : memref<16x16x128xf32, #tpu.memory_space<vmem>>, vector<1x16x128xf32>,
    %c0_157 = arith.constant 0 : index
    %c6 = arith.constant 6 : index
    %c0_158 = arith.constant 0 : index
    %c0_159 = arith.constant 0 : index
    %294 = vector.load %arg5[%c0_157, %c6, %c0_158, %c0_159] : memref<1x18x16x128xi8, #tpu.memory_space<vmem>>, vector<1x1x16x128xi8>
    %295 = vector.shape_cast %294 : vector<1x1x16x128xi8> to vector<16x128xi8>
    %296 = arith.extsi %295 : vector<16x128xi8> to vector<16x128xi32>
    %cst_160 = arith.constant 0.000000e+00 : f32
    %297 = vector.broadcast %cst_160 : f32 to vector<16x128xf32>
    %c0_i32_161 = arith.constant 0 : i32
    %298 = vector.broadcast %c0_i32_161 : i32 to vector<16x128xi32>
    %299 = arith.cmpi eq, %296, %298 : vector<16x128xi32>
    %300 = vector.broadcast %0 : f32 to vector<16x128xf32>
    %301 = arith.select %299, %300, %297 : vector<16x128xi1>, vector<16x128xf32>
    %c1_i32_162 = arith.constant 1 : i32
    %302 = vector.broadcast %c1_i32_162 : i32 to vector<16x128xi32>
    %303 = arith.cmpi eq, %296, %302 : vector<16x128xi32>
    %304 = vector.broadcast %1 : f32 to vector<16x128xf32>
    %305 = arith.select %303, %304, %301 : vector<16x128xi1>, vector<16x128xf32>
    %c2_i32_163 = arith.constant 2 : i32
    %306 = vector.broadcast %c2_i32_163 : i32 to vector<16x128xi32>
    %307 = arith.cmpi eq, %296, %306 : vector<16x128xi32>
    %308 = vector.broadcast %2 : f32 to vector<16x128xf32>
    %309 = arith.select %307, %308, %305 : vector<16x128xi1>, vector<16x128xf32>
    %c3_i32_164 = arith.constant 3 : i32
    %310 = vector.broadcast %c3_i32_164 : i32 to vector<16x128xi32>
    %311 = arith.cmpi eq, %296, %310 : vector<16x128xi32>
    %312 = vector.broadcast %3 : f32 to vector<16x128xf32>
    %313 = arith.select %311, %312, %309 : vector<16x128xi1>, vector<16x128xf32>
    %c4_i32_165 = arith.constant 4 : i32
    %314 = vector.broadcast %c4_i32_165 : i32 to vector<16x128xi32>
    %315 = arith.cmpi eq, %296, %314 : vector<16x128xi32>
    %316 = vector.broadcast %4 : f32 to vector<16x128xf32>
    %317 = arith.select %315, %316, %313 : vector<16x128xi1>, vector<16x128xf32>
    %c5_i32_166 = arith.constant 5 : i32
    %318 = vector.broadcast %c5_i32_166 : i32 to vector<16x128xi32>
    %319 = arith.cmpi eq, %296, %318 : vector<16x128xi32>
    %320 = vector.broadcast %5 : f32 to vector<16x128xf32>
    %321 = arith.select %319, %320, %317 : vector<16x128xi1>, vector<16x128xf32>
    %c0_167 = arith.constant 0 : index
    %c6_168 = arith.constant 6 : index
    %c0_169 = arith.constant 0 : index
    %c0_170 = arith.constant 0 : index
    %322 = vector.load %arg6[%c0_167, %c6_168, %c0_169, %c0_170] : memref<1x18x16x128xbf16, #tpu.memory_space<vmem>>, vector<1x1x16x128xbf16>
    %323 = vector.shape_cast %322 : vector<1x1x16x128xbf16> to vector<16x128xbf16>
    %324 = arith.extf %323 : vector<16x128xbf16> to vector<16x128xf32>
    %325 = arith.addf %321, %324 : vector<16x128xf32>
    %326 = vector.broadcast %6 : f32 to vector<16x128xf32>
    %327 = arith.mulf %326, %325 : vector<16x128xf32>
    %c6_171 = arith.constant 6 : index
    %c0_172 = arith.constant 0 : index
    %c0_173 = arith.constant 0 : index
    %328 = vector.load %arg10[%c6_171, %c0_172, %c0_173] : memref<16x16x128xf32, #tpu.memory_space<vmem>>, vector<1x16x128xf32>
    %329 = vector.shape_cast %328 : vector<1x16x128xf32> to vector<16x128xf32>
    %330 = vector.shape_cast %327 : vector<16x128xf32> to vector<1x16x128xf32>
    tpu.vector_store %arg10[%c6_171, %c0_172, %c0_173], %330 {strides = array<i32>} : memref<16x16x128xf32, #tpu.memory_space<vmem>>, vector<1x16x128xf32>,
    %c5_174 = arith.constant 5 : index
    %c0_175 = arith.constant 0 : index
    %c0_176 = arith.constant 0 : index
    %331 = vector.load %arg10[%c5_174, %c0_175, %c0_176] : memref<16x16x128xf32, #tpu.memory_space<vmem>>, vector<1x16x128xf32>
    %332 = vector.shape_cast %331 : vector<1x16x128xf32> to vector<16x128xf32>
    %333 = vector.broadcast %7 : f32 to vector<16x128xf32>
    %334 = arith.mulf %333, %325 : vector<16x128xf32>
    %335 = arith.addf %332, %334 : vector<16x128xf32>
    %c5_177 = arith.constant 5 : index
    %c0_178 = arith.constant 0 : index
    %c0_179 = arith.constant 0 : index
    %336 = vector.load %arg10[%c5_177, %c0_178, %c0_179] : memref<16x16x128xf32, #tpu.memory_space<vmem>>, vector<1x16x128xf32>
    %337 = vector.shape_cast %336 : vector<1x16x128xf32> to vector<16x128xf32>
    %338 = vector.shape_cast %335 : vector<16x128xf32> to vector<1x16x128xf32>
    tpu.vector_store %arg10[%c5_177, %c0_178, %c0_179], %338 {strides = array<i32>} : memref<16x16x128xf32, #tpu.memory_space<vmem>>, vector<1x16x128xf32>,
    %c4_180 = arith.constant 4 : index
    %c0_181 = arith.constant 0 : index
    %c0_182 = arith.constant 0 : index
    %339 = vector.load %arg10[%c4_180, %c0_181, %c0_182] : memref<16x16x128xf32, #tpu.memory_space<vmem>>, vector<1x16x128xf32>
    %340 = vector.shape_cast %339 : vector<1x16x128xf32> to vector<16x128xf32>
    %341 = arith.addf %340, %327 : vector<16x128xf32>
    %c4_183 = arith.constant 4 : index
    %c0_184 = arith.constant 0 : index
    %c0_185 = arith.constant 0 : index
    %342 = vector.load %arg10[%c4_183, %c0_184, %c0_185] : memref<16x16x128xf32, #tpu.memory_space<vmem>>, vector<1x16x128xf32>
    %343 = vector.shape_cast %342 : vector<1x16x128xf32> to vector<16x128xf32>
    %344 = vector.shape_cast %341 : vector<16x128xf32> to vector<1x16x128xf32>
    tpu.vector_store %arg10[%c4_183, %c0_184, %c0_185], %344 {strides = array<i32>} : memref<16x16x128xf32, #tpu.memory_space<vmem>>, vector<1x16x128xf32>,
    %c0_186 = arith.constant 0 : index
    %c7 = arith.constant 7 : index
    %c0_187 = arith.constant 0 : index
    %c0_188 = arith.constant 0 : index
    %345 = vector.load %arg5[%c0_186, %c7, %c0_187, %c0_188] : memref<1x18x16x128xi8, #tpu.memory_space<vmem>>, vector<1x1x16x128xi8>
    %346 = vector.shape_cast %345 : vector<1x1x16x128xi8> to vector<16x128xi8>
    %347 = arith.extsi %346 : vector<16x128xi8> to vector<16x128xi32>
    %cst_189 = arith.constant 0.000000e+00 : f32
    %348 = vector.broadcast %cst_189 : f32 to vector<16x128xf32>
    %c0_i32_190 = arith.constant 0 : i32
    %349 = vector.broadcast %c0_i32_190 : i32 to vector<16x128xi32>
    %350 = arith.cmpi eq, %347, %349 : vector<16x128xi32>
    %351 = vector.broadcast %0 : f32 to vector<16x128xf32>
    %352 = arith.select %350, %351, %348 : vector<16x128xi1>, vector<16x128xf32>
    %c1_i32_191 = arith.constant 1 : i32
    %353 = vector.broadcast %c1_i32_191 : i32 to vector<16x128xi32>
    %354 = arith.cmpi eq, %347, %353 : vector<16x128xi32>
    %355 = vector.broadcast %1 : f32 to vector<16x128xf32>
    %356 = arith.select %354, %355, %352 : vector<16x128xi1>, vector<16x128xf32>
    %c2_i32_192 = arith.constant 2 : i32
    %357 = vector.broadcast %c2_i32_192 : i32 to vector<16x128xi32>
    %358 = arith.cmpi eq, %347, %357 : vector<16x128xi32>
    %359 = vector.broadcast %2 : f32 to vector<16x128xf32>
    %360 = arith.select %358, %359, %356 : vector<16x128xi1>, vector<16x128xf32>
    %c3_i32_193 = arith.constant 3 : i32
    %361 = vector.broadcast %c3_i32_193 : i32 to vector<16x128xi32>
    %362 = arith.cmpi eq, %347, %361 : vector<16x128xi32>
    %363 = vector.broadcast %3 : f32 to vector<16x128xf32>
    %364 = arith.select %362, %363, %360 : vector<16x128xi1>, vector<16x128xf32>
    %c4_i32_194 = arith.constant 4 : i32
    %365 = vector.broadcast %c4_i32_194 : i32 to vector<16x128xi32>
    %366 = arith.cmpi eq, %347, %365 : vector<16x128xi32>
    %367 = vector.broadcast %4 : f32 to vector<16x128xf32>
    %368 = arith.select %366, %367, %364 : vector<16x128xi1>, vector<16x128xf32>
    %c5_i32_195 = arith.constant 5 : i32
    %369 = vector.broadcast %c5_i32_195 : i32 to vector<16x128xi32>
    %370 = arith.cmpi eq, %347, %369 : vector<16x128xi32>
    %371 = vector.broadcast %5 : f32 to vector<16x128xf32>
    %372 = arith.select %370, %371, %368 : vector<16x128xi1>, vector<16x128xf32>
    %c0_196 = arith.constant 0 : index
    %c7_197 = arith.constant 7 : index
    %c0_198 = arith.constant 0 : index
    %c0_199 = arith.constant 0 : index
    %373 = vector.load %arg6[%c0_196, %c7_197, %c0_198, %c0_199] : memref<1x18x16x128xbf16, #tpu.memory_space<vmem>>, vector<1x1x16x128xbf16>
    %374 = vector.shape_cast %373 : vector<1x1x16x128xbf16> to vector<16x128xbf16>
    %375 = arith.extf %374 : vector<16x128xbf16> to vector<16x128xf32>
    %376 = arith.addf %372, %375 : vector<16x128xf32>
    %377 = vector.broadcast %6 : f32 to vector<16x128xf32>
    %378 = arith.mulf %377, %376 : vector<16x128xf32>
    %c7_200 = arith.constant 7 : index
    %c0_201 = arith.constant 0 : index
    %c0_202 = arith.constant 0 : index
    %379 = vector.load %arg10[%c7_200, %c0_201, %c0_202] : memref<16x16x128xf32, #tpu.memory_space<vmem>>, vector<1x16x128xf32>
    %380 = vector.shape_cast %379 : vector<1x16x128xf32> to vector<16x128xf32>
    %381 = vector.shape_cast %378 : vector<16x128xf32> to vector<1x16x128xf32>
    tpu.vector_store %arg10[%c7_200, %c0_201, %c0_202], %381 {strides = array<i32>} : memref<16x16x128xf32, #tpu.memory_space<vmem>>, vector<1x16x128xf32>,
    %c6_203 = arith.constant 6 : index
    %c0_204 = arith.constant 0 : index
    %c0_205 = arith.constant 0 : index
    %382 = vector.load %arg10[%c6_203, %c0_204, %c0_205] : memref<16x16x128xf32, #tpu.memory_space<vmem>>, vector<1x16x128xf32>
    %383 = vector.shape_cast %382 : vector<1x16x128xf32> to vector<16x128xf32>
    %384 = vector.broadcast %7 : f32 to vector<16x128xf32>
    %385 = arith.mulf %384, %376 : vector<16x128xf32>
    %386 = arith.addf %383, %385 : vector<16x128xf32>
    %c6_206 = arith.constant 6 : index
    %c0_207 = arith.constant 0 : index
    %c0_208 = arith.constant 0 : index
    %387 = vector.load %arg10[%c6_206, %c0_207, %c0_208] : memref<16x16x128xf32, #tpu.memory_space<vmem>>, vector<1x16x128xf32>
    %388 = vector.shape_cast %387 : vector<1x16x128xf32> to vector<16x128xf32>
    %389 = vector.shape_cast %386 : vector<16x128xf32> to vector<1x16x128xf32>
    tpu.vector_store %arg10[%c6_206, %c0_207, %c0_208], %389 {strides = array<i32>} : memref<16x16x128xf32, #tpu.memory_space<vmem>>, vector<1x16x128xf32>,
    %c5_209 = arith.constant 5 : index
    %c0_210 = arith.constant 0 : index
    %c0_211 = arith.constant 0 : index
    %390 = vector.load %arg10[%c5_209, %c0_210, %c0_211] : memref<16x16x128xf32, #tpu.memory_space<vmem>>, vector<1x16x128xf32>
    %391 = vector.shape_cast %390 : vector<1x16x128xf32> to vector<16x128xf32>
    %392 = arith.addf %391, %378 : vector<16x128xf32>
    %c5_212 = arith.constant 5 : index
    %c0_213 = arith.constant 0 : index
    %c0_214 = arith.constant 0 : index
    %393 = vector.load %arg10[%c5_212, %c0_213, %c0_214] : memref<16x16x128xf32, #tpu.memory_space<vmem>>, vector<1x16x128xf32>
    %394 = vector.shape_cast %393 : vector<1x16x128xf32> to vector<16x128xf32>
    %395 = vector.shape_cast %392 : vector<16x128xf32> to vector<1x16x128xf32>
    tpu.vector_store %arg10[%c5_212, %c0_213, %c0_214], %395 {strides = array<i32>} : memref<16x16x128xf32, #tpu.memory_space<vmem>>, vector<1x16x128xf32>,
    %c0_215 = arith.constant 0 : index
    %c8 = arith.constant 8 : index
    %c0_216 = arith.constant 0 : index
    %c0_217 = arith.constant 0 : index
    %396 = vector.load %arg5[%c0_215, %c8, %c0_216, %c0_217] : memref<1x18x16x128xi8, #tpu.memory_space<vmem>>, vector<1x1x16x128xi8>
    %397 = vector.shape_cast %396 : vector<1x1x16x128xi8> to vector<16x128xi8>
    %398 = arith.extsi %397 : vector<16x128xi8> to vector<16x128xi32>
    %cst_218 = arith.constant 0.000000e+00 : f32
    %399 = vector.broadcast %cst_218 : f32 to vector<16x128xf32>
    %c0_i32_219 = arith.constant 0 : i32
    %400 = vector.broadcast %c0_i32_219 : i32 to vector<16x128xi32>
    %401 = arith.cmpi eq, %398, %400 : vector<16x128xi32>
    %402 = vector.broadcast %0 : f32 to vector<16x128xf32>
    %403 = arith.select %401, %402, %399 : vector<16x128xi1>, vector<16x128xf32>
    %c1_i32_220 = arith.constant 1 : i32
    %404 = vector.broadcast %c1_i32_220 : i32 to vector<16x128xi32>
    %405 = arith.cmpi eq, %398, %404 : vector<16x128xi32>
    %406 = vector.broadcast %1 : f32 to vector<16x128xf32>
    %407 = arith.select %405, %406, %403 : vector<16x128xi1>, vector<16x128xf32>
    %c2_i32_221 = arith.constant 2 : i32
    %408 = vector.broadcast %c2_i32_221 : i32 to vector<16x128xi32>
    %409 = arith.cmpi eq, %398, %408 : vector<16x128xi32>
    %410 = vector.broadcast %2 : f32 to vector<16x128xf32>
    %411 = arith.select %409, %410, %407 : vector<16x128xi1>, vector<16x128xf32>
    %c3_i32_222 = arith.constant 3 : i32
    %412 = vector.broadcast %c3_i32_222 : i32 to vector<16x128xi32>
    %413 = arith.cmpi eq, %398, %412 : vector<16x128xi32>
    %414 = vector.broadcast %3 : f32 to vector<16x128xf32>
    %415 = arith.select %413, %414, %411 : vector<16x128xi1>, vector<16x128xf32>
    %c4_i32_223 = arith.constant 4 : i32
    %416 = vector.broadcast %c4_i32_223 : i32 to vector<16x128xi32>
    %417 = arith.cmpi eq, %398, %416 : vector<16x128xi32>
    %418 = vector.broadcast %4 : f32 to vector<16x128xf32>
    %419 = arith.select %417, %418, %415 : vector<16x128xi1>, vector<16x128xf32>
    %c5_i32_224 = arith.constant 5 : i32
    %420 = vector.broadcast %c5_i32_224 : i32 to vector<16x128xi32>
    %421 = arith.cmpi eq, %398, %420 : vector<16x128xi32>
    %422 = vector.broadcast %5 : f32 to vector<16x128xf32>
    %423 = arith.select %421, %422, %419 : vector<16x128xi1>, vector<16x128xf32>
    %c0_225 = arith.constant 0 : index
    %c8_226 = arith.constant 8 : index
    %c0_227 = arith.constant 0 : index
    %c0_228 = arith.constant 0 : index
    %424 = vector.load %arg6[%c0_225, %c8_226, %c0_227, %c0_228] : memref<1x18x16x128xbf16, #tpu.memory_space<vmem>>, vector<1x1x16x128xbf16>
    %425 = vector.shape_cast %424 : vector<1x1x16x128xbf16> to vector<16x128xbf16>
    %426 = arith.extf %425 : vector<16x128xbf16> to vector<16x128xf32>
    %427 = arith.addf %423, %426 : vector<16x128xf32>
    %428 = vector.broadcast %6 : f32 to vector<16x128xf32>
    %429 = arith.mulf %428, %427 : vector<16x128xf32>
    %c8_229 = arith.constant 8 : index
    %c0_230 = arith.constant 0 : index
    %c0_231 = arith.constant 0 : index
    %430 = vector.load %arg10[%c8_229, %c0_230, %c0_231] : memref<16x16x128xf32, #tpu.memory_space<vmem>>, vector<1x16x128xf32>
    %431 = vector.shape_cast %430 : vector<1x16x128xf32> to vector<16x128xf32>
    %432 = vector.shape_cast %429 : vector<16x128xf32> to vector<1x16x128xf32>
    tpu.vector_store %arg10[%c8_229, %c0_230, %c0_231], %432 {strides = array<i32>} : memref<16x16x128xf32, #tpu.memory_space<vmem>>, vector<1x16x128xf32>,
    %c7_232 = arith.constant 7 : index
    %c0_233 = arith.constant 0 : index
    %c0_234 = arith.constant 0 : index
    %433 = vector.load %arg10[%c7_232, %c0_233, %c0_234] : memref<16x16x128xf32, #tpu.memory_space<vmem>>, vector<1x16x128xf32>
    %434 = vector.shape_cast %433 : vector<1x16x128xf32> to vector<16x128xf32>
    %435 = vector.broadcast %7 : f32 to vector<16x128xf32>
    %436 = arith.mulf %435, %427 : vector<16x128xf32>
    %437 = arith.addf %434, %436 : vector<16x128xf32>
    %c7_235 = arith.constant 7 : index
    %c0_236 = arith.constant 0 : index
    %c0_237 = arith.constant 0 : index
    %438 = vector.load %arg10[%c7_235, %c0_236, %c0_237] : memref<16x16x128xf32, #tpu.memory_space<vmem>>, vector<1x16x128xf32>
    %439 = vector.shape_cast %438 : vector<1x16x128xf32> to vector<16x128xf32>
    %440 = vector.shape_cast %437 : vector<16x128xf32> to vector<1x16x128xf32>
    tpu.vector_store %arg10[%c7_235, %c0_236, %c0_237], %440 {strides = array<i32>} : memref<16x16x128xf32, #tpu.memory_space<vmem>>, vector<1x16x128xf32>,
    %c6_238 = arith.constant 6 : index
    %c0_239 = arith.constant 0 : index
    %c0_240 = arith.constant 0 : index
    %441 = vector.load %arg10[%c6_238, %c0_239, %c0_240] : memref<16x16x128xf32, #tpu.memory_space<vmem>>, vector<1x16x128xf32>
    %442 = vector.shape_cast %441 : vector<1x16x128xf32> to vector<16x128xf32>
    %443 = arith.addf %442, %429 : vector<16x128xf32>
    %c6_241 = arith.constant 6 : index
    %c0_242 = arith.constant 0 : index
    %c0_243 = arith.constant 0 : index
    %444 = vector.load %arg10[%c6_241, %c0_242, %c0_243] : memref<16x16x128xf32, #tpu.memory_space<vmem>>, vector<1x16x128xf32>
    %445 = vector.shape_cast %444 : vector<1x16x128xf32> to vector<16x128xf32>
    %446 = vector.shape_cast %443 : vector<16x128xf32> to vector<1x16x128xf32>
    tpu.vector_store %arg10[%c6_241, %c0_242, %c0_243], %446 {strides = array<i32>} : memref<16x16x128xf32, #tpu.memory_space<vmem>>, vector<1x16x128xf32>,
    %c0_244 = arith.constant 0 : index
    %c9 = arith.constant 9 : index
    %c0_245 = arith.constant 0 : index
    %c0_246 = arith.constant 0 : index
    %447 = vector.load %arg5[%c0_244, %c9, %c0_245, %c0_246] : memref<1x18x16x128xi8, #tpu.memory_space<vmem>>, vector<1x1x16x128xi8>
    %448 = vector.shape_cast %447 : vector<1x1x16x128xi8> to vector<16x128xi8>
    %449 = arith.extsi %448 : vector<16x128xi8> to vector<16x128xi32>
    %cst_247 = arith.constant 0.000000e+00 : f32
    %450 = vector.broadcast %cst_247 : f32 to vector<16x128xf32>
    %c0_i32_248 = arith.constant 0 : i32
    %451 = vector.broadcast %c0_i32_248 : i32 to vector<16x128xi32>
    %452 = arith.cmpi eq, %449, %451 : vector<16x128xi32>
    %453 = vector.broadcast %0 : f32 to vector<16x128xf32>
    %454 = arith.select %452, %453, %450 : vector<16x128xi1>, vector<16x128xf32>
    %c1_i32_249 = arith.constant 1 : i32
    %455 = vector.broadcast %c1_i32_249 : i32 to vector<16x128xi32>
    %456 = arith.cmpi eq, %449, %455 : vector<16x128xi32>
    %457 = vector.broadcast %1 : f32 to vector<16x128xf32>
    %458 = arith.select %456, %457, %454 : vector<16x128xi1>, vector<16x128xf32>
    %c2_i32_250 = arith.constant 2 : i32
    %459 = vector.broadcast %c2_i32_250 : i32 to vector<16x128xi32>
    %460 = arith.cmpi eq, %449, %459 : vector<16x128xi32>
    %461 = vector.broadcast %2 : f32 to vector<16x128xf32>
    %462 = arith.select %460, %461, %458 : vector<16x128xi1>, vector<16x128xf32>
    %c3_i32_251 = arith.constant 3 : i32
    %463 = vector.broadcast %c3_i32_251 : i32 to vector<16x128xi32>
    %464 = arith.cmpi eq, %449, %463 : vector<16x128xi32>
    %465 = vector.broadcast %3 : f32 to vector<16x128xf32>
    %466 = arith.select %464, %465, %462 : vector<16x128xi1>, vector<16x128xf32>
    %c4_i32_252 = arith.constant 4 : i32
    %467 = vector.broadcast %c4_i32_252 : i32 to vector<16x128xi32>
    %468 = arith.cmpi eq, %449, %467 : vector<16x128xi32>
    %469 = vector.broadcast %4 : f32 to vector<16x128xf32>
    %470 = arith.select %468, %469, %466 : vector<16x128xi1>, vector<16x128xf32>
    %c5_i32_253 = arith.constant 5 : i32
    %471 = vector.broadcast %c5_i32_253 : i32 to vector<16x128xi32>
    %472 = arith.cmpi eq, %449, %471 : vector<16x128xi32>
    %473 = vector.broadcast %5 : f32 to vector<16x128xf32>
    %474 = arith.select %472, %473, %470 : vector<16x128xi1>, vector<16x128xf32>
    %c0_254 = arith.constant 0 : index
    %c9_255 = arith.constant 9 : index
    %c0_256 = arith.constant 0 : index
    %c0_257 = arith.constant 0 : index
    %475 = vector.load %arg6[%c0_254, %c9_255, %c0_256, %c0_257] : memref<1x18x16x128xbf16, #tpu.memory_space<vmem>>, vector<1x1x16x128xbf16>
    %476 = vector.shape_cast %475 : vector<1x1x16x128xbf16> to vector<16x128xbf16>
    %477 = arith.extf %476 : vector<16x128xbf16> to vector<16x128xf32>
    %478 = arith.addf %474, %477 : vector<16x128xf32>
    %479 = vector.broadcast %6 : f32 to vector<16x128xf32>
    %480 = arith.mulf %479, %478 : vector<16x128xf32>
    %c9_258 = arith.constant 9 : index
    %c0_259 = arith.constant 0 : index
    %c0_260 = arith.constant 0 : index
    %481 = vector.load %arg10[%c9_258, %c0_259, %c0_260] : memref<16x16x128xf32, #tpu.memory_space<vmem>>, vector<1x16x128xf32>
    %482 = vector.shape_cast %481 : vector<1x16x128xf32> to vector<16x128xf32>
    %483 = vector.shape_cast %480 : vector<16x128xf32> to vector<1x16x128xf32>
    tpu.vector_store %arg10[%c9_258, %c0_259, %c0_260], %483 {strides = array<i32>} : memref<16x16x128xf32, #tpu.memory_space<vmem>>, vector<1x16x128xf32>,
    %c8_261 = arith.constant 8 : index
    %c0_262 = arith.constant 0 : index
    %c0_263 = arith.constant 0 : index
    %484 = vector.load %arg10[%c8_261, %c0_262, %c0_263] : memref<16x16x128xf32, #tpu.memory_space<vmem>>, vector<1x16x128xf32>
    %485 = vector.shape_cast %484 : vector<1x16x128xf32> to vector<16x128xf32>
    %486 = vector.broadcast %7 : f32 to vector<16x128xf32>
    %487 = arith.mulf %486, %478 : vector<16x128xf32>
    %488 = arith.addf %485, %487 : vector<16x128xf32>
    %c8_264 = arith.constant 8 : index
    %c0_265 = arith.constant 0 : index
    %c0_266 = arith.constant 0 : index
    %489 = vector.load %arg10[%c8_264, %c0_265, %c0_266] : memref<16x16x128xf32, #tpu.memory_space<vmem>>, vector<1x16x128xf32>
    %490 = vector.shape_cast %489 : vector<1x16x128xf32> to vector<16x128xf32>
    %491 = vector.shape_cast %488 : vector<16x128xf32> to vector<1x16x128xf32>
    tpu.vector_store %arg10[%c8_264, %c0_265, %c0_266], %491 {strides = array<i32>} : memref<16x16x128xf32, #tpu.memory_space<vmem>>, vector<1x16x128xf32>,
    %c7_267 = arith.constant 7 : index
    %c0_268 = arith.constant 0 : index
    %c0_269 = arith.constant 0 : index
    %492 = vector.load %arg10[%c7_267, %c0_268, %c0_269] : memref<16x16x128xf32, #tpu.memory_space<vmem>>, vector<1x16x128xf32>
    %493 = vector.shape_cast %492 : vector<1x16x128xf32> to vector<16x128xf32>
    %494 = arith.addf %493, %480 : vector<16x128xf32>
    %c7_270 = arith.constant 7 : index
    %c0_271 = arith.constant 0 : index
    %c0_272 = arith.constant 0 : index
    %495 = vector.load %arg10[%c7_270, %c0_271, %c0_272] : memref<16x16x128xf32, #tpu.memory_space<vmem>>, vector<1x16x128xf32>
    %496 = vector.shape_cast %495 : vector<1x16x128xf32> to vector<16x128xf32>
    %497 = vector.shape_cast %494 : vector<16x128xf32> to vector<1x16x128xf32>
    tpu.vector_store %arg10[%c7_270, %c0_271, %c0_272], %497 {strides = array<i32>} : memref<16x16x128xf32, #tpu.memory_space<vmem>>, vector<1x16x128xf32>,
    %c0_273 = arith.constant 0 : index
    %c10 = arith.constant 10 : index
    %c0_274 = arith.constant 0 : index
    %c0_275 = arith.constant 0 : index
    %498 = vector.load %arg5[%c0_273, %c10, %c0_274, %c0_275] : memref<1x18x16x128xi8, #tpu.memory_space<vmem>>, vector<1x1x16x128xi8>
    %499 = vector.shape_cast %498 : vector<1x1x16x128xi8> to vector<16x128xi8>
    %500 = arith.extsi %499 : vector<16x128xi8> to vector<16x128xi32>
    %cst_276 = arith.constant 0.000000e+00 : f32
    %501 = vector.broadcast %cst_276 : f32 to vector<16x128xf32>
    %c0_i32_277 = arith.constant 0 : i32
    %502 = vector.broadcast %c0_i32_277 : i32 to vector<16x128xi32>
    %503 = arith.cmpi eq, %500, %502 : vector<16x128xi32>
    %504 = vector.broadcast %0 : f32 to vector<16x128xf32>
    %505 = arith.select %503, %504, %501 : vector<16x128xi1>, vector<16x128xf32>
    %c1_i32_278 = arith.constant 1 : i32
    %506 = vector.broadcast %c1_i32_278 : i32 to vector<16x128xi32>
    %507 = arith.cmpi eq, %500, %506 : vector<16x128xi32>
    %508 = vector.broadcast %1 : f32 to vector<16x128xf32>
    %509 = arith.select %507, %508, %505 : vector<16x128xi1>, vector<16x128xf32>
    %c2_i32_279 = arith.constant 2 : i32
    %510 = vector.broadcast %c2_i32_279 : i32 to vector<16x128xi32>
    %511 = arith.cmpi eq, %500, %510 : vector<16x128xi32>
    %512 = vector.broadcast %2 : f32 to vector<16x128xf32>
    %513 = arith.select %511, %512, %509 : vector<16x128xi1>, vector<16x128xf32>
    %c3_i32_280 = arith.constant 3 : i32
    %514 = vector.broadcast %c3_i32_280 : i32 to vector<16x128xi32>
    %515 = arith.cmpi eq, %500, %514 : vector<16x128xi32>
    %516 = vector.broadcast %3 : f32 to vector<16x128xf32>
    %517 = arith.select %515, %516, %513 : vector<16x128xi1>, vector<16x128xf32>
    %c4_i32_281 = arith.constant 4 : i32
    %518 = vector.broadcast %c4_i32_281 : i32 to vector<16x128xi32>
    %519 = arith.cmpi eq, %500, %518 : vector<16x128xi32>
    %520 = vector.broadcast %4 : f32 to vector<16x128xf32>
    %521 = arith.select %519, %520, %517 : vector<16x128xi1>, vector<16x128xf32>
    %c5_i32_282 = arith.constant 5 : i32
    %522 = vector.broadcast %c5_i32_282 : i32 to vector<16x128xi32>
    %523 = arith.cmpi eq, %500, %522 : vector<16x128xi32>
    %524 = vector.broadcast %5 : f32 to vector<16x128xf32>
    %525 = arith.select %523, %524, %521 : vector<16x128xi1>, vector<16x128xf32>
    %c0_283 = arith.constant 0 : index
    %c10_284 = arith.constant 10 : index
    %c0_285 = arith.constant 0 : index
    %c0_286 = arith.constant 0 : index
    %526 = vector.load %arg6[%c0_283, %c10_284, %c0_285, %c0_286] : memref<1x18x16x128xbf16, #tpu.memory_space<vmem>>, vector<1x1x16x128xbf16>
    %527 = vector.shape_cast %526 : vector<1x1x16x128xbf16> to vector<16x128xbf16>
    %528 = arith.extf %527 : vector<16x128xbf16> to vector<16x128xf32>
    %529 = arith.addf %525, %528 : vector<16x128xf32>
    %530 = vector.broadcast %6 : f32 to vector<16x128xf32>
    %531 = arith.mulf %530, %529 : vector<16x128xf32>
    %c10_287 = arith.constant 10 : index
    %c0_288 = arith.constant 0 : index
    %c0_289 = arith.constant 0 : index
    %532 = vector.load %arg10[%c10_287, %c0_288, %c0_289] : memref<16x16x128xf32, #tpu.memory_space<vmem>>, vector<1x16x128xf32>
    %533 = vector.shape_cast %532 : vector<1x16x128xf32> to vector<16x128xf32>
    %534 = vector.shape_cast %531 : vector<16x128xf32> to vector<1x16x128xf32>
    tpu.vector_store %arg10[%c10_287, %c0_288, %c0_289], %534 {strides = array<i32>} : memref<16x16x128xf32, #tpu.memory_space<vmem>>, vector<1x16x128xf32>,
    %c9_290 = arith.constant 9 : index
    %c0_291 = arith.constant 0 : index
    %c0_292 = arith.constant 0 : index
    %535 = vector.load %arg10[%c9_290, %c0_291, %c0_292] : memref<16x16x128xf32, #tpu.memory_space<vmem>>, vector<1x16x128xf32>
    %536 = vector.shape_cast %535 : vector<1x16x128xf32> to vector<16x128xf32>
    %537 = vector.broadcast %7 : f32 to vector<16x128xf32>
    %538 = arith.mulf %537, %529 : vector<16x128xf32>
    %539 = arith.addf %536, %538 : vector<16x128xf32>
    %c9_293 = arith.constant 9 : index
    %c0_294 = arith.constant 0 : index
    %c0_295 = arith.constant 0 : index
    %540 = vector.load %arg10[%c9_293, %c0_294, %c0_295] : memref<16x16x128xf32, #tpu.memory_space<vmem>>, vector<1x16x128xf32>
    %541 = vector.shape_cast %540 : vector<1x16x128xf32> to vector<16x128xf32>
    %542 = vector.shape_cast %539 : vector<16x128xf32> to vector<1x16x128xf32>
    tpu.vector_store %arg10[%c9_293, %c0_294, %c0_295], %542 {strides = array<i32>} : memref<16x16x128xf32, #tpu.memory_space<vmem>>, vector<1x16x128xf32>,
    %c8_296 = arith.constant 8 : index
    %c0_297 = arith.constant 0 : index
    %c0_298 = arith.constant 0 : index
    %543 = vector.load %arg10[%c8_296, %c0_297, %c0_298] : memref<16x16x128xf32, #tpu.memory_space<vmem>>, vector<1x16x128xf32>
    %544 = vector.shape_cast %543 : vector<1x16x128xf32> to vector<16x128xf32>
    %545 = arith.addf %544, %531 : vector<16x128xf32>
    %c8_299 = arith.constant 8 : index
    %c0_300 = arith.constant 0 : index
    %c0_301 = arith.constant 0 : index
    %546 = vector.load %arg10[%c8_299, %c0_300, %c0_301] : memref<16x16x128xf32, #tpu.memory_space<vmem>>, vector<1x16x128xf32>
    %547 = vector.shape_cast %546 : vector<1x16x128xf32> to vector<16x128xf32>
    %548 = vector.shape_cast %545 : vector<16x128xf32> to vector<1x16x128xf32>
    tpu.vector_store %arg10[%c8_299, %c0_300, %c0_301], %548 {strides = array<i32>} : memref<16x16x128xf32, #tpu.memory_space<vmem>>, vector<1x16x128xf32>,
    %c0_302 = arith.constant 0 : index
    %c11 = arith.constant 11 : index
    %c0_303 = arith.constant 0 : index
    %c0_304 = arith.constant 0 : index
    %549 = vector.load %arg5[%c0_302, %c11, %c0_303, %c0_304] : memref<1x18x16x128xi8, #tpu.memory_space<vmem>>, vector<1x1x16x128xi8>
    %550 = vector.shape_cast %549 : vector<1x1x16x128xi8> to vector<16x128xi8>
    %551 = arith.extsi %550 : vector<16x128xi8> to vector<16x128xi32>
    %cst_305 = arith.constant 0.000000e+00 : f32
    %552 = vector.broadcast %cst_305 : f32 to vector<16x128xf32>
    %c0_i32_306 = arith.constant 0 : i32
    %553 = vector.broadcast %c0_i32_306 : i32 to vector<16x128xi32>
    %554 = arith.cmpi eq, %551, %553 : vector<16x128xi32>
    %555 = vector.broadcast %0 : f32 to vector<16x128xf32>
    %556 = arith.select %554, %555, %552 : vector<16x128xi1>, vector<16x128xf32>
    %c1_i32_307 = arith.constant 1 : i32
    %557 = vector.broadcast %c1_i32_307 : i32 to vector<16x128xi32>
    %558 = arith.cmpi eq, %551, %557 : vector<16x128xi32>
    %559 = vector.broadcast %1 : f32 to vector<16x128xf32>
    %560 = arith.select %558, %559, %556 : vector<16x128xi1>, vector<16x128xf32>
    %c2_i32_308 = arith.constant 2 : i32
    %561 = vector.broadcast %c2_i32_308 : i32 to vector<16x128xi32>
    %562 = arith.cmpi eq, %551, %561 : vector<16x128xi32>
    %563 = vector.broadcast %2 : f32 to vector<16x128xf32>
    %564 = arith.select %562, %563, %560 : vector<16x128xi1>, vector<16x128xf32>
    %c3_i32_309 = arith.constant 3 : i32
    %565 = vector.broadcast %c3_i32_309 : i32 to vector<16x128xi32>
    %566 = arith.cmpi eq, %551, %565 : vector<16x128xi32>
    %567 = vector.broadcast %3 : f32 to vector<16x128xf32>
    %568 = arith.select %566, %567, %564 : vector<16x128xi1>, vector<16x128xf32>
    %c4_i32_310 = arith.constant 4 : i32
    %569 = vector.broadcast %c4_i32_310 : i32 to vector<16x128xi32>
    %570 = arith.cmpi eq, %551, %569 : vector<16x128xi32>
    %571 = vector.broadcast %4 : f32 to vector<16x128xf32>
    %572 = arith.select %570, %571, %568 : vector<16x128xi1>, vector<16x128xf32>
    %c5_i32_311 = arith.constant 5 : i32
    %573 = vector.broadcast %c5_i32_311 : i32 to vector<16x128xi32>
    %574 = arith.cmpi eq, %551, %573 : vector<16x128xi32>
    %575 = vector.broadcast %5 : f32 to vector<16x128xf32>
    %576 = arith.select %574, %575, %572 : vector<16x128xi1>, vector<16x128xf32>
    %c0_312 = arith.constant 0 : index
    %c11_313 = arith.constant 11 : index
    %c0_314 = arith.constant 0 : index
    %c0_315 = arith.constant 0 : index
    %577 = vector.load %arg6[%c0_312, %c11_313, %c0_314, %c0_315] : memref<1x18x16x128xbf16, #tpu.memory_space<vmem>>, vector<1x1x16x128xbf16>
    %578 = vector.shape_cast %577 : vector<1x1x16x128xbf16> to vector<16x128xbf16>
    %579 = arith.extf %578 : vector<16x128xbf16> to vector<16x128xf32>
    %580 = arith.addf %576, %579 : vector<16x128xf32>
    %581 = vector.broadcast %6 : f32 to vector<16x128xf32>
    %582 = arith.mulf %581, %580 : vector<16x128xf32>
    %c11_316 = arith.constant 11 : index
    %c0_317 = arith.constant 0 : index
    %c0_318 = arith.constant 0 : index
    %583 = vector.load %arg10[%c11_316, %c0_317, %c0_318] : memref<16x16x128xf32, #tpu.memory_space<vmem>>, vector<1x16x128xf32>
    %584 = vector.shape_cast %583 : vector<1x16x128xf32> to vector<16x128xf32>
    %585 = vector.shape_cast %582 : vector<16x128xf32> to vector<1x16x128xf32>
    tpu.vector_store %arg10[%c11_316, %c0_317, %c0_318], %585 {strides = array<i32>} : memref<16x16x128xf32, #tpu.memory_space<vmem>>, vector<1x16x128xf32>,
    %c10_319 = arith.constant 10 : index
    %c0_320 = arith.constant 0 : index
    %c0_321 = arith.constant 0 : index
    %586 = vector.load %arg10[%c10_319, %c0_320, %c0_321] : memref<16x16x128xf32, #tpu.memory_space<vmem>>, vector<1x16x128xf32>
    %587 = vector.shape_cast %586 : vector<1x16x128xf32> to vector<16x128xf32>
    %588 = vector.broadcast %7 : f32 to vector<16x128xf32>
    %589 = arith.mulf %588, %580 : vector<16x128xf32>
    %590 = arith.addf %587, %589 : vector<16x128xf32>
    %c10_322 = arith.constant 10 : index
    %c0_323 = arith.constant 0 : index
    %c0_324 = arith.constant 0 : index
    %591 = vector.load %arg10[%c10_322, %c0_323, %c0_324] : memref<16x16x128xf32, #tpu.memory_space<vmem>>, vector<1x16x128xf32>
    %592 = vector.shape_cast %591 : vector<1x16x128xf32> to vector<16x128xf32>
    %593 = vector.shape_cast %590 : vector<16x128xf32> to vector<1x16x128xf32>
    tpu.vector_store %arg10[%c10_322, %c0_323, %c0_324], %593 {strides = array<i32>} : memref<16x16x128xf32, #tpu.memory_space<vmem>>, vector<1x16x128xf32>,
    %c9_325 = arith.constant 9 : index
    %c0_326 = arith.constant 0 : index
    %c0_327 = arith.constant 0 : index
    %594 = vector.load %arg10[%c9_325, %c0_326, %c0_327] : memref<16x16x128xf32, #tpu.memory_space<vmem>>, vector<1x16x128xf32>
    %595 = vector.shape_cast %594 : vector<1x16x128xf32> to vector<16x128xf32>
    %596 = arith.addf %595, %582 : vector<16x128xf32>
    %c9_328 = arith.constant 9 : index
    %c0_329 = arith.constant 0 : index
    %c0_330 = arith.constant 0 : index
    %597 = vector.load %arg10[%c9_328, %c0_329, %c0_330] : memref<16x16x128xf32, #tpu.memory_space<vmem>>, vector<1x16x128xf32>
    %598 = vector.shape_cast %597 : vector<1x16x128xf32> to vector<16x128xf32>
    %599 = vector.shape_cast %596 : vector<16x128xf32> to vector<1x16x128xf32>
    tpu.vector_store %arg10[%c9_328, %c0_329, %c0_330], %599 {strides = array<i32>} : memref<16x16x128xf32, #tpu.memory_space<vmem>>, vector<1x16x128xf32>,
    %c0_331 = arith.constant 0 : index
    %c12 = arith.constant 12 : index
    %c0_332 = arith.constant 0 : index
    %c0_333 = arith.constant 0 : index
    %600 = vector.load %arg5[%c0_331, %c12, %c0_332, %c0_333] : memref<1x18x16x128xi8, #tpu.memory_space<vmem>>, vector<1x1x16x128xi8>
    %601 = vector.shape_cast %600 : vector<1x1x16x128xi8> to vector<16x128xi8>
    %602 = arith.extsi %601 : vector<16x128xi8> to vector<16x128xi32>
    %cst_334 = arith.constant 0.000000e+00 : f32
    %603 = vector.broadcast %cst_334 : f32 to vector<16x128xf32>
    %c0_i32_335 = arith.constant 0 : i32
    %604 = vector.broadcast %c0_i32_335 : i32 to vector<16x128xi32>
    %605 = arith.cmpi eq, %602, %604 : vector<16x128xi32>
    %606 = vector.broadcast %0 : f32 to vector<16x128xf32>
    %607 = arith.select %605, %606, %603 : vector<16x128xi1>, vector<16x128xf32>
    %c1_i32_336 = arith.constant 1 : i32
    %608 = vector.broadcast %c1_i32_336 : i32 to vector<16x128xi32>
    %609 = arith.cmpi eq, %602, %608 : vector<16x128xi32>
    %610 = vector.broadcast %1 : f32 to vector<16x128xf32>
    %611 = arith.select %609, %610, %607 : vector<16x128xi1>, vector<16x128xf32>
    %c2_i32_337 = arith.constant 2 : i32
    %612 = vector.broadcast %c2_i32_337 : i32 to vector<16x128xi32>
    %613 = arith.cmpi eq, %602, %612 : vector<16x128xi32>
    %614 = vector.broadcast %2 : f32 to vector<16x128xf32>
    %615 = arith.select %613, %614, %611 : vector<16x128xi1>, vector<16x128xf32>
    %c3_i32_338 = arith.constant 3 : i32
    %616 = vector.broadcast %c3_i32_338 : i32 to vector<16x128xi32>
    %617 = arith.cmpi eq, %602, %616 : vector<16x128xi32>
    %618 = vector.broadcast %3 : f32 to vector<16x128xf32>
    %619 = arith.select %617, %618, %615 : vector<16x128xi1>, vector<16x128xf32>
    %c4_i32_339 = arith.constant 4 : i32
    %620 = vector.broadcast %c4_i32_339 : i32 to vector<16x128xi32>
    %621 = arith.cmpi eq, %602, %620 : vector<16x128xi32>
    %622 = vector.broadcast %4 : f32 to vector<16x128xf32>
    %623 = arith.select %621, %622, %619 : vector<16x128xi1>, vector<16x128xf32>
    %c5_i32_340 = arith.constant 5 : i32
    %624 = vector.broadcast %c5_i32_340 : i32 to vector<16x128xi32>
    %625 = arith.cmpi eq, %602, %624 : vector<16x128xi32>
    %626 = vector.broadcast %5 : f32 to vector<16x128xf32>
    %627 = arith.select %625, %626, %623 : vector<16x128xi1>, vector<16x128xf32>
    %c0_341 = arith.constant 0 : index
    %c12_342 = arith.constant 12 : index
    %c0_343 = arith.constant 0 : index
    %c0_344 = arith.constant 0 : index
    %628 = vector.load %arg6[%c0_341, %c12_342, %c0_343, %c0_344] : memref<1x18x16x128xbf16, #tpu.memory_space<vmem>>, vector<1x1x16x128xbf16>
    %629 = vector.shape_cast %628 : vector<1x1x16x128xbf16> to vector<16x128xbf16>
    %630 = arith.extf %629 : vector<16x128xbf16> to vector<16x128xf32>
    %631 = arith.addf %627, %630 : vector<16x128xf32>
    %632 = vector.broadcast %6 : f32 to vector<16x128xf32>
    %633 = arith.mulf %632, %631 : vector<16x128xf32>
    %c12_345 = arith.constant 12 : index
    %c0_346 = arith.constant 0 : index
    %c0_347 = arith.constant 0 : index
    %634 = vector.load %arg10[%c12_345, %c0_346, %c0_347] : memref<16x16x128xf32, #tpu.memory_space<vmem>>, vector<1x16x128xf32>
    %635 = vector.shape_cast %634 : vector<1x16x128xf32> to vector<16x128xf32>
    %636 = vector.shape_cast %633 : vector<16x128xf32> to vector<1x16x128xf32>
    tpu.vector_store %arg10[%c12_345, %c0_346, %c0_347], %636 {strides = array<i32>} : memref<16x16x128xf32, #tpu.memory_space<vmem>>, vector<1x16x128xf32>,
    %c11_348 = arith.constant 11 : index
    %c0_349 = arith.constant 0 : index
    %c0_350 = arith.constant 0 : index
    %637 = vector.load %arg10[%c11_348, %c0_349, %c0_350] : memref<16x16x128xf32, #tpu.memory_space<vmem>>, vector<1x16x128xf32>
    %638 = vector.shape_cast %637 : vector<1x16x128xf32> to vector<16x128xf32>
    %639 = vector.broadcast %7 : f32 to vector<16x128xf32>
    %640 = arith.mulf %639, %631 : vector<16x128xf32>
    %641 = arith.addf %638, %640 : vector<16x128xf32>
    %c11_351 = arith.constant 11 : index
    %c0_352 = arith.constant 0 : index
    %c0_353 = arith.constant 0 : index
    %642 = vector.load %arg10[%c11_351, %c0_352, %c0_353] : memref<16x16x128xf32, #tpu.memory_space<vmem>>, vector<1x16x128xf32>
    %643 = vector.shape_cast %642 : vector<1x16x128xf32> to vector<16x128xf32>
    %644 = vector.shape_cast %641 : vector<16x128xf32> to vector<1x16x128xf32>
    tpu.vector_store %arg10[%c11_351, %c0_352, %c0_353], %644 {strides = array<i32>} : memref<16x16x128xf32, #tpu.memory_space<vmem>>, vector<1x16x128xf32>,
    %c10_354 = arith.constant 10 : index
    %c0_355 = arith.constant 0 : index
    %c0_356 = arith.constant 0 : index
    %645 = vector.load %arg10[%c10_354, %c0_355, %c0_356] : memref<16x16x128xf32, #tpu.memory_space<vmem>>, vector<1x16x128xf32>
    %646 = vector.shape_cast %645 : vector<1x16x128xf32> to vector<16x128xf32>
    %647 = arith.addf %646, %633 : vector<16x128xf32>
    %c10_357 = arith.constant 10 : index
    %c0_358 = arith.constant 0 : index
    %c0_359 = arith.constant 0 : index
    %648 = vector.load %arg10[%c10_357, %c0_358, %c0_359] : memref<16x16x128xf32, #tpu.memory_space<vmem>>, vector<1x16x128xf32>
    %649 = vector.shape_cast %648 : vector<1x16x128xf32> to vector<16x128xf32>
    %650 = vector.shape_cast %647 : vector<16x128xf32> to vector<1x16x128xf32>
    tpu.vector_store %arg10[%c10_357, %c0_358, %c0_359], %650 {strides = array<i32>} : memref<16x16x128xf32, #tpu.memory_space<vmem>>, vector<1x16x128xf32>,
    %c0_360 = arith.constant 0 : index
    %c13 = arith.constant 13 : index
    %c0_361 = arith.constant 0 : index
    %c0_362 = arith.constant 0 : index
    %651 = vector.load %arg5[%c0_360, %c13, %c0_361, %c0_362] : memref<1x18x16x128xi8, #tpu.memory_space<vmem>>, vector<1x1x16x128xi8>
    %652 = vector.shape_cast %651 : vector<1x1x16x128xi8> to vector<16x128xi8>
    %653 = arith.extsi %652 : vector<16x128xi8> to vector<16x128xi32>
    %cst_363 = arith.constant 0.000000e+00 : f32
    %654 = vector.broadcast %cst_363 : f32 to vector<16x128xf32>
    %c0_i32_364 = arith.constant 0 : i32
    %655 = vector.broadcast %c0_i32_364 : i32 to vector<16x128xi32>
    %656 = arith.cmpi eq, %653, %655 : vector<16x128xi32>
    %657 = vector.broadcast %0 : f32 to vector<16x128xf32>
    %658 = arith.select %656, %657, %654 : vector<16x128xi1>, vector<16x128xf32>
    %c1_i32_365 = arith.constant 1 : i32
    %659 = vector.broadcast %c1_i32_365 : i32 to vector<16x128xi32>
    %660 = arith.cmpi eq, %653, %659 : vector<16x128xi32>
    %661 = vector.broadcast %1 : f32 to vector<16x128xf32>
    %662 = arith.select %660, %661, %658 : vector<16x128xi1>, vector<16x128xf32>
    %c2_i32_366 = arith.constant 2 : i32
    %663 = vector.broadcast %c2_i32_366 : i32 to vector<16x128xi32>
    %664 = arith.cmpi eq, %653, %663 : vector<16x128xi32>
    %665 = vector.broadcast %2 : f32 to vector<16x128xf32>
    %666 = arith.select %664, %665, %662 : vector<16x128xi1>, vector<16x128xf32>
    %c3_i32_367 = arith.constant 3 : i32
    %667 = vector.broadcast %c3_i32_367 : i32 to vector<16x128xi32>
    %668 = arith.cmpi eq, %653, %667 : vector<16x128xi32>
    %669 = vector.broadcast %3 : f32 to vector<16x128xf32>
    %670 = arith.select %668, %669, %666 : vector<16x128xi1>, vector<16x128xf32>
    %c4_i32_368 = arith.constant 4 : i32
    %671 = vector.broadcast %c4_i32_368 : i32 to vector<16x128xi32>
    %672 = arith.cmpi eq, %653, %671 : vector<16x128xi32>
    %673 = vector.broadcast %4 : f32 to vector<16x128xf32>
    %674 = arith.select %672, %673, %670 : vector<16x128xi1>, vector<16x128xf32>
    %c5_i32_369 = arith.constant 5 : i32
    %675 = vector.broadcast %c5_i32_369 : i32 to vector<16x128xi32>
    %676 = arith.cmpi eq, %653, %675 : vector<16x128xi32>
    %677 = vector.broadcast %5 : f32 to vector<16x128xf32>
    %678 = arith.select %676, %677, %674 : vector<16x128xi1>, vector<16x128xf32>
    %c0_370 = arith.constant 0 : index
    %c13_371 = arith.constant 13 : index
    %c0_372 = arith.constant 0 : index
    %c0_373 = arith.constant 0 : index
    %679 = vector.load %arg6[%c0_370, %c13_371, %c0_372, %c0_373] : memref<1x18x16x128xbf16, #tpu.memory_space<vmem>>, vector<1x1x16x128xbf16>
    %680 = vector.shape_cast %679 : vector<1x1x16x128xbf16> to vector<16x128xbf16>
    %681 = arith.extf %680 : vector<16x128xbf16> to vector<16x128xf32>
    %682 = arith.addf %678, %681 : vector<16x128xf32>
    %683 = vector.broadcast %6 : f32 to vector<16x128xf32>
    %684 = arith.mulf %683, %682 : vector<16x128xf32>
    %c13_374 = arith.constant 13 : index
    %c0_375 = arith.constant 0 : index
    %c0_376 = arith.constant 0 : index
    %685 = vector.load %arg10[%c13_374, %c0_375, %c0_376] : memref<16x16x128xf32, #tpu.memory_space<vmem>>, vector<1x16x128xf32>
    %686 = vector.shape_cast %685 : vector<1x16x128xf32> to vector<16x128xf32>
    %687 = vector.shape_cast %684 : vector<16x128xf32> to vector<1x16x128xf32>
    tpu.vector_store %arg10[%c13_374, %c0_375, %c0_376], %687 {strides = array<i32>} : memref<16x16x128xf32, #tpu.memory_space<vmem>>, vector<1x16x128xf32>,
    %c12_377 = arith.constant 12 : index
    %c0_378 = arith.constant 0 : index
    %c0_379 = arith.constant 0 : index
    %688 = vector.load %arg10[%c12_377, %c0_378, %c0_379] : memref<16x16x128xf32, #tpu.memory_space<vmem>>, vector<1x16x128xf32>
    %689 = vector.shape_cast %688 : vector<1x16x128xf32> to vector<16x128xf32>
    %690 = vector.broadcast %7 : f32 to vector<16x128xf32>
    %691 = arith.mulf %690, %682 : vector<16x128xf32>
    %692 = arith.addf %689, %691 : vector<16x128xf32>
    %c12_380 = arith.constant 12 : index
    %c0_381 = arith.constant 0 : index
    %c0_382 = arith.constant 0 : index
    %693 = vector.load %arg10[%c12_380, %c0_381, %c0_382] : memref<16x16x128xf32, #tpu.memory_space<vmem>>, vector<1x16x128xf32>
    %694 = vector.shape_cast %693 : vector<1x16x128xf32> to vector<16x128xf32>
    %695 = vector.shape_cast %692 : vector<16x128xf32> to vector<1x16x128xf32>
    tpu.vector_store %arg10[%c12_380, %c0_381, %c0_382], %695 {strides = array<i32>} : memref<16x16x128xf32, #tpu.memory_space<vmem>>, vector<1x16x128xf32>,
    %c11_383 = arith.constant 11 : index
    %c0_384 = arith.constant 0 : index
    %c0_385 = arith.constant 0 : index
    %696 = vector.load %arg10[%c11_383, %c0_384, %c0_385] : memref<16x16x128xf32, #tpu.memory_space<vmem>>, vector<1x16x128xf32>
    %697 = vector.shape_cast %696 : vector<1x16x128xf32> to vector<16x128xf32>
    %698 = arith.addf %697, %684 : vector<16x128xf32>
    %c11_386 = arith.constant 11 : index
    %c0_387 = arith.constant 0 : index
    %c0_388 = arith.constant 0 : index
    %699 = vector.load %arg10[%c11_386, %c0_387, %c0_388] : memref<16x16x128xf32, #tpu.memory_space<vmem>>, vector<1x16x128xf32>
    %700 = vector.shape_cast %699 : vector<1x16x128xf32> to vector<16x128xf32>
    %701 = vector.shape_cast %698 : vector<16x128xf32> to vector<1x16x128xf32>
    tpu.vector_store %arg10[%c11_386, %c0_387, %c0_388], %701 {strides = array<i32>} : memref<16x16x128xf32, #tpu.memory_space<vmem>>, vector<1x16x128xf32>,
    %c0_389 = arith.constant 0 : index
    %c14 = arith.constant 14 : index
    %c0_390 = arith.constant 0 : index
    %c0_391 = arith.constant 0 : index
    %702 = vector.load %arg5[%c0_389, %c14, %c0_390, %c0_391] : memref<1x18x16x128xi8, #tpu.memory_space<vmem>>, vector<1x1x16x128xi8>
    %703 = vector.shape_cast %702 : vector<1x1x16x128xi8> to vector<16x128xi8>
    %704 = arith.extsi %703 : vector<16x128xi8> to vector<16x128xi32>
    %cst_392 = arith.constant 0.000000e+00 : f32
    %705 = vector.broadcast %cst_392 : f32 to vector<16x128xf32>
    %c0_i32_393 = arith.constant 0 : i32
    %706 = vector.broadcast %c0_i32_393 : i32 to vector<16x128xi32>
    %707 = arith.cmpi eq, %704, %706 : vector<16x128xi32>
    %708 = vector.broadcast %0 : f32 to vector<16x128xf32>
    %709 = arith.select %707, %708, %705 : vector<16x128xi1>, vector<16x128xf32>
    %c1_i32_394 = arith.constant 1 : i32
    %710 = vector.broadcast %c1_i32_394 : i32 to vector<16x128xi32>
    %711 = arith.cmpi eq, %704, %710 : vector<16x128xi32>
    %712 = vector.broadcast %1 : f32 to vector<16x128xf32>
    %713 = arith.select %711, %712, %709 : vector<16x128xi1>, vector<16x128xf32>
    %c2_i32_395 = arith.constant 2 : i32
    %714 = vector.broadcast %c2_i32_395 : i32 to vector<16x128xi32>
    %715 = arith.cmpi eq, %704, %714 : vector<16x128xi32>
    %716 = vector.broadcast %2 : f32 to vector<16x128xf32>
    %717 = arith.select %715, %716, %713 : vector<16x128xi1>, vector<16x128xf32>
    %c3_i32_396 = arith.constant 3 : i32
    %718 = vector.broadcast %c3_i32_396 : i32 to vector<16x128xi32>
    %719 = arith.cmpi eq, %704, %718 : vector<16x128xi32>
    %720 = vector.broadcast %3 : f32 to vector<16x128xf32>
    %721 = arith.select %719, %720, %717 : vector<16x128xi1>, vector<16x128xf32>
    %c4_i32_397 = arith.constant 4 : i32
    %722 = vector.broadcast %c4_i32_397 : i32 to vector<16x128xi32>
    %723 = arith.cmpi eq, %704, %722 : vector<16x128xi32>
    %724 = vector.broadcast %4 : f32 to vector<16x128xf32>
    %725 = arith.select %723, %724, %721 : vector<16x128xi1>, vector<16x128xf32>
    %c5_i32_398 = arith.constant 5 : i32
    %726 = vector.broadcast %c5_i32_398 : i32 to vector<16x128xi32>
    %727 = arith.cmpi eq, %704, %726 : vector<16x128xi32>
    %728 = vector.broadcast %5 : f32 to vector<16x128xf32>
    %729 = arith.select %727, %728, %725 : vector<16x128xi1>, vector<16x128xf32>
    %c0_399 = arith.constant 0 : index
    %c14_400 = arith.constant 14 : index
    %c0_401 = arith.constant 0 : index
    %c0_402 = arith.constant 0 : index
    %730 = vector.load %arg6[%c0_399, %c14_400, %c0_401, %c0_402] : memref<1x18x16x128xbf16, #tpu.memory_space<vmem>>, vector<1x1x16x128xbf16>
    %731 = vector.shape_cast %730 : vector<1x1x16x128xbf16> to vector<16x128xbf16>
    %732 = arith.extf %731 : vector<16x128xbf16> to vector<16x128xf32>
    %733 = arith.addf %729, %732 : vector<16x128xf32>
    %734 = vector.broadcast %6 : f32 to vector<16x128xf32>
    %735 = arith.mulf %734, %733 : vector<16x128xf32>
    %c14_403 = arith.constant 14 : index
    %c0_404 = arith.constant 0 : index
    %c0_405 = arith.constant 0 : index
    %736 = vector.load %arg10[%c14_403, %c0_404, %c0_405] : memref<16x16x128xf32, #tpu.memory_space<vmem>>, vector<1x16x128xf32>
    %737 = vector.shape_cast %736 : vector<1x16x128xf32> to vector<16x128xf32>
    %738 = vector.shape_cast %735 : vector<16x128xf32> to vector<1x16x128xf32>
    tpu.vector_store %arg10[%c14_403, %c0_404, %c0_405], %738 {strides = array<i32>} : memref<16x16x128xf32, #tpu.memory_space<vmem>>, vector<1x16x128xf32>,
    %c13_406 = arith.constant 13 : index
    %c0_407 = arith.constant 0 : index
    %c0_408 = arith.constant 0 : index
    %739 = vector.load %arg10[%c13_406, %c0_407, %c0_408] : memref<16x16x128xf32, #tpu.memory_space<vmem>>, vector<1x16x128xf32>
    %740 = vector.shape_cast %739 : vector<1x16x128xf32> to vector<16x128xf32>
    %741 = vector.broadcast %7 : f32 to vector<16x128xf32>
    %742 = arith.mulf %741, %733 : vector<16x128xf32>
    %743 = arith.addf %740, %742 : vector<16x128xf32>
    %c13_409 = arith.constant 13 : index
    %c0_410 = arith.constant 0 : index
    %c0_411 = arith.constant 0 : index
    %744 = vector.load %arg10[%c13_409, %c0_410, %c0_411] : memref<16x16x128xf32, #tpu.memory_space<vmem>>, vector<1x16x128xf32>
    %745 = vector.shape_cast %744 : vector<1x16x128xf32> to vector<16x128xf32>
    %746 = vector.shape_cast %743 : vector<16x128xf32> to vector<1x16x128xf32>
    tpu.vector_store %arg10[%c13_409, %c0_410, %c0_411], %746 {strides = array<i32>} : memref<16x16x128xf32, #tpu.memory_space<vmem>>, vector<1x16x128xf32>,
    %c12_412 = arith.constant 12 : index
    %c0_413 = arith.constant 0 : index
    %c0_414 = arith.constant 0 : index
    %747 = vector.load %arg10[%c12_412, %c0_413, %c0_414] : memref<16x16x128xf32, #tpu.memory_space<vmem>>, vector<1x16x128xf32>
    %748 = vector.shape_cast %747 : vector<1x16x128xf32> to vector<16x128xf32>
    %749 = arith.addf %748, %735 : vector<16x128xf32>
    %c12_415 = arith.constant 12 : index
    %c0_416 = arith.constant 0 : index
    %c0_417 = arith.constant 0 : index
    %750 = vector.load %arg10[%c12_415, %c0_416, %c0_417] : memref<16x16x128xf32, #tpu.memory_space<vmem>>, vector<1x16x128xf32>
    %751 = vector.shape_cast %750 : vector<1x16x128xf32> to vector<16x128xf32>
    %752 = vector.shape_cast %749 : vector<16x128xf32> to vector<1x16x128xf32>
    tpu.vector_store %arg10[%c12_415, %c0_416, %c0_417], %752 {strides = array<i32>} : memref<16x16x128xf32, #tpu.memory_space<vmem>>, vector<1x16x128xf32>,
    %c0_418 = arith.constant 0 : index
    %c15 = arith.constant 15 : index
    %c0_419 = arith.constant 0 : index
    %c0_420 = arith.constant 0 : index
    %753 = vector.load %arg5[%c0_418, %c15, %c0_419, %c0_420] : memref<1x18x16x128xi8, #tpu.memory_space<vmem>>, vector<1x1x16x128xi8>
    %754 = vector.shape_cast %753 : vector<1x1x16x128xi8> to vector<16x128xi8>
    %755 = arith.extsi %754 : vector<16x128xi8> to vector<16x128xi32>
    %cst_421 = arith.constant 0.000000e+00 : f32
    %756 = vector.broadcast %cst_421 : f32 to vector<16x128xf32>
    %c0_i32_422 = arith.constant 0 : i32
    %757 = vector.broadcast %c0_i32_422 : i32 to vector<16x128xi32>
    %758 = arith.cmpi eq, %755, %757 : vector<16x128xi32>
    %759 = vector.broadcast %0 : f32 to vector<16x128xf32>
    %760 = arith.select %758, %759, %756 : vector<16x128xi1>, vector<16x128xf32>
    %c1_i32_423 = arith.constant 1 : i32
    %761 = vector.broadcast %c1_i32_423 : i32 to vector<16x128xi32>
    %762 = arith.cmpi eq, %755, %761 : vector<16x128xi32>
    %763 = vector.broadcast %1 : f32 to vector<16x128xf32>
    %764 = arith.select %762, %763, %760 : vector<16x128xi1>, vector<16x128xf32>
    %c2_i32_424 = arith.constant 2 : i32
    %765 = vector.broadcast %c2_i32_424 : i32 to vector<16x128xi32>
    %766 = arith.cmpi eq, %755, %765 : vector<16x128xi32>
    %767 = vector.broadcast %2 : f32 to vector<16x128xf32>
    %768 = arith.select %766, %767, %764 : vector<16x128xi1>, vector<16x128xf32>
    %c3_i32_425 = arith.constant 3 : i32
    %769 = vector.broadcast %c3_i32_425 : i32 to vector<16x128xi32>
    %770 = arith.cmpi eq, %755, %769 : vector<16x128xi32>
    %771 = vector.broadcast %3 : f32 to vector<16x128xf32>
    %772 = arith.select %770, %771, %768 : vector<16x128xi1>, vector<16x128xf32>
    %c4_i32_426 = arith.constant 4 : i32
    %773 = vector.broadcast %c4_i32_426 : i32 to vector<16x128xi32>
    %774 = arith.cmpi eq, %755, %773 : vector<16x128xi32>
    %775 = vector.broadcast %4 : f32 to vector<16x128xf32>
    %776 = arith.select %774, %775, %772 : vector<16x128xi1>, vector<16x128xf32>
    %c5_i32_427 = arith.constant 5 : i32
    %777 = vector.broadcast %c5_i32_427 : i32 to vector<16x128xi32>
    %778 = arith.cmpi eq, %755, %777 : vector<16x128xi32>
    %779 = vector.broadcast %5 : f32 to vector<16x128xf32>
    %780 = arith.select %778, %779, %776 : vector<16x128xi1>, vector<16x128xf32>
    %c0_428 = arith.constant 0 : index
    %c15_429 = arith.constant 15 : index
    %c0_430 = arith.constant 0 : index
    %c0_431 = arith.constant 0 : index
    %781 = vector.load %arg6[%c0_428, %c15_429, %c0_430, %c0_431] : memref<1x18x16x128xbf16, #tpu.memory_space<vmem>>, vector<1x1x16x128xbf16>
    %782 = vector.shape_cast %781 : vector<1x1x16x128xbf16> to vector<16x128xbf16>
    %783 = arith.extf %782 : vector<16x128xbf16> to vector<16x128xf32>
    %784 = arith.addf %780, %783 : vector<16x128xf32>
    %785 = vector.broadcast %6 : f32 to vector<16x128xf32>
    %786 = arith.mulf %785, %784 : vector<16x128xf32>
    %c15_432 = arith.constant 15 : index
    %c0_433 = arith.constant 0 : index
    %c0_434 = arith.constant 0 : index
    %787 = vector.load %arg10[%c15_432, %c0_433, %c0_434] : memref<16x16x128xf32, #tpu.memory_space<vmem>>, vector<1x16x128xf32>
    %788 = vector.shape_cast %787 : vector<1x16x128xf32> to vector<16x128xf32>
    %789 = vector.shape_cast %786 : vector<16x128xf32> to vector<1x16x128xf32>
    tpu.vector_store %arg10[%c15_432, %c0_433, %c0_434], %789 {strides = array<i32>} : memref<16x16x128xf32, #tpu.memory_space<vmem>>, vector<1x16x128xf32>,
    %c14_435 = arith.constant 14 : index
    %c0_436 = arith.constant 0 : index
    %c0_437 = arith.constant 0 : index
    %790 = vector.load %arg10[%c14_435, %c0_436, %c0_437] : memref<16x16x128xf32, #tpu.memory_space<vmem>>, vector<1x16x128xf32>
    %791 = vector.shape_cast %790 : vector<1x16x128xf32> to vector<16x128xf32>
    %792 = vector.broadcast %7 : f32 to vector<16x128xf32>
    %793 = arith.mulf %792, %784 : vector<16x128xf32>
    %794 = arith.addf %791, %793 : vector<16x128xf32>
    %c14_438 = arith.constant 14 : index
    %c0_439 = arith.constant 0 : index
    %c0_440 = arith.constant 0 : index
    %795 = vector.load %arg10[%c14_438, %c0_439, %c0_440] : memref<16x16x128xf32, #tpu.memory_space<vmem>>, vector<1x16x128xf32>
    %796 = vector.shape_cast %795 : vector<1x16x128xf32> to vector<16x128xf32>
    %797 = vector.shape_cast %794 : vector<16x128xf32> to vector<1x16x128xf32>
    tpu.vector_store %arg10[%c14_438, %c0_439, %c0_440], %797 {strides = array<i32>} : memref<16x16x128xf32, #tpu.memory_space<vmem>>, vector<1x16x128xf32>,
    %c13_441 = arith.constant 13 : index
    %c0_442 = arith.constant 0 : index
    %c0_443 = arith.constant 0 : index
    %798 = vector.load %arg10[%c13_441, %c0_442, %c0_443] : memref<16x16x128xf32, #tpu.memory_space<vmem>>, vector<1x16x128xf32>
    %799 = vector.shape_cast %798 : vector<1x16x128xf32> to vector<16x128xf32>
    %800 = arith.addf %799, %786 : vector<16x128xf32>
    %c13_444 = arith.constant 13 : index
    %c0_445 = arith.constant 0 : index
    %c0_446 = arith.constant 0 : index
    %801 = vector.load %arg10[%c13_444, %c0_445, %c0_446] : memref<16x16x128xf32, #tpu.memory_space<vmem>>, vector<1x16x128xf32>
    %802 = vector.shape_cast %801 : vector<1x16x128xf32> to vector<16x128xf32>
    %803 = vector.shape_cast %800 : vector<16x128xf32> to vector<1x16x128xf32>
    tpu.vector_store %arg10[%c13_444, %c0_445, %c0_446], %803 {strides = array<i32>} : memref<16x16x128xf32, #tpu.memory_space<vmem>>, vector<1x16x128xf32>,
    %c0_447 = arith.constant 0 : index
    %c16 = arith.constant 16 : index
    %c0_448 = arith.constant 0 : index
    %c0_449 = arith.constant 0 : index
    %804 = vector.load %arg5[%c0_447, %c16, %c0_448, %c0_449] : memref<1x18x16x128xi8, #tpu.memory_space<vmem>>, vector<1x1x16x128xi8>
    %805 = vector.shape_cast %804 : vector<1x1x16x128xi8> to vector<16x128xi8>
    %806 = arith.extsi %805 : vector<16x128xi8> to vector<16x128xi32>
    %cst_450 = arith.constant 0.000000e+00 : f32
    %807 = vector.broadcast %cst_450 : f32 to vector<16x128xf32>
    %c0_i32_451 = arith.constant 0 : i32
    %808 = vector.broadcast %c0_i32_451 : i32 to vector<16x128xi32>
    %809 = arith.cmpi eq, %806, %808 : vector<16x128xi32>
    %810 = vector.broadcast %0 : f32 to vector<16x128xf32>
    %811 = arith.select %809, %810, %807 : vector<16x128xi1>, vector<16x128xf32>
    %c1_i32_452 = arith.constant 1 : i32
    %812 = vector.broadcast %c1_i32_452 : i32 to vector<16x128xi32>
    %813 = arith.cmpi eq, %806, %812 : vector<16x128xi32>
    %814 = vector.broadcast %1 : f32 to vector<16x128xf32>
    %815 = arith.select %813, %814, %811 : vector<16x128xi1>, vector<16x128xf32>
    %c2_i32_453 = arith.constant 2 : i32
    %816 = vector.broadcast %c2_i32_453 : i32 to vector<16x128xi32>
    %817 = arith.cmpi eq, %806, %816 : vector<16x128xi32>
    %818 = vector.broadcast %2 : f32 to vector<16x128xf32>
    %819 = arith.select %817, %818, %815 : vector<16x128xi1>, vector<16x128xf32>
    %c3_i32_454 = arith.constant 3 : i32
    %820 = vector.broadcast %c3_i32_454 : i32 to vector<16x128xi32>
    %821 = arith.cmpi eq, %806, %820 : vector<16x128xi32>
    %822 = vector.broadcast %3 : f32 to vector<16x128xf32>
    %823 = arith.select %821, %822, %819 : vector<16x128xi1>, vector<16x128xf32>
    %c4_i32_455 = arith.constant 4 : i32
    %824 = vector.broadcast %c4_i32_455 : i32 to vector<16x128xi32>
    %825 = arith.cmpi eq, %806, %824 : vector<16x128xi32>
    %826 = vector.broadcast %4 : f32 to vector<16x128xf32>
    %827 = arith.select %825, %826, %823 : vector<16x128xi1>, vector<16x128xf32>
    %c5_i32_456 = arith.constant 5 : i32
    %828 = vector.broadcast %c5_i32_456 : i32 to vector<16x128xi32>
    %829 = arith.cmpi eq, %806, %828 : vector<16x128xi32>
    %830 = vector.broadcast %5 : f32 to vector<16x128xf32>
    %831 = arith.select %829, %830, %827 : vector<16x128xi1>, vector<16x128xf32>
    %c0_457 = arith.constant 0 : index
    %c16_458 = arith.constant 16 : index
    %c0_459 = arith.constant 0 : index
    %c0_460 = arith.constant 0 : index
    %832 = vector.load %arg6[%c0_457, %c16_458, %c0_459, %c0_460] : memref<1x18x16x128xbf16, #tpu.memory_space<vmem>>, vector<1x1x16x128xbf16>
    %833 = vector.shape_cast %832 : vector<1x1x16x128xbf16> to vector<16x128xbf16>
    %834 = arith.extf %833 : vector<16x128xbf16> to vector<16x128xf32>
    %835 = arith.addf %831, %834 : vector<16x128xf32>
    %836 = vector.broadcast %6 : f32 to vector<16x128xf32>
    %837 = arith.mulf %836, %835 : vector<16x128xf32>
    %c15_461 = arith.constant 15 : index
    %c0_462 = arith.constant 0 : index
    %c0_463 = arith.constant 0 : index
    %838 = vector.load %arg10[%c15_461, %c0_462, %c0_463] : memref<16x16x128xf32, #tpu.memory_space<vmem>>, vector<1x16x128xf32>
    %839 = vector.shape_cast %838 : vector<1x16x128xf32> to vector<16x128xf32>
    %840 = vector.broadcast %7 : f32 to vector<16x128xf32>
    %841 = arith.mulf %840, %835 : vector<16x128xf32>
    %842 = arith.addf %839, %841 : vector<16x128xf32>
    %c15_464 = arith.constant 15 : index
    %c0_465 = arith.constant 0 : index
    %c0_466 = arith.constant 0 : index
    %843 = vector.load %arg10[%c15_464, %c0_465, %c0_466] : memref<16x16x128xf32, #tpu.memory_space<vmem>>, vector<1x16x128xf32>
    %844 = vector.shape_cast %843 : vector<1x16x128xf32> to vector<16x128xf32>
    %845 = vector.shape_cast %842 : vector<16x128xf32> to vector<1x16x128xf32>
    tpu.vector_store %arg10[%c15_464, %c0_465, %c0_466], %845 {strides = array<i32>} : memref<16x16x128xf32, #tpu.memory_space<vmem>>, vector<1x16x128xf32>,
    %c14_467 = arith.constant 14 : index
    %c0_468 = arith.constant 0 : index
    %c0_469 = arith.constant 0 : index
    %846 = vector.load %arg10[%c14_467, %c0_468, %c0_469] : memref<16x16x128xf32, #tpu.memory_space<vmem>>, vector<1x16x128xf32>
    %847 = vector.shape_cast %846 : vector<1x16x128xf32> to vector<16x128xf32>
    %848 = arith.addf %847, %837 : vector<16x128xf32>
    %c14_470 = arith.constant 14 : index
    %c0_471 = arith.constant 0 : index
    %c0_472 = arith.constant 0 : index
    %849 = vector.load %arg10[%c14_470, %c0_471, %c0_472] : memref<16x16x128xf32, #tpu.memory_space<vmem>>, vector<1x16x128xf32>
    %850 = vector.shape_cast %849 : vector<1x16x128xf32> to vector<16x128xf32>
    %851 = vector.shape_cast %848 : vector<16x128xf32> to vector<1x16x128xf32>
    tpu.vector_store %arg10[%c14_470, %c0_471, %c0_472], %851 {strides = array<i32>} : memref<16x16x128xf32, #tpu.memory_space<vmem>>, vector<1x16x128xf32>,
    %c0_473 = arith.constant 0 : index
    %c17 = arith.constant 17 : index
    %c0_474 = arith.constant 0 : index
    %c0_475 = arith.constant 0 : index
    %852 = vector.load %arg5[%c0_473, %c17, %c0_474, %c0_475] : memref<1x18x16x128xi8, #tpu.memory_space<vmem>>, vector<1x1x16x128xi8>
    %853 = vector.shape_cast %852 : vector<1x1x16x128xi8> to vector<16x128xi8>
    %854 = arith.extsi %853 : vector<16x128xi8> to vector<16x128xi32>
    %cst_476 = arith.constant 0.000000e+00 : f32
    %855 = vector.broadcast %cst_476 : f32 to vector<16x128xf32>
    %c0_i32_477 = arith.constant 0 : i32
    %856 = vector.broadcast %c0_i32_477 : i32 to vector<16x128xi32>
    %857 = arith.cmpi eq, %854, %856 : vector<16x128xi32>
    %858 = vector.broadcast %0 : f32 to vector<16x128xf32>
    %859 = arith.select %857, %858, %855 : vector<16x128xi1>, vector<16x128xf32>
    %c1_i32_478 = arith.constant 1 : i32
    %860 = vector.broadcast %c1_i32_478 : i32 to vector<16x128xi32>
    %861 = arith.cmpi eq, %854, %860 : vector<16x128xi32>
    %862 = vector.broadcast %1 : f32 to vector<16x128xf32>
    %863 = arith.select %861, %862, %859 : vector<16x128xi1>, vector<16x128xf32>
    %c2_i32_479 = arith.constant 2 : i32
    %864 = vector.broadcast %c2_i32_479 : i32 to vector<16x128xi32>
    %865 = arith.cmpi eq, %854, %864 : vector<16x128xi32>
    %866 = vector.broadcast %2 : f32 to vector<16x128xf32>
    %867 = arith.select %865, %866, %863 : vector<16x128xi1>, vector<16x128xf32>
    %c3_i32_480 = arith.constant 3 : i32
    %868 = vector.broadcast %c3_i32_480 : i32 to vector<16x128xi32>
    %869 = arith.cmpi eq, %854, %868 : vector<16x128xi32>
    %870 = vector.broadcast %3 : f32 to vector<16x128xf32>
    %871 = arith.select %869, %870, %867 : vector<16x128xi1>, vector<16x128xf32>
    %c4_i32_481 = arith.constant 4 : i32
    %872 = vector.broadcast %c4_i32_481 : i32 to vector<16x128xi32>
    %873 = arith.cmpi eq, %854, %872 : vector<16x128xi32>
    %874 = vector.broadcast %4 : f32 to vector<16x128xf32>
    %875 = arith.select %873, %874, %871 : vector<16x128xi1>, vector<16x128xf32>
    %c5_i32_482 = arith.constant 5 : i32
    %876 = vector.broadcast %c5_i32_482 : i32 to vector<16x128xi32>
    %877 = arith.cmpi eq, %854, %876 : vector<16x128xi32>
    %878 = vector.broadcast %5 : f32 to vector<16x128xf32>
    %879 = arith.select %877, %878, %875 : vector<16x128xi1>, vector<16x128xf32>
    %c0_483 = arith.constant 0 : index
    %c17_484 = arith.constant 17 : index
    %c0_485 = arith.constant 0 : index
    %c0_486 = arith.constant 0 : index
    %880 = vector.load %arg6[%c0_483, %c17_484, %c0_485, %c0_486] : memref<1x18x16x128xbf16, #tpu.memory_space<vmem>>, vector<1x1x16x128xbf16>
    %881 = vector.shape_cast %880 : vector<1x1x16x128xbf16> to vector<16x128xbf16>
    %882 = arith.extf %881 : vector<16x128xbf16> to vector<16x128xf32>
    %883 = arith.addf %879, %882 : vector<16x128xf32>
    %884 = vector.broadcast %6 : f32 to vector<16x128xf32>
    %885 = arith.mulf %884, %883 : vector<16x128xf32>
    %c15_487 = arith.constant 15 : index
    %c0_488 = arith.constant 0 : index
    %c0_489 = arith.constant 0 : index
    %886 = vector.load %arg10[%c15_487, %c0_488, %c0_489] : memref<16x16x128xf32, #tpu.memory_space<vmem>>, vector<1x16x128xf32>
    %887 = vector.shape_cast %886 : vector<1x16x128xf32> to vector<16x128xf32>
    %888 = arith.addf %887, %885 : vector<16x128xf32>
    %c15_490 = arith.constant 15 : index
    %c0_491 = arith.constant 0 : index
    %c0_492 = arith.constant 0 : index
    %889 = vector.load %arg10[%c15_490, %c0_491, %c0_492] : memref<16x16x128xf32, #tpu.memory_space<vmem>>, vector<1x16x128xf32>
    %890 = vector.shape_cast %889 : vector<1x16x128xf32> to vector<16x128xf32>
    %891 = vector.shape_cast %888 : vector<16x128xf32> to vector<1x16x128xf32>
    tpu.vector_store %arg10[%c15_490, %c0_491, %c0_492], %891 {strides = array<i32>} : memref<16x16x128xf32, #tpu.memory_space<vmem>>, vector<1x16x128xf32>,
    %c0_493 = arith.constant 0 : index
    %c0_494 = arith.constant 0 : index
    %892 = vector.load %arg3[%c0_493, %c0_494] : memref<16x16xf32, #tpu.memory_space<vmem>>, vector<16x16xf32>
    %c0_495 = arith.constant 0 : index
    %c0_496 = arith.constant 0 : index
    %893 = vector.load %arg4[%c0_495, %c0_496] : memref<128x128xf32, #tpu.memory_space<vmem>>, vector<128x128xf32>
    %c0_497 = arith.constant 0 : index
    %c0_498 = arith.constant 0 : index
    %c0_499 = arith.constant 0 : index
    %894 = vector.load %arg10[%c0_497, %c0_498, %c0_499] : memref<16x16x128xf32, #tpu.memory_space<vmem>>, vector<1x16x128xf32>
    %895 = vector.shape_cast %894 : vector<1x16x128xf32> to vector<16x128xf32>
    %cst_500 = arith.constant dense<0.000000e+00> : vector<16x128xf32>
    %896 = tpu.matmul %892, %895, %cst_500 {dimension_numbers = #tpu.dot_dimension_numbers<[1], [0], [0], [1], [0, 0, 1, 1], [], []>} : vector<16x16xf32>, vector<16x128xf32>, vector<16x128xf32> -> vector<16x128xf32>
    %cst_501 = arith.constant dense<0.000000e+00> : vector<16x128xf32>
    %897 = tpu.matmul %896, %893, %cst_501 {dimension_numbers = #tpu.dot_dimension_numbers<[1], [0], [0], [1], [0, 0, 1, 1], [], []>} : vector<16x128xf32>, vector<128x128xf32>, vector<16x128xf32> -> vector<16x128xf32>
    %898 = arith.truncf %897 : vector<16x128xf32> to vector<16x128xbf16>
    %c0_502 = arith.constant 0 : index
    %c0_503 = arith.constant 0 : index
    %c0_504 = arith.constant 0 : index
    %899 = vector.load %arg7[%c0_502, %c0_503, %c0_504] : memref<16x16x128xbf16, #tpu.memory_space<vmem>>, vector<1x16x128xbf16>
    %900 = vector.shape_cast %899 : vector<1x16x128xbf16> to vector<16x128xbf16>
    %901 = vector.shape_cast %898 : vector<16x128xbf16> to vector<1x16x128xbf16>
    tpu.vector_store %arg7[%c0_502, %c0_503, %c0_504], %901 {strides = array<i32>} : memref<16x16x128xbf16, #tpu.memory_space<vmem>>, vector<1x16x128xbf16>,
    %902 = arith.extf %898 : vector<16x128xbf16> to vector<16x128xf32>
    %cst_505 = arith.constant dense<0x7F800000> : vector<128xf32>
    %903 = vector.multi_reduction <minimumf>, %902, %cst_505 [0] : vector<16x128xf32> to vector<128xf32>
    %904 = vector.shape_cast %903 : vector<128xf32> to vector<1x128xf32>
    %cst_506 = arith.constant dense<0xFF800000> : vector<128xf32>
    %905 = vector.multi_reduction <maximumf>, %902, %cst_506 [0] : vector<16x128xf32> to vector<128xf32>
    %906 = vector.shape_cast %905 : vector<128xf32> to vector<1x128xf32>
    %c1_507 = arith.constant 1 : index
    %c0_508 = arith.constant 0 : index
    %c0_509 = arith.constant 0 : index
    %907 = vector.load %arg10[%c1_507, %c0_508, %c0_509] : memref<16x16x128xf32, #tpu.memory_space<vmem>>, vector<1x16x128xf32>
    %908 = vector.shape_cast %907 : vector<1x16x128xf32> to vector<16x128xf32>
    %cst_510 = arith.constant dense<0.000000e+00> : vector<16x128xf32>
    %909 = tpu.matmul %892, %908, %cst_510 {dimension_numbers = #tpu.dot_dimension_numbers<[1], [0], [0], [1], [0, 0, 1, 1], [], []>} : vector<16x16xf32>, vector<16x128xf32>, vector<16x128xf32> -> vector<16x128xf32>
    %cst_511 = arith.constant dense<0.000000e+00> : vector<16x128xf32>
    %910 = tpu.matmul %909, %893, %cst_511 {dimension_numbers = #tpu.dot_dimension_numbers<[1], [0], [0], [1], [0, 0, 1, 1], [], []>} : vector<16x128xf32>, vector<128x128xf32>, vector<16x128xf32> -> vector<16x128xf32>
    %911 = arith.truncf %910 : vector<16x128xf32> to vector<16x128xbf16>
    %c1_512 = arith.constant 1 : index
    %c0_513 = arith.constant 0 : index
    %c0_514 = arith.constant 0 : index
    %912 = vector.load %arg7[%c1_512, %c0_513, %c0_514] : memref<16x16x128xbf16, #tpu.memory_space<vmem>>, vector<1x16x128xbf16>
    %913 = vector.shape_cast %912 : vector<1x16x128xbf16> to vector<16x128xbf16>
    %914 = vector.shape_cast %911 : vector<16x128xbf16> to vector<1x16x128xbf16>
    tpu.vector_store %arg7[%c1_512, %c0_513, %c0_514], %914 {strides = array<i32>} : memref<16x16x128xbf16, #tpu.memory_space<vmem>>, vector<1x16x128xbf16>,
    %915 = arith.extf %911 : vector<16x128xbf16> to vector<16x128xf32>
    %cst_515 = arith.constant dense<0x7F800000> : vector<128xf32>
    %916 = vector.multi_reduction <minimumf>, %915, %cst_515 [0] : vector<16x128xf32> to vector<128xf32>
    %917 = vector.shape_cast %916 : vector<128xf32> to vector<1x128xf32>
    %cst_516 = arith.constant dense<0xFF800000> : vector<128xf32>
    %918 = vector.multi_reduction <maximumf>, %915, %cst_516 [0] : vector<16x128xf32> to vector<128xf32>
    %919 = vector.shape_cast %918 : vector<128xf32> to vector<1x128xf32>
    %920 = arith.minimumf %904, %917 : vector<1x128xf32>
    %921 = arith.maximumf %906, %919 : vector<1x128xf32>
    %c2_517 = arith.constant 2 : index
    %c0_518 = arith.constant 0 : index
    %c0_519 = arith.constant 0 : index
    %922 = vector.load %arg10[%c2_517, %c0_518, %c0_519] : memref<16x16x128xf32, #tpu.memory_space<vmem>>, vector<1x16x128xf32>
    %923 = vector.shape_cast %922 : vector<1x16x128xf32> to vector<16x128xf32>
    %cst_520 = arith.constant dense<0.000000e+00> : vector<16x128xf32>
    %924 = tpu.matmul %892, %923, %cst_520 {dimension_numbers = #tpu.dot_dimension_numbers<[1], [0], [0], [1], [0, 0, 1, 1], [], []>} : vector<16x16xf32>, vector<16x128xf32>, vector<16x128xf32> -> vector<16x128xf32>
    %cst_521 = arith.constant dense<0.000000e+00> : vector<16x128xf32>
    %925 = tpu.matmul %924, %893, %cst_521 {dimension_numbers = #tpu.dot_dimension_numbers<[1], [0], [0], [1], [0, 0, 1, 1], [], []>} : vector<16x128xf32>, vector<128x128xf32>, vector<16x128xf32> -> vector<16x128xf32>
    %926 = arith.truncf %925 : vector<16x128xf32> to vector<16x128xbf16>
    %c2_522 = arith.constant 2 : index
    %c0_523 = arith.constant 0 : index
    %c0_524 = arith.constant 0 : index
    %927 = vector.load %arg7[%c2_522, %c0_523, %c0_524] : memref<16x16x128xbf16, #tpu.memory_space<vmem>>, vector<1x16x128xbf16>
    %928 = vector.shape_cast %927 : vector<1x16x128xbf16> to vector<16x128xbf16>
    %929 = vector.shape_cast %926 : vector<16x128xbf16> to vector<1x16x128xbf16>
    tpu.vector_store %arg7[%c2_522, %c0_523, %c0_524], %929 {strides = array<i32>} : memref<16x16x128xbf16, #tpu.memory_space<vmem>>, vector<1x16x128xbf16>,
    %930 = arith.extf %926 : vector<16x128xbf16> to vector<16x128xf32>
    %cst_525 = arith.constant dense<0x7F800000> : vector<128xf32>
    %931 = vector.multi_reduction <minimumf>, %930, %cst_525 [0] : vector<16x128xf32> to vector<128xf32>
    %932 = vector.shape_cast %931 : vector<128xf32> to vector<1x128xf32>
    %cst_526 = arith.constant dense<0xFF800000> : vector<128xf32>
    %933 = vector.multi_reduction <maximumf>, %930, %cst_526 [0] : vector<16x128xf32> to vector<128xf32>
    %934 = vector.shape_cast %933 : vector<128xf32> to vector<1x128xf32>
    %935 = arith.minimumf %920, %932 : vector<1x128xf32>
    %936 = arith.maximumf %921, %934 : vector<1x128xf32>
    %c3_527 = arith.constant 3 : index
    %c0_528 = arith.constant 0 : index
    %c0_529 = arith.constant 0 : index
    %937 = vector.load %arg10[%c3_527, %c0_528, %c0_529] : memref<16x16x128xf32, #tpu.memory_space<vmem>>, vector<1x16x128xf32>
    %938 = vector.shape_cast %937 : vector<1x16x128xf32> to vector<16x128xf32>
    %cst_530 = arith.constant dense<0.000000e+00> : vector<16x128xf32>
    %939 = tpu.matmul %892, %938, %cst_530 {dimension_numbers = #tpu.dot_dimension_numbers<[1], [0], [0], [1], [0, 0, 1, 1], [], []>} : vector<16x16xf32>, vector<16x128xf32>, vector<16x128xf32> -> vector<16x128xf32>
    %cst_531 = arith.constant dense<0.000000e+00> : vector<16x128xf32>
    %940 = tpu.matmul %939, %893, %cst_531 {dimension_numbers = #tpu.dot_dimension_numbers<[1], [0], [0], [1], [0, 0, 1, 1], [], []>} : vector<16x128xf32>, vector<128x128xf32>, vector<16x128xf32> -> vector<16x128xf32>
    %941 = arith.truncf %940 : vector<16x128xf32> to vector<16x128xbf16>
    %c3_532 = arith.constant 3 : index
    %c0_533 = arith.constant 0 : index
    %c0_534 = arith.constant 0 : index
    %942 = vector.load %arg7[%c3_532, %c0_533, %c0_534] : memref<16x16x128xbf16, #tpu.memory_space<vmem>>, vector<1x16x128xbf16>
    %943 = vector.shape_cast %942 : vector<1x16x128xbf16> to vector<16x128xbf16>
    %944 = vector.shape_cast %941 : vector<16x128xbf16> to vector<1x16x128xbf16>
    tpu.vector_store %arg7[%c3_532, %c0_533, %c0_534], %944 {strides = array<i32>} : memref<16x16x128xbf16, #tpu.memory_space<vmem>>, vector<1x16x128xbf16>,
    %945 = arith.extf %941 : vector<16x128xbf16> to vector<16x128xf32>
    %cst_535 = arith.constant dense<0x7F800000> : vector<128xf32>
    %946 = vector.multi_reduction <minimumf>, %945, %cst_535 [0] : vector<16x128xf32> to vector<128xf32>
    %947 = vector.shape_cast %946 : vector<128xf32> to vector<1x128xf32>
    %cst_536 = arith.constant dense<0xFF800000> : vector<128xf32>
    %948 = vector.multi_reduction <maximumf>, %945, %cst_536 [0] : vector<16x128xf32> to vector<128xf32>
    %949 = vector.shape_cast %948 : vector<128xf32> to vector<1x128xf32>
    %950 = arith.minimumf %935, %947 : vector<1x128xf32>
    %951 = arith.maximumf %936, %949 : vector<1x128xf32>
    %c4_537 = arith.constant 4 : index
    %c0_538 = arith.constant 0 : index
    %c0_539 = arith.constant 0 : index
    %952 = vector.load %arg10[%c4_537, %c0_538, %c0_539] : memref<16x16x128xf32, #tpu.memory_space<vmem>>, vector<1x16x128xf32>
    %953 = vector.shape_cast %952 : vector<1x16x128xf32> to vector<16x128xf32>
    %cst_540 = arith.constant dense<0.000000e+00> : vector<16x128xf32>
    %954 = tpu.matmul %892, %953, %cst_540 {dimension_numbers = #tpu.dot_dimension_numbers<[1], [0], [0], [1], [0, 0, 1, 1], [], []>} : vector<16x16xf32>, vector<16x128xf32>, vector<16x128xf32> -> vector<16x128xf32>
    %cst_541 = arith.constant dense<0.000000e+00> : vector<16x128xf32>
    %955 = tpu.matmul %954, %893, %cst_541 {dimension_numbers = #tpu.dot_dimension_numbers<[1], [0], [0], [1], [0, 0, 1, 1], [], []>} : vector<16x128xf32>, vector<128x128xf32>, vector<16x128xf32> -> vector<16x128xf32>
    %956 = arith.truncf %955 : vector<16x128xf32> to vector<16x128xbf16>
    %c4_542 = arith.constant 4 : index
    %c0_543 = arith.constant 0 : index
    %c0_544 = arith.constant 0 : index
    %957 = vector.load %arg7[%c4_542, %c0_543, %c0_544] : memref<16x16x128xbf16, #tpu.memory_space<vmem>>, vector<1x16x128xbf16>
    %958 = vector.shape_cast %957 : vector<1x16x128xbf16> to vector<16x128xbf16>
    %959 = vector.shape_cast %956 : vector<16x128xbf16> to vector<1x16x128xbf16>
    tpu.vector_store %arg7[%c4_542, %c0_543, %c0_544], %959 {strides = array<i32>} : memref<16x16x128xbf16, #tpu.memory_space<vmem>>, vector<1x16x128xbf16>,
    %960 = arith.extf %956 : vector<16x128xbf16> to vector<16x128xf32>
    %cst_545 = arith.constant dense<0x7F800000> : vector<128xf32>
    %961 = vector.multi_reduction <minimumf>, %960, %cst_545 [0] : vector<16x128xf32> to vector<128xf32>
    %962 = vector.shape_cast %961 : vector<128xf32> to vector<1x128xf32>
    %cst_546 = arith.constant dense<0xFF800000> : vector<128xf32>
    %963 = vector.multi_reduction <maximumf>, %960, %cst_546 [0] : vector<16x128xf32> to vector<128xf32>
    %964 = vector.shape_cast %963 : vector<128xf32> to vector<1x128xf32>
    %965 = arith.minimumf %950, %962 : vector<1x128xf32>
    %966 = arith.maximumf %951, %964 : vector<1x128xf32>
    %c5_547 = arith.constant 5 : index
    %c0_548 = arith.constant 0 : index
    %c0_549 = arith.constant 0 : index
    %967 = vector.load %arg10[%c5_547, %c0_548, %c0_549] : memref<16x16x128xf32, #tpu.memory_space<vmem>>, vector<1x16x128xf32>
    %968 = vector.shape_cast %967 : vector<1x16x128xf32> to vector<16x128xf32>
    %cst_550 = arith.constant dense<0.000000e+00> : vector<16x128xf32>
    %969 = tpu.matmul %892, %968, %cst_550 {dimension_numbers = #tpu.dot_dimension_numbers<[1], [0], [0], [1], [0, 0, 1, 1], [], []>} : vector<16x16xf32>, vector<16x128xf32>, vector<16x128xf32> -> vector<16x128xf32>
    %cst_551 = arith.constant dense<0.000000e+00> : vector<16x128xf32>
    %970 = tpu.matmul %969, %893, %cst_551 {dimension_numbers = #tpu.dot_dimension_numbers<[1], [0], [0], [1], [0, 0, 1, 1], [], []>} : vector<16x128xf32>, vector<128x128xf32>, vector<16x128xf32> -> vector<16x128xf32>
    %971 = arith.truncf %970 : vector<16x128xf32> to vector<16x128xbf16>
    %c5_552 = arith.constant 5 : index
    %c0_553 = arith.constant 0 : index
    %c0_554 = arith.constant 0 : index
    %972 = vector.load %arg7[%c5_552, %c0_553, %c0_554] : memref<16x16x128xbf16, #tpu.memory_space<vmem>>, vector<1x16x128xbf16>
    %973 = vector.shape_cast %972 : vector<1x16x128xbf16> to vector<16x128xbf16>
    %974 = vector.shape_cast %971 : vector<16x128xbf16> to vector<1x16x128xbf16>
    tpu.vector_store %arg7[%c5_552, %c0_553, %c0_554], %974 {strides = array<i32>} : memref<16x16x128xbf16, #tpu.memory_space<vmem>>, vector<1x16x128xbf16>,
    %975 = arith.extf %971 : vector<16x128xbf16> to vector<16x128xf32>
    %cst_555 = arith.constant dense<0x7F800000> : vector<128xf32>
    %976 = vector.multi_reduction <minimumf>, %975, %cst_555 [0] : vector<16x128xf32> to vector<128xf32>
    %977 = vector.shape_cast %976 : vector<128xf32> to vector<1x128xf32>
    %cst_556 = arith.constant dense<0xFF800000> : vector<128xf32>
    %978 = vector.multi_reduction <maximumf>, %975, %cst_556 [0] : vector<16x128xf32> to vector<128xf32>
    %979 = vector.shape_cast %978 : vector<128xf32> to vector<1x128xf32>
    %980 = arith.minimumf %965, %977 : vector<1x128xf32>
    %981 = arith.maximumf %966, %979 : vector<1x128xf32>
    %c6_557 = arith.constant 6 : index
    %c0_558 = arith.constant 0 : index
    %c0_559 = arith.constant 0 : index
    %982 = vector.load %arg10[%c6_557, %c0_558, %c0_559] : memref<16x16x128xf32, #tpu.memory_space<vmem>>, vector<1x16x128xf32>
    %983 = vector.shape_cast %982 : vector<1x16x128xf32> to vector<16x128xf32>
    %cst_560 = arith.constant dense<0.000000e+00> : vector<16x128xf32>
    %984 = tpu.matmul %892, %983, %cst_560 {dimension_numbers = #tpu.dot_dimension_numbers<[1], [0], [0], [1], [0, 0, 1, 1], [], []>} : vector<16x16xf32>, vector<16x128xf32>, vector<16x128xf32> -> vector<16x128xf32>
    %cst_561 = arith.constant dense<0.000000e+00> : vector<16x128xf32>
    %985 = tpu.matmul %984, %893, %cst_561 {dimension_numbers = #tpu.dot_dimension_numbers<[1], [0], [0], [1], [0, 0, 1, 1], [], []>} : vector<16x128xf32>, vector<128x128xf32>, vector<16x128xf32> -> vector<16x128xf32>
    %986 = arith.truncf %985 : vector<16x128xf32> to vector<16x128xbf16>
    %c6_562 = arith.constant 6 : index
    %c0_563 = arith.constant 0 : index
    %c0_564 = arith.constant 0 : index
    %987 = vector.load %arg7[%c6_562, %c0_563, %c0_564] : memref<16x16x128xbf16, #tpu.memory_space<vmem>>, vector<1x16x128xbf16>
    %988 = vector.shape_cast %987 : vector<1x16x128xbf16> to vector<16x128xbf16>
    %989 = vector.shape_cast %986 : vector<16x128xbf16> to vector<1x16x128xbf16>
    tpu.vector_store %arg7[%c6_562, %c0_563, %c0_564], %989 {strides = array<i32>} : memref<16x16x128xbf16, #tpu.memory_space<vmem>>, vector<1x16x128xbf16>,
    %990 = arith.extf %986 : vector<16x128xbf16> to vector<16x128xf32>
    %cst_565 = arith.constant dense<0x7F800000> : vector<128xf32>
    %991 = vector.multi_reduction <minimumf>, %990, %cst_565 [0] : vector<16x128xf32> to vector<128xf32>
    %992 = vector.shape_cast %991 : vector<128xf32> to vector<1x128xf32>
    %cst_566 = arith.constant dense<0xFF800000> : vector<128xf32>
    %993 = vector.multi_reduction <maximumf>, %990, %cst_566 [0] : vector<16x128xf32> to vector<128xf32>
    %994 = vector.shape_cast %993 : vector<128xf32> to vector<1x128xf32>
    %995 = arith.minimumf %980, %992 : vector<1x128xf32>
    %996 = arith.maximumf %981, %994 : vector<1x128xf32>
    %c7_567 = arith.constant 7 : index
    %c0_568 = arith.constant 0 : index
    %c0_569 = arith.constant 0 : index
    %997 = vector.load %arg10[%c7_567, %c0_568, %c0_569] : memref<16x16x128xf32, #tpu.memory_space<vmem>>, vector<1x16x128xf32>
    %998 = vector.shape_cast %997 : vector<1x16x128xf32> to vector<16x128xf32>
    %cst_570 = arith.constant dense<0.000000e+00> : vector<16x128xf32>
    %999 = tpu.matmul %892, %998, %cst_570 {dimension_numbers = #tpu.dot_dimension_numbers<[1], [0], [0], [1], [0, 0, 1, 1], [], []>} : vector<16x16xf32>, vector<16x128xf32>, vector<16x128xf32> -> vector<16x128xf32>
    %cst_571 = arith.constant dense<0.000000e+00> : vector<16x128xf32>
    %1000 = tpu.matmul %999, %893, %cst_571 {dimension_numbers = #tpu.dot_dimension_numbers<[1], [0], [0], [1], [0, 0, 1, 1], [], []>} : vector<16x128xf32>, vector<128x128xf32>, vector<16x128xf32> -> vector<16x128xf32>
    %1001 = arith.truncf %1000 : vector<16x128xf32> to vector<16x128xbf16>
    %c7_572 = arith.constant 7 : index
    %c0_573 = arith.constant 0 : index
    %c0_574 = arith.constant 0 : index
    %1002 = vector.load %arg7[%c7_572, %c0_573, %c0_574] : memref<16x16x128xbf16, #tpu.memory_space<vmem>>, vector<1x16x128xbf16>
    %1003 = vector.shape_cast %1002 : vector<1x16x128xbf16> to vector<16x128xbf16>
    %1004 = vector.shape_cast %1001 : vector<16x128xbf16> to vector<1x16x128xbf16>
    tpu.vector_store %arg7[%c7_572, %c0_573, %c0_574], %1004 {strides = array<i32>} : memref<16x16x128xbf16, #tpu.memory_space<vmem>>, vector<1x16x128xbf16>,
    %1005 = arith.extf %1001 : vector<16x128xbf16> to vector<16x128xf32>
    %cst_575 = arith.constant dense<0x7F800000> : vector<128xf32>
    %1006 = vector.multi_reduction <minimumf>, %1005, %cst_575 [0] : vector<16x128xf32> to vector<128xf32>
    %1007 = vector.shape_cast %1006 : vector<128xf32> to vector<1x128xf32>
    %cst_576 = arith.constant dense<0xFF800000> : vector<128xf32>
    %1008 = vector.multi_reduction <maximumf>, %1005, %cst_576 [0] : vector<16x128xf32> to vector<128xf32>
    %1009 = vector.shape_cast %1008 : vector<128xf32> to vector<1x128xf32>
    %1010 = arith.minimumf %995, %1007 : vector<1x128xf32>
    %1011 = arith.maximumf %996, %1009 : vector<1x128xf32>
    %c8_577 = arith.constant 8 : index
    %c0_578 = arith.constant 0 : index
    %c0_579 = arith.constant 0 : index
    %1012 = vector.load %arg10[%c8_577, %c0_578, %c0_579] : memref<16x16x128xf32, #tpu.memory_space<vmem>>, vector<1x16x128xf32>
    %1013 = vector.shape_cast %1012 : vector<1x16x128xf32> to vector<16x128xf32>
    %cst_580 = arith.constant dense<0.000000e+00> : vector<16x128xf32>
    %1014 = tpu.matmul %892, %1013, %cst_580 {dimension_numbers = #tpu.dot_dimension_numbers<[1], [0], [0], [1], [0, 0, 1, 1], [], []>} : vector<16x16xf32>, vector<16x128xf32>, vector<16x128xf32> -> vector<16x128xf32>
    %cst_581 = arith.constant dense<0.000000e+00> : vector<16x128xf32>
    %1015 = tpu.matmul %1014, %893, %cst_581 {dimension_numbers = #tpu.dot_dimension_numbers<[1], [0], [0], [1], [0, 0, 1, 1], [], []>} : vector<16x128xf32>, vector<128x128xf32>, vector<16x128xf32> -> vector<16x128xf32>
    %1016 = arith.truncf %1015 : vector<16x128xf32> to vector<16x128xbf16>
    %c8_582 = arith.constant 8 : index
    %c0_583 = arith.constant 0 : index
    %c0_584 = arith.constant 0 : index
    %1017 = vector.load %arg7[%c8_582, %c0_583, %c0_584] : memref<16x16x128xbf16, #tpu.memory_space<vmem>>, vector<1x16x128xbf16>
    %1018 = vector.shape_cast %1017 : vector<1x16x128xbf16> to vector<16x128xbf16>
    %1019 = vector.shape_cast %1016 : vector<16x128xbf16> to vector<1x16x128xbf16>
    tpu.vector_store %arg7[%c8_582, %c0_583, %c0_584], %1019 {strides = array<i32>} : memref<16x16x128xbf16, #tpu.memory_space<vmem>>, vector<1x16x128xbf16>,
    %1020 = arith.extf %1016 : vector<16x128xbf16> to vector<16x128xf32>
    %cst_585 = arith.constant dense<0x7F800000> : vector<128xf32>
    %1021 = vector.multi_reduction <minimumf>, %1020, %cst_585 [0] : vector<16x128xf32> to vector<128xf32>
    %1022 = vector.shape_cast %1021 : vector<128xf32> to vector<1x128xf32>
    %cst_586 = arith.constant dense<0xFF800000> : vector<128xf32>
    %1023 = vector.multi_reduction <maximumf>, %1020, %cst_586 [0] : vector<16x128xf32> to vector<128xf32>
    %1024 = vector.shape_cast %1023 : vector<128xf32> to vector<1x128xf32>
    %1025 = arith.minimumf %1010, %1022 : vector<1x128xf32>
    %1026 = arith.maximumf %1011, %1024 : vector<1x128xf32>
    %c9_587 = arith.constant 9 : index
    %c0_588 = arith.constant 0 : index
    %c0_589 = arith.constant 0 : index
    %1027 = vector.load %arg10[%c9_587, %c0_588, %c0_589] : memref<16x16x128xf32, #tpu.memory_space<vmem>>, vector<1x16x128xf32>
    %1028 = vector.shape_cast %1027 : vector<1x16x128xf32> to vector<16x128xf32>
    %cst_590 = arith.constant dense<0.000000e+00> : vector<16x128xf32>
    %1029 = tpu.matmul %892, %1028, %cst_590 {dimension_numbers = #tpu.dot_dimension_numbers<[1], [0], [0], [1], [0, 0, 1, 1], [], []>} : vector<16x16xf32>, vector<16x128xf32>, vector<16x128xf32> -> vector<16x128xf32>
    %cst_591 = arith.constant dense<0.000000e+00> : vector<16x128xf32>
    %1030 = tpu.matmul %1029, %893, %cst_591 {dimension_numbers = #tpu.dot_dimension_numbers<[1], [0], [0], [1], [0, 0, 1, 1], [], []>} : vector<16x128xf32>, vector<128x128xf32>, vector<16x128xf32> -> vector<16x128xf32>
    %1031 = arith.truncf %1030 : vector<16x128xf32> to vector<16x128xbf16>
    %c9_592 = arith.constant 9 : index
    %c0_593 = arith.constant 0 : index
    %c0_594 = arith.constant 0 : index
    %1032 = vector.load %arg7[%c9_592, %c0_593, %c0_594] : memref<16x16x128xbf16, #tpu.memory_space<vmem>>, vector<1x16x128xbf16>
    %1033 = vector.shape_cast %1032 : vector<1x16x128xbf16> to vector<16x128xbf16>
    %1034 = vector.shape_cast %1031 : vector<16x128xbf16> to vector<1x16x128xbf16>
    tpu.vector_store %arg7[%c9_592, %c0_593, %c0_594], %1034 {strides = array<i32>} : memref<16x16x128xbf16, #tpu.memory_space<vmem>>, vector<1x16x128xbf16>,
    %1035 = arith.extf %1031 : vector<16x128xbf16> to vector<16x128xf32>
    %cst_595 = arith.constant dense<0x7F800000> : vector<128xf32>
    %1036 = vector.multi_reduction <minimumf>, %1035, %cst_595 [0] : vector<16x128xf32> to vector<128xf32>
    %1037 = vector.shape_cast %1036 : vector<128xf32> to vector<1x128xf32>
    %cst_596 = arith.constant dense<0xFF800000> : vector<128xf32>
    %1038 = vector.multi_reduction <maximumf>, %1035, %cst_596 [0] : vector<16x128xf32> to vector<128xf32>
    %1039 = vector.shape_cast %1038 : vector<128xf32> to vector<1x128xf32>
    %1040 = arith.minimumf %1025, %1037 : vector<1x128xf32>
    %1041 = arith.maximumf %1026, %1039 : vector<1x128xf32>
    %c10_597 = arith.constant 10 : index
    %c0_598 = arith.constant 0 : index
    %c0_599 = arith.constant 0 : index
    %1042 = vector.load %arg10[%c10_597, %c0_598, %c0_599] : memref<16x16x128xf32, #tpu.memory_space<vmem>>, vector<1x16x128xf32>
    %1043 = vector.shape_cast %1042 : vector<1x16x128xf32> to vector<16x128xf32>
    %cst_600 = arith.constant dense<0.000000e+00> : vector<16x128xf32>
    %1044 = tpu.matmul %892, %1043, %cst_600 {dimension_numbers = #tpu.dot_dimension_numbers<[1], [0], [0], [1], [0, 0, 1, 1], [], []>} : vector<16x16xf32>, vector<16x128xf32>, vector<16x128xf32> -> vector<16x128xf32>
    %cst_601 = arith.constant dense<0.000000e+00> : vector<16x128xf32>
    %1045 = tpu.matmul %1044, %893, %cst_601 {dimension_numbers = #tpu.dot_dimension_numbers<[1], [0], [0], [1], [0, 0, 1, 1], [], []>} : vector<16x128xf32>, vector<128x128xf32>, vector<16x128xf32> -> vector<16x128xf32>
    %1046 = arith.truncf %1045 : vector<16x128xf32> to vector<16x128xbf16>
    %c10_602 = arith.constant 10 : index
    %c0_603 = arith.constant 0 : index
    %c0_604 = arith.constant 0 : index
    %1047 = vector.load %arg7[%c10_602, %c0_603, %c0_604] : memref<16x16x128xbf16, #tpu.memory_space<vmem>>, vector<1x16x128xbf16>
    %1048 = vector.shape_cast %1047 : vector<1x16x128xbf16> to vector<16x128xbf16>
    %1049 = vector.shape_cast %1046 : vector<16x128xbf16> to vector<1x16x128xbf16>
    tpu.vector_store %arg7[%c10_602, %c0_603, %c0_604], %1049 {strides = array<i32>} : memref<16x16x128xbf16, #tpu.memory_space<vmem>>, vector<1x16x128xbf16>,
    %1050 = arith.extf %1046 : vector<16x128xbf16> to vector<16x128xf32>
    %cst_605 = arith.constant dense<0x7F800000> : vector<128xf32>
    %1051 = vector.multi_reduction <minimumf>, %1050, %cst_605 [0] : vector<16x128xf32> to vector<128xf32>
    %1052 = vector.shape_cast %1051 : vector<128xf32> to vector<1x128xf32>
    %cst_606 = arith.constant dense<0xFF800000> : vector<128xf32>
    %1053 = vector.multi_reduction <maximumf>, %1050, %cst_606 [0] : vector<16x128xf32> to vector<128xf32>
    %1054 = vector.shape_cast %1053 : vector<128xf32> to vector<1x128xf32>
    %1055 = arith.minimumf %1040, %1052 : vector<1x128xf32>
    %1056 = arith.maximumf %1041, %1054 : vector<1x128xf32>
    %c11_607 = arith.constant 11 : index
    %c0_608 = arith.constant 0 : index
    %c0_609 = arith.constant 0 : index
    %1057 = vector.load %arg10[%c11_607, %c0_608, %c0_609] : memref<16x16x128xf32, #tpu.memory_space<vmem>>, vector<1x16x128xf32>
    %1058 = vector.shape_cast %1057 : vector<1x16x128xf32> to vector<16x128xf32>
    %cst_610 = arith.constant dense<0.000000e+00> : vector<16x128xf32>
    %1059 = tpu.matmul %892, %1058, %cst_610 {dimension_numbers = #tpu.dot_dimension_numbers<[1], [0], [0], [1], [0, 0, 1, 1], [], []>} : vector<16x16xf32>, vector<16x128xf32>, vector<16x128xf32> -> vector<16x128xf32>
    %cst_611 = arith.constant dense<0.000000e+00> : vector<16x128xf32>
    %1060 = tpu.matmul %1059, %893, %cst_611 {dimension_numbers = #tpu.dot_dimension_numbers<[1], [0], [0], [1], [0, 0, 1, 1], [], []>} : vector<16x128xf32>, vector<128x128xf32>, vector<16x128xf32> -> vector<16x128xf32>
    %1061 = arith.truncf %1060 : vector<16x128xf32> to vector<16x128xbf16>
    %c11_612 = arith.constant 11 : index
    %c0_613 = arith.constant 0 : index
    %c0_614 = arith.constant 0 : index
    %1062 = vector.load %arg7[%c11_612, %c0_613, %c0_614] : memref<16x16x128xbf16, #tpu.memory_space<vmem>>, vector<1x16x128xbf16>
    %1063 = vector.shape_cast %1062 : vector<1x16x128xbf16> to vector<16x128xbf16>
    %1064 = vector.shape_cast %1061 : vector<16x128xbf16> to vector<1x16x128xbf16>
    tpu.vector_store %arg7[%c11_612, %c0_613, %c0_614], %1064 {strides = array<i32>} : memref<16x16x128xbf16, #tpu.memory_space<vmem>>, vector<1x16x128xbf16>,
    %1065 = arith.extf %1061 : vector<16x128xbf16> to vector<16x128xf32>
    %cst_615 = arith.constant dense<0x7F800000> : vector<128xf32>
    %1066 = vector.multi_reduction <minimumf>, %1065, %cst_615 [0] : vector<16x128xf32> to vector<128xf32>
    %1067 = vector.shape_cast %1066 : vector<128xf32> to vector<1x128xf32>
    %cst_616 = arith.constant dense<0xFF800000> : vector<128xf32>
    %1068 = vector.multi_reduction <maximumf>, %1065, %cst_616 [0] : vector<16x128xf32> to vector<128xf32>
    %1069 = vector.shape_cast %1068 : vector<128xf32> to vector<1x128xf32>
    %1070 = arith.minimumf %1055, %1067 : vector<1x128xf32>
    %1071 = arith.maximumf %1056, %1069 : vector<1x128xf32>
    %c12_617 = arith.constant 12 : index
    %c0_618 = arith.constant 0 : index
    %c0_619 = arith.constant 0 : index
    %1072 = vector.load %arg10[%c12_617, %c0_618, %c0_619] : memref<16x16x128xf32, #tpu.memory_space<vmem>>, vector<1x16x128xf32>
    %1073 = vector.shape_cast %1072 : vector<1x16x128xf32> to vector<16x128xf32>
    %cst_620 = arith.constant dense<0.000000e+00> : vector<16x128xf32>
    %1074 = tpu.matmul %892, %1073, %cst_620 {dimension_numbers = #tpu.dot_dimension_numbers<[1], [0], [0], [1], [0, 0, 1, 1], [], []>} : vector<16x16xf32>, vector<16x128xf32>, vector<16x128xf32> -> vector<16x128xf32>
    %cst_621 = arith.constant dense<0.000000e+00> : vector<16x128xf32>
    %1075 = tpu.matmul %1074, %893, %cst_621 {dimension_numbers = #tpu.dot_dimension_numbers<[1], [0], [0], [1], [0, 0, 1, 1], [], []>} : vector<16x128xf32>, vector<128x128xf32>, vector<16x128xf32> -> vector<16x128xf32>
    %1076 = arith.truncf %1075 : vector<16x128xf32> to vector<16x128xbf16>
    %c12_622 = arith.constant 12 : index
    %c0_623 = arith.constant 0 : index
    %c0_624 = arith.constant 0 : index
    %1077 = vector.load %arg7[%c12_622, %c0_623, %c0_624] : memref<16x16x128xbf16, #tpu.memory_space<vmem>>, vector<1x16x128xbf16>
    %1078 = vector.shape_cast %1077 : vector<1x16x128xbf16> to vector<16x128xbf16>
    %1079 = vector.shape_cast %1076 : vector<16x128xbf16> to vector<1x16x128xbf16>
    tpu.vector_store %arg7[%c12_622, %c0_623, %c0_624], %1079 {strides = array<i32>} : memref<16x16x128xbf16, #tpu.memory_space<vmem>>, vector<1x16x128xbf16>,
    %1080 = arith.extf %1076 : vector<16x128xbf16> to vector<16x128xf32>
    %cst_625 = arith.constant dense<0x7F800000> : vector<128xf32>
    %1081 = vector.multi_reduction <minimumf>, %1080, %cst_625 [0] : vector<16x128xf32> to vector<128xf32>
    %1082 = vector.shape_cast %1081 : vector<128xf32> to vector<1x128xf32>
    %cst_626 = arith.constant dense<0xFF800000> : vector<128xf32>
    %1083 = vector.multi_reduction <maximumf>, %1080, %cst_626 [0] : vector<16x128xf32> to vector<128xf32>
    %1084 = vector.shape_cast %1083 : vector<128xf32> to vector<1x128xf32>
    %1085 = arith.minimumf %1070, %1082 : vector<1x128xf32>
    %1086 = arith.maximumf %1071, %1084 : vector<1x128xf32>
    %c13_627 = arith.constant 13 : index
    %c0_628 = arith.constant 0 : index
    %c0_629 = arith.constant 0 : index
    %1087 = vector.load %arg10[%c13_627, %c0_628, %c0_629] : memref<16x16x128xf32, #tpu.memory_space<vmem>>, vector<1x16x128xf32>
    %1088 = vector.shape_cast %1087 : vector<1x16x128xf32> to vector<16x128xf32>
    %cst_630 = arith.constant dense<0.000000e+00> : vector<16x128xf32>
    %1089 = tpu.matmul %892, %1088, %cst_630 {dimension_numbers = #tpu.dot_dimension_numbers<[1], [0], [0], [1], [0, 0, 1, 1], [], []>} : vector<16x16xf32>, vector<16x128xf32>, vector<16x128xf32> -> vector<16x128xf32>
    %cst_631 = arith.constant dense<0.000000e+00> : vector<16x128xf32>
    %1090 = tpu.matmul %1089, %893, %cst_631 {dimension_numbers = #tpu.dot_dimension_numbers<[1], [0], [0], [1], [0, 0, 1, 1], [], []>} : vector<16x128xf32>, vector<128x128xf32>, vector<16x128xf32> -> vector<16x128xf32>
    %1091 = arith.truncf %1090 : vector<16x128xf32> to vector<16x128xbf16>
    %c13_632 = arith.constant 13 : index
    %c0_633 = arith.constant 0 : index
    %c0_634 = arith.constant 0 : index
    %1092 = vector.load %arg7[%c13_632, %c0_633, %c0_634] : memref<16x16x128xbf16, #tpu.memory_space<vmem>>, vector<1x16x128xbf16>
    %1093 = vector.shape_cast %1092 : vector<1x16x128xbf16> to vector<16x128xbf16>
    %1094 = vector.shape_cast %1091 : vector<16x128xbf16> to vector<1x16x128xbf16>
    tpu.vector_store %arg7[%c13_632, %c0_633, %c0_634], %1094 {strides = array<i32>} : memref<16x16x128xbf16, #tpu.memory_space<vmem>>, vector<1x16x128xbf16>,
    %1095 = arith.extf %1091 : vector<16x128xbf16> to vector<16x128xf32>
    %cst_635 = arith.constant dense<0x7F800000> : vector<128xf32>
    %1096 = vector.multi_reduction <minimumf>, %1095, %cst_635 [0] : vector<16x128xf32> to vector<128xf32>
    %1097 = vector.shape_cast %1096 : vector<128xf32> to vector<1x128xf32>
    %cst_636 = arith.constant dense<0xFF800000> : vector<128xf32>
    %1098 = vector.multi_reduction <maximumf>, %1095, %cst_636 [0] : vector<16x128xf32> to vector<128xf32>
    %1099 = vector.shape_cast %1098 : vector<128xf32> to vector<1x128xf32>
    %1100 = arith.minimumf %1085, %1097 : vector<1x128xf32>
    %1101 = arith.maximumf %1086, %1099 : vector<1x128xf32>
    %c14_637 = arith.constant 14 : index
    %c0_638 = arith.constant 0 : index
    %c0_639 = arith.constant 0 : index
    %1102 = vector.load %arg10[%c14_637, %c0_638, %c0_639] : memref<16x16x128xf32, #tpu.memory_space<vmem>>, vector<1x16x128xf32>
    %1103 = vector.shape_cast %1102 : vector<1x16x128xf32> to vector<16x128xf32>
    %cst_640 = arith.constant dense<0.000000e+00> : vector<16x128xf32>
    %1104 = tpu.matmul %892, %1103, %cst_640 {dimension_numbers = #tpu.dot_dimension_numbers<[1], [0], [0], [1], [0, 0, 1, 1], [], []>} : vector<16x16xf32>, vector<16x128xf32>, vector<16x128xf32> -> vector<16x128xf32>
    %cst_641 = arith.constant dense<0.000000e+00> : vector<16x128xf32>
    %1105 = tpu.matmul %1104, %893, %cst_641 {dimension_numbers = #tpu.dot_dimension_numbers<[1], [0], [0], [1], [0, 0, 1, 1], [], []>} : vector<16x128xf32>, vector<128x128xf32>, vector<16x128xf32> -> vector<16x128xf32>
    %1106 = arith.truncf %1105 : vector<16x128xf32> to vector<16x128xbf16>
    %c14_642 = arith.constant 14 : index
    %c0_643 = arith.constant 0 : index
    %c0_644 = arith.constant 0 : index
    %1107 = vector.load %arg7[%c14_642, %c0_643, %c0_644] : memref<16x16x128xbf16, #tpu.memory_space<vmem>>, vector<1x16x128xbf16>
    %1108 = vector.shape_cast %1107 : vector<1x16x128xbf16> to vector<16x128xbf16>
    %1109 = vector.shape_cast %1106 : vector<16x128xbf16> to vector<1x16x128xbf16>
    tpu.vector_store %arg7[%c14_642, %c0_643, %c0_644], %1109 {strides = array<i32>} : memref<16x16x128xbf16, #tpu.memory_space<vmem>>, vector<1x16x128xbf16>,
    %1110 = arith.extf %1106 : vector<16x128xbf16> to vector<16x128xf32>
    %cst_645 = arith.constant dense<0x7F800000> : vector<128xf32>
    %1111 = vector.multi_reduction <minimumf>, %1110, %cst_645 [0] : vector<16x128xf32> to vector<128xf32>
    %1112 = vector.shape_cast %1111 : vector<128xf32> to vector<1x128xf32>
    %cst_646 = arith.constant dense<0xFF800000> : vector<128xf32>
    %1113 = vector.multi_reduction <maximumf>, %1110, %cst_646 [0] : vector<16x128xf32> to vector<128xf32>
    %1114 = vector.shape_cast %1113 : vector<128xf32> to vector<1x128xf32>
    %1115 = arith.minimumf %1100, %1112 : vector<1x128xf32>
    %1116 = arith.maximumf %1101, %1114 : vector<1x128xf32>
    %c15_647 = arith.constant 15 : index
    %c0_648 = arith.constant 0 : index
    %c0_649 = arith.constant 0 : index
    %1117 = vector.load %arg10[%c15_647, %c0_648, %c0_649] : memref<16x16x128xf32, #tpu.memory_space<vmem>>, vector<1x16x128xf32>
    %1118 = vector.shape_cast %1117 : vector<1x16x128xf32> to vector<16x128xf32>
    %cst_650 = arith.constant dense<0.000000e+00> : vector<16x128xf32>
    %1119 = tpu.matmul %892, %1118, %cst_650 {dimension_numbers = #tpu.dot_dimension_numbers<[1], [0], [0], [1], [0, 0, 1, 1], [], []>} : vector<16x16xf32>, vector<16x128xf32>, vector<16x128xf32> -> vector<16x128xf32>
    %cst_651 = arith.constant dense<0.000000e+00> : vector<16x128xf32>
    %1120 = tpu.matmul %1119, %893, %cst_651 {dimension_numbers = #tpu.dot_dimension_numbers<[1], [0], [0], [1], [0, 0, 1, 1], [], []>} : vector<16x128xf32>, vector<128x128xf32>, vector<16x128xf32> -> vector<16x128xf32>
    %1121 = arith.truncf %1120 : vector<16x128xf32> to vector<16x128xbf16>
    %c15_652 = arith.constant 15 : index
    %c0_653 = arith.constant 0 : index
    %c0_654 = arith.constant 0 : index
    %1122 = vector.load %arg7[%c15_652, %c0_653, %c0_654] : memref<16x16x128xbf16, #tpu.memory_space<vmem>>, vector<1x16x128xbf16>
    %1123 = vector.shape_cast %1122 : vector<1x16x128xbf16> to vector<16x128xbf16>
    %1124 = vector.shape_cast %1121 : vector<16x128xbf16> to vector<1x16x128xbf16>
    tpu.vector_store %arg7[%c15_652, %c0_653, %c0_654], %1124 {strides = array<i32>} : memref<16x16x128xbf16, #tpu.memory_space<vmem>>, vector<1x16x128xbf16>,
    %1125 = arith.extf %1121 : vector<16x128xbf16> to vector<16x128xf32>
    %cst_655 = arith.constant dense<0x7F800000> : vector<128xf32>
    %1126 = vector.multi_reduction <minimumf>, %1125, %cst_655 [0] : vector<16x128xf32> to vector<128xf32>
    %1127 = vector.shape_cast %1126 : vector<128xf32> to vector<1x128xf32>
    %cst_656 = arith.constant dense<0xFF800000> : vector<128xf32>
    %1128 = vector.multi_reduction <maximumf>, %1125, %cst_656 [0] : vector<16x128xf32> to vector<128xf32>
    %1129 = vector.shape_cast %1128 : vector<128xf32> to vector<1x128xf32>
    %1130 = arith.minimumf %1115, %1127 : vector<1x128xf32>
    %1131 = arith.maximumf %1116, %1129 : vector<1x128xf32>
    %1132 = vector.shape_cast %1130 : vector<1x128xf32> to vector<1x1x128xf32>
    %c0_657 = arith.constant 0 : index
    %c0_658 = arith.constant 0 : index
    %c0_659 = arith.constant 0 : index
    %1133 = vector.load %arg8[%c0_657, %c0_658, %c0_659] : memref<1x1x128xf32, #tpu.memory_space<vmem>>, vector<1x1x128xf32>
    tpu.vector_store %arg8[%c0_657, %c0_658, %c0_659], %1132 {strides = array<i32>} : memref<1x1x128xf32, #tpu.memory_space<vmem>>, vector<1x1x128xf32>,
    %1134 = vector.shape_cast %1131 : vector<1x128xf32> to vector<1x1x128xf32>
    %c0_660 = arith.constant 0 : index
    %c0_661 = arith.constant 0 : index
    %c0_662 = arith.constant 0 : index
    %1135 = vector.load %arg9[%c0_660, %c0_661, %c0_662] : memref<1x1x128xf32, #tpu.memory_space<vmem>>, vector<1x1x128xf32>
    tpu.vector_store %arg9[%c0_660, %c0_661, %c0_662], %1134 {strides = array<i32>} : memref<1x1x128xf32, #tpu.memory_space<vmem>>, vector<1x1x128xf32>,
    return
  }
  func.func @transform_0(%arg0: i32) -> i32 {
    %c0_i32 = arith.constant 0 : i32
    %c0_i32_0 = arith.constant 0 : i32
    return %c0_i32 : i32
  }
  func.func @transform_1(%arg0: i32) -> i32 {
    %c0_i32 = arith.constant 0 : i32
    %c0_i32_0 = arith.constant 0 : i32
    return %c0_i32 : i32
  }
  func.func @transform_2(%arg0: i32) -> (i32, i32) {
    %c0_i32 = arith.constant 0 : i32
    %c0_i32_0 = arith.constant 0 : i32
    %c0_i32_1 = arith.constant 0 : i32
    return %c0_i32, %c0_i32_0 : i32, i32
  }
  func.func @transform_3(%arg0: i32) -> (i32, i32) {
    %c0_i32 = arith.constant 0 : i32
    %c0_i32_0 = arith.constant 0 : i32
    %c0_i32_1 = arith.constant 0 : i32
    return %c0_i32, %c0_i32_0 : i32, i32
  }
  func.func @transform_4(%arg0: i32) -> (i32, i32, i32, i32) {
    %c0_i32 = arith.constant 0 : i32
    %c0_i32_0 = arith.constant 0 : i32
    %c0_i32_1 = arith.constant 0 : i32
    %c0_i32_2 = arith.constant 0 : i32
    return %arg0, %c0_i32, %c0_i32_0, %c0_i32_1 : i32, i32, i32, i32
  }
  func.func @transform_5(%arg0: i32) -> (i32, i32, i32, i32) {
    %c0_i32 = arith.constant 0 : i32
    %c0_i32_0 = arith.constant 0 : i32
    %c0_i32_1 = arith.constant 0 : i32
    %c0_i32_2 = arith.constant 0 : i32
    return %arg0, %c0_i32, %c0_i32_0, %c0_i32_1 : i32, i32, i32, i32
  }
  func.func @transform_6(%arg0: i32) -> (i32, i32, i32) {
    %c0_i32 = arith.constant 0 : i32
    %c0_i32_0 = arith.constant 0 : i32
    %c0_i32_1 = arith.constant 0 : i32
    return %arg0, %c0_i32, %c0_i32_0 : i32, i32, i32
  }
  func.func @transform_7(%arg0: i32) -> (i32, i32, i32) {
    %c0_i32 = arith.constant 0 : i32
    %c0_i32_0 = arith.constant 0 : i32
    %c0_i32_1 = arith.constant 0 : i32
    return %arg0, %c0_i32, %c0_i32_0 : i32, i32, i32
  }
  func.func @transform_8(%arg0: i32) -> (i32, i32, i32) {
    %c0_i32 = arith.constant 0 : i32
    %c0_i32_0 = arith.constant 0 : i32
    %c0_i32_1 = arith.constant 0 : i32
    return %arg0, %c0_i32, %c0_i32_0 : i32, i32, i32
  }
}

</mosaic_0001>

<bundles_post_ra>
// kernel: tpu_custom_call.1
= control target key start
LH: loop header
LB: loop body
LE: loop exit
PB: predicated region body
PF: predicated region fallthrough
CT: control target
= control target key end

     0   :  { %14 = vsyncpa [#allocation6], 0  ;;  %s7451_s0 = inlined_call_operand.hbm [shape: f32[6], index: 0, kind: input, shape index: {}]   ;;  %s7452_s1 = inlined_call_operand.hbm [shape: f32[2], index: 1, kind: input, shape index: {}]   ;;  %s7453_s2 = inlined_call_operand.hbm [shape: f32[16,16], index: 2, kind: input, shape index: {}]   ;;  %s7454_s3 = inlined_call_operand.hbm [shape: f32[128,128], index: 3, kind: input, shape index: {}]   ;;  %s7455_s4 = inlined_call_operand.hbm [shape: s8[1,18,16,128], index: 4, kind: input, shape index: {}]   ;;  %s7456_s5 = inlined_call_operand.hbm [shape: bf16[1,18,16,128], index: 5, kind: input, shape index: {}]   ;;  %s7457_s6 = inlined_call_operand.hbm [shape: bf16[16,16,128], index: 6, kind: output, shape index: {0}]   ;;  %s7458_s7 = inlined_call_operand.hbm [shape: f32[1,1,128], index: 7, kind: output, shape index: {1}]   ;;  %s7459_s8 = inlined_call_operand.hbm [shape: f32[1,1,128], index: 8, kind: output, shape index: {2}]  }
   0x1   :  { %15 = vsyncpa [#allocation8], 0 }
   0x2   :  { %16 = vsyncpa [#allocation4], 0 }
   0x3   :  { %17 = vsyncpa [#allocation11], 0 }
   0x4   :  { %18 = vsyncpa [#allocation14], 0 }
   0x5   :  { %19 = vsyncpa [#allocation5], 0 }
   0x6   :  { %20 = vsyncpa [#allocation17], 0  ;;  %s6174_s27 = smov [#allocation10]   ;;  %s5986_s9 = scalar_lea.hbm %s7454_s3, 2048 }
   0x7   :  { %s54_s28 = sshll.u32 %s6174_s27, 4  ;;  %p5987_p0 = scmp.ne.s32.totalorder %s7454_s3, %s5986_s9  ;;  %s55_s28 = int_to_ptr.vmem [resolvable:$true] %s54_s28 }
   0x8   :  { %p5990_p1 = scmp.lt.u32.totalorder %s5986_s9, %s7454_s3 }
   0xa   :  { %p5992_p2 = pnand %p5990_p1, %p5987_p0 }
   0xc   :  { %5995 = shalt.err (!%p5992_p2)
}
   0xd   :  { %s5996_s14 = scalar_lea.vmem %s55_s28, 2048  ;;  %p6001_p4 = scmp.lt.s32.totalorder %s55_s28, %s55_s28 }
   0xe   :  { %p5997_p3 = scmp.ne.s32.totalorder %s55_s28, %s5996_s14  ;;  %p6002_p5 = scmp.lt.s32.totalorder %s5996_s14, %s5996_s14 }
  0x10   :  { %p6003_p6 = por %p6002_p5, %p6001_p4 }
  0x12   :  { %p6004_p7 = pnand %p6003_p6, %p5997_p3 }
  0x14   :  { %6007 = shalt.err (!%p6004_p7)
}
  0x15   :  { %s6175_s15 = smov 128   ;;  %s6176_s16 = smov 8  }
  0x16   :  { %60 = dma.hbm_to_vmem [thread:$0]  %s7454_s3, 2048, %s55_s28, [#allocation11], %s6175_s15, %s6175_s15, %s6176_s16  }
  0x17   :  { %s6008_s21 = scalar_lea.hbm %s7451_s0, 16 }
  0x18   :  { %p6009_p8 = scmp.ne.s32.totalorder %s7451_s0, %s6008_s21  ;;  %p6012_p9 = scmp.lt.u32.totalorder %s6008_s21, %s7451_s0 }
  0x1a   :  { %p6014_p10 = pnand %p6012_p9, %p6009_p8 }
  0x1c   :  { %6017 = shalt.err (!%p6014_p10)
}
  0x1d   :  { %s6177_s26 = smov [#allocation3]   ;;  %s6018_s30 = scalar_lea.hbm %s7452_s1, 16 }
  0x1e   :  { %28 = dma.hbm_to_smem %s7451_s0, 16, %s6177_s26, [#allocation6]  }
  0x1f   :  { %p6019_p11 = scmp.ne.s32.totalorder %s7452_s1, %s6018_s30  ;;  %p6022_p12 = scmp.lt.u32.totalorder %s6018_s30, %s7452_s1 }
  0x21   :  { %p6024_p13 = pnand %p6022_p12, %p6019_p11 }
  0x23   :  { %6027 = shalt.err (!%p6024_p13)
}
  0x24   :  { %s6178_s13 = smov [#allocation7]   ;;  %s6179_s0 = smov [#allocation9]  }
  0x25   :  { %36 = dma.hbm_to_smem %s7452_s1, 16, %s6178_s13, [#allocation8]  }
  0x26   :  { %s42_s18 = sshll.u32 %s6179_s0, 4  ;;  %s6180_s19 = smov [#allocation12]   ;;  %s43_s18 = int_to_ptr.vmem [resolvable:$true] %s42_s18 }
  0x27   :  { %s66_s20 = sshll.u32 %s6180_s19, 4  ;;  %s6028_s23 = scalar_lea.hbm %s7453_s2, 256  ;;  %s67_s20 = int_to_ptr.vmem [resolvable:$true] %s66_s20 }
  0x28   :  { %p6029_p0 = scmp.ne.s32.totalorder %s7453_s2, %s6028_s23  ;;  %p6032_p1 = scmp.lt.u32.totalorder %s6028_s23, %s7453_s2 }
  0x2a   :  { %p6034_p2 = pnand %p6032_p1, %p6029_p0 }
  0x2c   :  { %6037 = shalt.err (!%p6034_p2)
}
  0x2d   :  { %s6038_s1 = scalar_lea.vmem %s43_s18, 256  ;;  %p6043_p4 = scmp.lt.s32.totalorder %s43_s18, %s43_s18 }
  0x2e   :  { %p6039_p3 = scmp.ne.s32.totalorder %s43_s18, %s6038_s1  ;;  %p6044_p5 = scmp.lt.s32.totalorder %s6038_s1, %s6038_s1 }
  0x30   :  { %p6045_p6 = por %p6044_p5, %p6043_p4 }
  0x32   :  { %p6046_p7 = pnand %p6045_p6, %p6039_p3 }
  0x34   :  { %6049 = shalt.err (!%p6046_p7)
}
  0x35   :  { %48 = dma.hbm_to_vmem [thread:$0]  %s7453_s2, 256, %s43_s18, [#allocation4], %s6175_s15, %s6175_s15, %s6176_s16  }
  0x36   :  { %s6050_s9 = scalar_lea.hbm %s7455_s4, 1152 }
  0x37   :  { %p6051_p8 = scmp.ne.s32.totalorder %s7455_s4, %s6050_s9  ;;  %p6054_p9 = scmp.lt.u32.totalorder %s6050_s9, %s7455_s4 }
  0x39   :  { %p6056_p10 = pnand %p6054_p9, %p6051_p8 }
  0x3b   :  { %6059 = shalt.err (!%p6056_p10)
}
  0x3c   :  { %s6060_s14 = scalar_lea.vmem %s67_s20, 1152  ;;  %p6065_p12 = scmp.lt.s32.totalorder %s67_s20, %s67_s20 }
  0x3d   :  { %p6061_p11 = scmp.ne.s32.totalorder %s67_s20, %s6060_s14  ;;  %p6066_p13 = scmp.lt.s32.totalorder %s6060_s14, %s6060_s14 }
  0x3f   :  { %p6067_p0 = por %p6066_p13, %p6065_p12 }
  0x41   :  { %p6068_p1 = pnand %p6067_p0, %p6061_p11 }
  0x43   :  { %6071 = shalt.err (!%p6068_p1)
}
  0x44   :  { %s6181_s2 = smov 32   ;;  %s6182_s15 = smov 2  }
  0x45   :  { %72 = dma.hbm_to_vmem [thread:$0]  %s7455_s4, 1152, %s67_s20, [#allocation11], %s6181_s2, %s6181_s2, %s6182_s15  }
  0x46   :  { %s6183_s0 = smov [#allocation13]   ;;  %s6072_s22 = scalar_lea.hbm %s7456_s5, 2304 }
  0x47   :  { %s78_s18 = sshll.u32 %s6183_s0, 4  ;;  %p6073_p2 = scmp.ne.s32.totalorder %s7456_s5, %s6072_s22  ;;  %s79_s18 = int_to_ptr.vmem [resolvable:$true] %s78_s18 }
  0x48   :  { %p6076_p3 = scmp.lt.u32.totalorder %s6072_s22, %s7456_s5 }
  0x4a   :  { %p6078_p4 = pnand %p6076_p3, %p6073_p2 }
  0x4c   :  { %6081 = shalt.err (!%p6078_p4)
}
  0x4d   :  { %s6082_s27 = scalar_lea.vmem %s79_s18, 2304  ;;  %p6087_p6 = scmp.lt.s32.totalorder %s79_s18, %s79_s18 }
  0x4e   :  { %p6083_p5 = scmp.ne.s32.totalorder %s79_s18, %s6082_s27  ;;  %p6088_p7 = scmp.lt.s32.totalorder %s6082_s27, %s6082_s27 }
  0x50   :  { %p6089_p8 = por %p6088_p7, %p6087_p6 }
  0x52   :  { %p6090_p9 = pnand %p6089_p8, %p6083_p5 }
  0x54   :  { %6093 = shalt.err (!%p6090_p9)
}
  0x55   :  { %s6184_s4 = smov 64   ;;  %s6185_s20 = smov 4  }
  0x56   :  { %84 = dma.hbm_to_vmem [thread:$0]  %s7456_s5, 2304, %s79_s18, [#allocation14], %s6184_s4, %s6184_s4, %s6185_s20  }
  0x57   :  { %6160 = dma.done.wait [#allocation6], 16  }
  0x58   :  { %6161 = vsyncadd [#allocation6], 4294967280 }
  0x59   :  { %6162 = dma.done.wait [#allocation8], 16  }
  0x5a   :  { %6163 = vsyncadd [#allocation8], 4294967280 }
  0x5b   :  { %6164 = dma.done.wait [#allocation4], 256  }
  0x5c   :  { %6165 = vsyncadd [#allocation4], 4294967040 }
  0x5d   :  { %6166 = dma.done.wait [#allocation11], 3200  }
  0x5e   :  { %6167 = vsyncadd [#allocation11], 4294964096 }
  0x5f   :  { %6168 = dma.done.wait [#allocation14], 2304  }
  0x60   :  { %6169 = vsyncadd [#allocation14], 4294964992 }
  0x61   :  { %103 = sfence }
  0x62   :  { %s6315_s3 = sld [smem:[#allocation3]]  ;;  %s6317_s28 = sld [smem:[#allocation3 + $0x1]]  ;;  %v4296_v0 = vld [vmem:[#allocation12] sm:$0xff]   ;;  %v4144_v1 = vld [vmem:[#allocation13] sm:$0xff]   ;;  %v6323_v6 = vld [vmem:[#allocation13 + $0x8] sm:$0xff]  }
  0x63   :  { %s6319_s30 = sld [smem:[#allocation3 + $0x2]]  ;;  %s6321_s5 = sld [smem:[#allocation3 + $0x3]]  ;;  %v4297_v2 = vunpack.c.0.s8 %v4296_v0  ;;  %v4298_v3 = vunpack.c.1.s8 %v4296_v0  ;;  %v4145_v4 = vunpack.c.l.bf16 %v4144_v1  ;;  %v4146_v5 = vunpack.c.h.bf16 %v4144_v1  ;;  %v6325_v7 = vld [vmem:[#allocation12 + $0x8] sm:$0xff]   ;;  %v4152_v60 = vld [vmem:[#allocation13 + $0x10] sm:$0xff]   ;;  %v4156_v1 = vld [vmem:[#allocation13 + $0x18] sm:$0xff]  }
  0x64   :  { %s4044_s9 = sld [smem:[#allocation3 + $0x4]]  ;;  %s4045_s10 = sld [smem:[#allocation3 + $0x5]]  ;;  %v6327_v8 = vunpack.c.2.s8 %v4296_v0  ;;  %v6329_v9 = vunpack.c.3.s8 %v4296_v0  ;;  %v4149_v10 = vunpack.c.l.bf16 %v6323_v6  ;;  %v4150_v11 = vunpack.c.h.bf16 %v6323_v6 }
  0x65   :  { %s110_s11 = sld [smem:[#allocation7]]  ;;  %vm116_vm0 = vcmp.eq.s32.totalorder %v4297_v2, 0  ;;  %vm117_vm1 = vcmp.eq.s32.totalorder %v4298_v3, 0  ;;  %v6334_v12 = vunpack.c.0.s8 %v6325_v7  ;;  %v6337_v13 = vunpack.c.1.s8 %v6325_v7  ;;  %s6363_s12 = sld [smem:[#allocation7 + $0x1]] }
  0x66   :  { %vm121_vm2 = vcmp.eq.s32.totalorder %v4297_v2, 1  ;;  %vm122_vm3 = vcmp.eq.s32.totalorder %v4298_v3, 1  ;;  %vm126_vm4 = vcmp.eq.s32.totalorder %v4297_v2, 2  ;;  %vm127_vm5 = vcmp.eq.s32.totalorder %v4298_v3, 2  ;;  %s6186_s13 = smov [#allocation15]  }
  0x67   :  { %vm131_vm6 = vcmp.eq.s32.totalorder %v4297_v2, 3  ;;  %vm132_vm7 = vcmp.eq.s32.totalorder %v4298_v3, 3  ;;  %vm136_vm8 = vcmp.eq.s32.totalorder %v4297_v2, 4  ;;  %vm137_vm9 = vcmp.eq.s32.totalorder %v4298_v3, 4  ;;  %s3998_s14 = sshll.u32 %s6186_s13, 4  ;;  %s3999_s14 = int_to_ptr.vmem [resolvable:$true] %s3998_s14 }
  0x68   :  { %v6340_v14 = vstv %s6315_s3  ;;  %v6343_v15 = vstv %s6317_s28  ;;  %vm141_vm10 = vcmp.eq.s32.totalorder %v4297_v2, 5  ;;  %vm142_vm11 = vcmp.eq.s32.totalorder %v4298_v3, 5  ;;  %s6094_s2 = scalar_lea.vmem %s3999_s14, 2048  ;;  %p6099_p11 = scmp.lt.s32.totalorder %s3999_s14, %s3999_s14 }
  0x69   :  { %v119_v16 = vsel %vm116_vm0, %v6340_v14, 0.0  ;;  %v120_v17 = vsel %vm117_vm1, %v6340_v14, 0.0  ;;  %v6350_v18 = vstv %s6319_s30  ;;  %v6353_v19 = vstv %s6321_s5  ;;  %p6095_p10 = scmp.ne.s32.totalorder %s3999_s14, %s6094_s2  ;;  %p6100_p12 = scmp.lt.s32.totalorder %s6094_s2, %s6094_s2 }
  0x6a   :  { %v124_v20 = vsel %vm121_vm2, %v6343_v15, %v119_v16  ;;  %v125_v21 = vsel %vm122_vm3, %v6343_v15, %v120_v17  ;;  %v6359_v22 = vstv %s4044_s9  ;;  %v6361_v23 = vstv %s4045_s10 }
  0x6b   :  { %v129_v24 = vsel %vm126_vm4, %v6350_v18, %v124_v20  ;;  %v130_v25 = vsel %vm127_vm5, %v6350_v18, %v125_v21  ;;  %v6369_v26 = vstv %s110_s11  ;;  %vm162_vm12 = vcmp.eq.s32.totalorder %v6327_v8, 0  ;;  %p6101_p13 = por %p6100_p12, %p6099_p11 }
  0x6c   :  { %v134_v27 = vsel %vm131_vm6, %v6353_v19, %v129_v24  ;;  %v135_v28 = vsel %vm132_vm7, %v6353_v19, %v130_v25  ;;  %vm163_vm13 = vcmp.eq.s32.totalorder %v6329_v9, 0  ;;  %v164_v29 = vsel %vm162_vm12, %v6340_v14, 0.0 }
  0x6d   :  { %v139_v30 = vsel %vm136_vm8, %v6359_v22, %v134_v27  ;;  %v140_v31 = vsel %vm137_vm9, %v6359_v22, %v135_v28  ;;  %v165_v32 = vsel %vm163_vm13, %v6340_v14, 0.0  ;;  %vm166_vm14 = vcmp.eq.s32.totalorder %v6327_v8, 1  ;;  %p6102_p0 = pnand %p6101_p13, %p6095_p10 }
  0x6e   :  { %v144_v33 = vsel %vm141_vm10, %v6361_v23, %v139_v30  ;;  %v145_v34 = vsel %vm142_vm11, %v6361_v23, %v140_v31  ;;  %vm167_vm15 = vcmp.eq.s32.totalorder %v6329_v9, 1  ;;  %v168_v35 = vsel %vm166_vm14, %v6343_v15, %v164_v29 }
  0x6f   :  { %v150_v36 = vadd.f32 %v4145_v4, %v144_v33  ;;  %v151_v37 = vadd.f32 %v4146_v5, %v145_v34  ;;  %v169_v38 = vsel %vm167_vm15, %v6343_v15, %v165_v32  ;;  %vm170_vm0 = vcmp.eq.s32.totalorder %v6327_v8, 2 }
  0x70   :  { %vm171_vm1 = vcmp.eq.s32.totalorder %v6329_v9, 2  ;;  %v172_v39 = vsel %vm170_vm0, %v6350_v18, %v168_v35  ;;  %vm174_vm2 = vcmp.eq.s32.totalorder %v6327_v8, 3  ;;  %vm175_vm3 = vcmp.eq.s32.totalorder %v6329_v9, 3 }
  0x71   :  { %v153_v40 = vmul.f32 %v6369_v26, %v150_v36  ;;  %v154_v41 = vmul.f32 %v6369_v26, %v151_v37  ;;  %v173_v42 = vsel %vm171_vm1, %v6350_v18, %v169_v38  ;;  %v176_v43 = vsel %vm174_vm2, %v6353_v19, %v172_v39 }
  0x72   :  { %v177_v44 = vsel %vm175_vm3, %v6353_v19, %v173_v42  ;;  %vm178_vm4 = vcmp.eq.s32.totalorder %v6327_v8, 4  ;;  %vm179_vm5 = vcmp.eq.s32.totalorder %v6329_v9, 4  ;;  %vm182_vm6 = vcmp.eq.s32.totalorder %v6327_v8, 5 }
  0x73   :  { %v180_v45 = vsel %vm178_vm4, %v6359_v22, %v176_v43  ;;  %v181_v46 = vsel %vm179_vm5, %v6359_v22, %v177_v44  ;;  %vm183_vm7 = vcmp.eq.s32.totalorder %v6329_v9, 5  ;;  %v6408_v47 = vstv %s6363_s12 }
  0x74   :  { %v184_v48 = vsel %vm182_vm6, %v6361_v23, %v180_v45  ;;  %v185_v49 = vsel %vm183_vm7, %v6361_v23, %v181_v46  ;;  %vm212_vm8 = vcmp.eq.s32.totalorder %v6334_v12, 0  ;;  %vm213_vm9 = vcmp.eq.s32.totalorder %v6337_v13, 0 }
  0x75   :  { %v6416_v50 = vadd.f32 %v4149_v10, %v184_v48  ;;  %v6420_v51 = vadd.f32 %v4150_v11, %v185_v49  ;;  %v214_v52 = vsel %vm212_vm8, %v6340_v14, 0.0  ;;  %v215_v53 = vsel %vm213_vm9, %v6340_v14, 0.0 }
  0x76   :  { %vm216_vm10 = vcmp.eq.s32.totalorder %v6334_v12, 1  ;;  %vm217_vm11 = vcmp.eq.s32.totalorder %v6337_v13, 1  ;;  %vm220_vm12 = vcmp.eq.s32.totalorder %v6334_v12, 2  ;;  %vm221_vm13 = vcmp.eq.s32.totalorder %v6337_v13, 2 }
  0x77   :  { %v201_v54 = vmul.f32 %v6408_v47, %v6416_v50  ;;  %v202_v55 = vmul.f32 %v6408_v47, %v6420_v51  ;;  %v218_v56 = vsel %vm216_vm10, %v6343_v15, %v214_v52  ;;  %v219_v57 = vsel %vm217_vm11, %v6343_v15, %v215_v53 }
  0x78   :  { %v222_v58 = vsel %vm220_vm12, %v6350_v18, %v218_v56  ;;  %v223_v59 = vsel %vm221_vm13, %v6350_v18, %v219_v57  ;;  %vm224_vm14 = vcmp.eq.s32.totalorder %v6334_v12, 3  ;;  %vm225_vm15 = vcmp.eq.s32.totalorder %v6337_v13, 3  ;;  %v1076_v56 = vld [vmem:[#allocation10 + $0x8] sm:$0xff]  ;;  %v6484_v57 = vld [vmem:[#allocation9] sm:$0xff] }
  0x79   :  { %v203_v61 = vadd.f32 %v201_v54, %v153_v40  ;;  %v204_v62 = vadd.f32 %v202_v55, %v154_v41  ;;  %v226_v63 = vsel %vm224_vm14, %v6353_v19, %v222_v58  ;;  %v227_v0 = vsel %vm225_vm15, %v6353_v19, %v223_v59  ;;  %v1075_v55 = vld [vmem:[#allocation10] sm:$0xff]  ;;  %v1077_v58 = vld [vmem:[#allocation10 + $0x10] sm:$0xff]  ;;  %v1078_v59 = vld [vmem:[#allocation10 + $0x18] sm:$0xff] }
  0x7a   :  { %vm228_vm0 = vcmp.eq.s32.totalorder %v6334_v12, 4  ;;  %vm229_vm1 = vcmp.eq.s32.totalorder %v6337_v13, 4  ;;  %vm232_vm2 = vcmp.eq.s32.totalorder %v6334_v12, 5  ;;  %vm233_vm3 = vcmp.eq.s32.totalorder %v6337_v13, 5 }
  0x7b   :  { %v230_v2 = vsel %vm228_vm0, %v6359_v22, %v226_v63  ;;  %v231_v3 = vsel %vm229_vm1, %v6359_v22, %v227_v0  ;;  %v4153_v4 = vunpack.c.l.bf16 %v4152_v60  ;;  %v4154_v5 = vunpack.c.h.bf16 %v4152_v60  ;;  %v1079_v0 = vld [vmem:[#allocation10 + $0x20] sm:$0xff] }
  0x7c   :  { %v234_v6 = vsel %vm232_vm2, %v6361_v23, %v230_v2  ;;  %v235_v8 = vsel %vm233_vm3, %v6361_v23, %v231_v3  ;;  %v4309_v9 = vunpack.c.2.s8 %v6325_v7  ;;  %v4310_v10 = vunpack.c.3.s8 %v6325_v7  ;;  %v1081_v3 = vld [vmem:[#allocation10 + $0x30] sm:$0xff] }
  0x7d   :  { %v241_v11 = vadd.f32 %v4153_v4, %v234_v6  ;;  %v242_v16 = vadd.f32 %v4154_v5, %v235_v8  ;;  %v4157_v12 = vunpack.c.l.bf16 %v4156_v1  ;;  %v4158_v17 = vunpack.c.h.bf16 %v4156_v1  ;;  %v1080_v1 = vld [vmem:[#allocation10 + $0x28] sm:$0xff]  ;;  %v1082_v4 = vld [vmem:[#allocation10 + $0x38] sm:$0xff]  ;;  %v1083_v6 = vld [vmem:[#allocation10 + $0x40] sm:$0xff] }
  0x7e   :  { %vm267_vm4 = vcmp.eq.s32.totalorder %v4309_v9, 0  ;;  %vm268_vm5 = vcmp.eq.s32.totalorder %v4310_v10, 0  ;;  %vm271_vm6 = vcmp.eq.s32.totalorder %v4309_v9, 1  ;;  %vm272_vm7 = vcmp.eq.s32.totalorder %v4310_v10, 1  ;;  %v1084_v8 = vld [vmem:[#allocation10 + $0x48] sm:$0xff] }
  0x7f   :  { %v243_v13 = vmul.f32 %v241_v11, %v6369_v26  ;;  %v244_v20 = vmul.f32 %v242_v16, %v6369_v26  ;;  %v269_v21 = vsel %vm267_vm4, %v6340_v14, 0.0  ;;  %v270_v24 = vsel %vm268_vm5, %v6340_v14, 0.0 }
  0x80   :  { %v273_v25 = vsel %vm271_vm6, %v6343_v15, %v269_v21  ;;  %v274_v7 = vsel %vm272_vm7, %v6343_v15, %v270_v24  ;;  %vm275_vm8 = vcmp.eq.s32.totalorder %v4309_v9, 2  ;;  %vm276_vm9 = vcmp.eq.s32.totalorder %v4310_v10, 2  ;;  %v1090_v21 = vld [vmem:[#allocation10 + $0x78] sm:$0xff] }
  0x81   :  { %v258_v27 = vadd.f32 %v243_v13, %v203_v61  ;;  %v259_v28 = vadd.f32 %v244_v20, %v204_v62  ;;  %v277_v29 = vsel %vm275_vm8, %v6350_v18, %v273_v25  ;;  %v278_v30 = vsel %vm276_vm9, %v6350_v18, %v274_v7  ;;  %v6486_v61 = vld [vmem:[#allocation9 + $0x8] sm:$0xff]  ;;  %v4312_v25 = vld [vmem:[#allocation12 + $0x10] sm:$0xff]  }
  0x82   :  { %vm279_vm10 = vcmp.eq.s32.totalorder %v4309_v9, 3  ;;  %vm280_vm11 = vcmp.eq.s32.totalorder %v4310_v10, 3  ;;  %vm283_vm12 = vcmp.eq.s32.totalorder %v4309_v9, 4  ;;  %vm284_vm13 = vcmp.eq.s32.totalorder %v4310_v10, 4 }
  0x83   :  { %v281_v31 = vsel %vm279_vm10, %v6353_v19, %v277_v29  ;;  %v282_v32 = vsel %vm280_vm11, %v6353_v19, %v278_v30  ;;  %vm287_vm14 = vcmp.eq.s32.totalorder %v4309_v9, 5  ;;  %vm288_vm15 = vcmp.eq.s32.totalorder %v4310_v10, 5  ;;  %v1085_v10 = vld [vmem:[#allocation10 + $0x50] sm:$0xff] }
  0x84   :  { %v285_v33 = vsel %vm283_vm12, %v6359_v22, %v281_v31  ;;  %v286_v34 = vsel %vm284_vm13, %v6359_v22, %v282_v32  ;;  %v5391_v35 = vpack.c.bf16 %v259_v28, %v258_v27  ;;  %v193_v36 = vmul.f32 %v6416_v50, %v6369_v26 }
  0x85   :  { %v289_v37 = vsel %vm287_vm14, %v6361_v23, %v285_v33  ;;  %v290_v38 = vsel %vm288_vm15, %v6361_v23, %v286_v34  ;;  %v194_v39 = vmul.f32 %v6420_v51, %v6369_v26  ;;  %v250_v40 = vmul.f32 %v241_v11, %v6408_v47  ;;  %v1086_v11 = vld [vmem:[#allocation10 + $0x58] sm:$0xff] }
  0x86   :  { %v296_v41 = vadd.f32 %v4157_v12, %v289_v37  ;;  %v297_v42 = vadd.f32 %v4158_v17, %v290_v38  ;;  %5392 = vmatprep.subr.bf16.mxu1 %v5391_v35  ;;  %v251_v43 = vmul.f32 %v242_v16, %v6408_v47  ;;  %vm1093_vm0 = vcmask 130048   ;;  %v1087_v12 = vld [vmem:[#allocation10 + $0x60] sm:$0xff]  ;;  %v1088_v17 = vld [vmem:[#allocation10 + $0x68] sm:$0xff] }
  0x87   :  { %v252_v44 = vadd.f32 %v250_v40, %v193_v36  ;;  %5394 = vmatpush3.bf16.msra.mxu1 %v5391_v35  ;;  %v6488_v62 = vpack.c.bf16 %v1076_v56, %v1075_v55  ;;  %4723 = vmatprep.mubr.msk.f32.mxu1 %vm1093_vm0, %v6484_v57  ;;  %v6492_v63 = vpack.c.bf16 %v1078_v59, %v1077_v58  ;;  %v4313_v7 = vunpack.c.0.s8 %v4312_v25  ;;  %v4160_v36 = vld [vmem:[#allocation13 + $0x20] sm:$0xff]  }
  0x88   :  { %v305_v45 = vmul.f32 %v296_v41, %v6408_v47  ;;  %v306_v46 = vmul.f32 %v297_v42, %v6408_v47  ;;  %v253_v48 = vadd.f32 %v251_v43, %v194_v39  ;;  %v6473_v49 = vmul.f32 %v296_v41, %v6369_v26  ;;  %4765 = vmatprep.mubr.msk.f32.mxu0 %vm1093_vm0, %v6484_v57 }
  0x89   :  { %v6476_v50 = vmul.f32 %v297_v42, %v6369_v26  ;;  %5396 = vmatprep.subr.bf16.mxu1 %v6488_v62  ;;  %v6504_v2 = vpack.c.bf16 %v1080_v1, %v1079_v0  ;;  %v6510_v5 = vpack.c.bf16 %v1082_v4, %v1081_v3  ;;  %v6516_v9 = vpack.c.bf16 %v1084_v8, %v1083_v6  ;;  %v4164_v3 = vld [vmem:[#allocation13 + $0x28] sm:$0xff]  }
  0x8a   :  { %v6478_v51 = vadd.f32 %v305_v45, %v243_v13  ;;  %v6480_v52 = vadd.f32 %v306_v46, %v244_v20  ;;  %v313_v53 = vadd.f32 %v6473_v49, %v252_v44  ;;  %4724 = vmatmul.mubr.msk.f32.vlgmr.msra.gmra.mrb[0].mxu1 %vm1093_vm0, %v6486_v61  ;;  %v6522_v16 = vpack.c.bf16 %v1086_v11, %v1085_v10  ;;  %v1089_v20 = vld [vmem:[#allocation10 + $0x70] sm:$0xff] }
  0x8b   :  { %v314_v54 = vadd.f32 %v6476_v50, %v253_v48  ;;  %5398 = vmatpush3.bf16.msra.mxu1 %v6488_v62  ;;  %v6528_v13 = vpack.c.bf16 %v1088_v17, %v1087_v12  ;;  %v6534_v24 = vpack.c.bf16 %v1090_v21, %v1089_v20  ;;  %v4314_v27 = vunpack.c.1.s8 %v4312_v25 }
  0x8c   :  { %5400 = vmatprep.subr.bf16.mxu1 %v6492_v63  ;;  %vm322_vm1 = vcmp.eq.s32.totalorder %v4313_v7, 0  ;;  %vm326_vm3 = vcmp.eq.s32.totalorder %v4313_v7, 1  ;;  %vm330_vm5 = vcmp.eq.s32.totalorder %v4313_v7, 2  ;;  %vm334_vm7 = vcmp.eq.s32.totalorder %v4313_v7, 3 }
  0x8d   :  { %v5427_v60 = vpack.c.bf16 %v314_v54, %v313_v53  ;;  %vm323_vm2 = vcmp.eq.s32.totalorder %v4314_v27, 0  ;;  %v324_v28 = vsel %vm322_vm1, %v6340_v14, 0.0  ;;  %vm327_vm4 = vcmp.eq.s32.totalorder %v4314_v27, 1 }
  0x8e   :  { %v325_v29 = vsel %vm323_vm2, %v6340_v14, 0.0  ;;  %v328_v30 = vsel %vm326_vm3, %v6343_v15, %v324_v28  ;;  %vm331_vm6 = vcmp.eq.s32.totalorder %v4314_v27, 2  ;;  %vm335_vm8 = vcmp.eq.s32.totalorder %v4314_v27, 3 }
  0x8f   :  { %5428 = vmatprep.subr.bf16.mxu0 %v5427_v60  ;;  %5402 = vmatpush3.bf16.msra.mxu1 %v6492_v63  ;;  %v329_v31 = vsel %vm327_vm4, %v6343_v15, %v325_v29  ;;  %v332_v32 = vsel %vm330_vm5, %v6350_v18, %v328_v30  ;;  %vm338_vm9 = vcmp.eq.s32.totalorder %v4313_v7, 4  ;;  %vm339_vm10 = vcmp.eq.s32.totalorder %v4314_v27, 4 }
  0x90   :  { %5430 = vmatpush3.bf16.msra.mxu0 %v5427_v60  ;;  %5404 = vmatprep.subr.bf16.mxu1 %v6504_v2  ;;  %v333_v33 = vsel %vm331_vm6, %v6350_v18, %v329_v31  ;;  %v336_v34 = vsel %vm334_vm7, %v6353_v19, %v332_v32  ;;  %vm342_vm11 = vcmp.eq.s32.totalorder %v4313_v7, 5  ;;  %vm343_vm12 = vcmp.eq.s32.totalorder %v4314_v27, 5 }
  0x91   :  { %5432 = vmatprep.subr.bf16.mxu0 %v6488_v62  ;;  %v337_v35 = vsel %vm335_vm8, %v6353_v19, %v333_v33  ;;  %v340_v37 = vsel %vm338_vm9, %v6359_v22, %v336_v34  ;;  %v4161_v39 = vunpack.c.l.bf16 %v4160_v36  ;;  %v4162_v40 = vunpack.c.h.bf16 %v4160_v36 }
  0x92   :  { %v341_v38 = vsel %vm339_vm10, %v6359_v22, %v337_v35  ;;  %v344_v41 = vsel %vm342_vm11, %v6361_v23, %v340_v37  ;;  %v4317_v45 = vunpack.c.2.s8 %v4312_v25  ;;  %v4318_v46 = vunpack.c.3.s8 %v4312_v25 }
  0x93   :  { %4766 = vmatmul.mubr.msk.f32.vlgmr.msra.gmra.mrb[0].mxu0 %vm1093_vm0, %v6486_v61  ;;  %5406 = vmatpush3.bf16.msra.mxu1 %v6504_v2  ;;  %v345_v42 = vsel %vm343_vm12, %v6361_v23, %v341_v38  ;;  %v351_v43 = vadd.f32 %v4161_v39, %v344_v41  ;;  %v4165_v11 = vunpack.c.l.bf16 %v4164_v3  ;;  %v4166_v12 = vunpack.c.h.bf16 %v4164_v3 }
  0x94   :  { %5434 = vmatpush3.bf16.msra.mxu0 %v6488_v62  ;;  %5408 = vmatprep.subr.bf16.mxu1 %v6510_v5  ;;  %v352_v44 = vadd.f32 %v4162_v40, %v345_v42  ;;  %vm377_vm13 = vcmp.eq.s32.totalorder %v4317_v45, 0  ;;  %vm378_vm14 = vcmp.eq.s32.totalorder %v4318_v46, 0  ;;  %vm381_vm15 = vcmp.eq.s32.totalorder %v4317_v45, 1 }
  0x95   :  { %5436 = vmatprep.subr.bf16.mxu0 %v6492_v63  ;;  %v360_v48 = vmul.f32 %v351_v43, %v6408_v47  ;;  %v379_v54 = vsel %vm377_vm13, %v6340_v14, 0.0  ;;  %v380_v55 = vsel %vm378_vm14, %v6340_v14, 0.0  ;;  %vm382_vm1 = vcmp.eq.s32.totalorder %v4318_v46, 1 }
  0x96   :  { %v361_v53 = vmul.f32 %v352_v44, %v6408_v47  ;;  %v383_v56 = vsel %vm381_vm15, %v6343_v15, %v379_v54  ;;  %v384_v58 = vsel %vm382_vm1, %v6343_v15, %v380_v55  ;;  %vm385_vm2 = vcmp.eq.s32.totalorder %v4317_v45, 2  ;;  %v4168_v54 = vld [vmem:[#allocation13 + $0x30] sm:$0xff]  }
  0x97   :  { %5410 = vmatpush3.bf16.msra.mxu1 %v6510_v5  ;;  %vm386_vm3 = vcmp.eq.s32.totalorder %v4318_v46, 2  ;;  %v387_v59 = vsel %vm385_vm2, %v6350_v18, %v383_v56  ;;  %vm389_vm4 = vcmp.eq.s32.totalorder %v4317_v45, 3  ;;  %vm390_vm5 = vcmp.eq.s32.totalorder %v4318_v46, 3 }
  0x98   :  { %5438 = vmatpush3.bf16.msra.mxu0 %v6492_v63  ;;  %5412 = vmatprep.subr.bf16.mxu1 %v6516_v9  ;;  %v388_v60 = vsel %vm386_vm3, %v6350_v18, %v384_v58  ;;  %v391_v0 = vsel %vm389_vm4, %v6353_v19, %v387_v59  ;;  %vm393_vm6 = vcmp.eq.s32.totalorder %v4317_v45, 4  ;;  %vm394_vm7 = vcmp.eq.s32.totalorder %v4318_v46, 4 }
  0x99   :  { %5440 = vmatprep.subr.bf16.mxu0 %v6504_v2  ;;  %v392_v1 = vsel %vm390_vm5, %v6353_v19, %v388_v60  ;;  %v395_v4 = vsel %vm393_vm6, %v6359_v22, %v391_v0  ;;  %vm397_vm8 = vcmp.eq.s32.totalorder %v4317_v45, 5  ;;  %vm398_vm9 = vcmp.eq.s32.totalorder %v4318_v46, 5 }
  0x9a   :  { %v396_v6 = vsel %vm394_vm7, %v6359_v22, %v392_v1  ;;  %v399_v8 = vsel %vm397_vm8, %v6361_v23, %v395_v4  ;;  %v362_v17 = vadd.f32 %v360_v48, %v6473_v49  ;;  %v363_v20 = vadd.f32 %v361_v53, %v6476_v50 }
  0x9b   :  { %5414 = vmatpush3.bf16.msra.mxu1 %v6516_v9  ;;  %v400_v10 = vsel %vm398_vm9, %v6361_v23, %v396_v6  ;;  %v6572_v21 = vadd.f32 %v4165_v11, %v399_v8  ;;  %v6577_v7 = vmul.f32 %v351_v43, %v6369_v26  ;;  %v6580_v27 = vmul.f32 %v352_v44, %v6369_v26 }
  0x9c   :  { %5442 = vmatpush3.bf16.msra.mxu0 %v6504_v2  ;;  %5416 = vmatprep.subr.bf16.mxu1 %v6522_v16  ;;  %v6574_v25 = vadd.f32 %v4166_v12, %v400_v10  ;;  %v4169_v60 = vunpack.c.l.bf16 %v4168_v54  ;;  %v4170_v0 = vunpack.c.h.bf16 %v4168_v54 }
  0x9d   :  { %5444 = vmatprep.subr.bf16.mxu0 %v6510_v5  ;;  %v6584_v28 = vmul.f32 %v6572_v21, %v6369_v26  ;;  %v368_v49 = vadd.f32 %v6577_v7, %v6478_v51  ;;  %v369_v50 = vadd.f32 %v6580_v27, %v6480_v52  ;;  %v4320_v51 = vld [vmem:[#allocation12 + $0x18] sm:$0xff]   ;;  %v415_v8 = vmul.f32 %v6572_v21, %v6408_v47 }
  0x9e   :  { %v6588_v29 = vmul.f32 %v6574_v25, %v6369_v26  ;;  %v4321_v52 = vunpack.c.0.s8 %v4320_v51  ;;  %v4322_v38 = vunpack.c.1.s8 %v4320_v51  ;;  %v6636_v39 = vunpack.c.2.s8 %v4320_v51 }
  0x9f   :  { %5418 = vmatpush3.bf16.msra.mxu1 %v6522_v16  ;;  %v423_v30 = vadd.f32 %v6584_v28, %v362_v17  ;;  %v5463_v32 = vpack.c.bf16 %v369_v50, %v368_v49  ;;  %v6638_v40 = vunpack.c.3.s8 %v4320_v51  ;;  %v416_v10 = vmul.f32 %v6574_v25, %v6408_v47 }
  0xa0   :  { %5446 = vmatpush3.bf16.msra.mxu0 %v6510_v5  ;;  %5420 = vmatprep.subr.bf16.mxu1 %v6528_v13  ;;  %v424_v31 = vadd.f32 %v6588_v29, %v363_v20  ;;  %vm432_vm10 = vcmp.eq.s32.totalorder %v4321_v52, 0  ;;  %vm433_vm11 = vcmp.eq.s32.totalorder %v4322_v38, 0  ;;  %vm436_vm12 = vcmp.eq.s32.totalorder %v4321_v52, 1 }
  0xa1   :  { %5448 = vmatprep.subr.bf16.mxu0 %v6516_v9  ;;  %v434_v41 = vsel %vm432_vm10, %v6340_v14, 0.0  ;;  %v435_v42 = vsel %vm433_vm11, %v6340_v14, 0.0  ;;  %vm437_vm13 = vcmp.eq.s32.totalorder %v4322_v38, 1  ;;  %vm440_vm14 = vcmp.eq.s32.totalorder %v4321_v52, 2 }
  0xa2   :  { %v5499_v33 = vpack.c.bf16 %v424_v31, %v423_v30  ;;  %v438_v43 = vsel %vm436_vm12, %v6343_v15, %v434_v41  ;;  %v439_v44 = vsel %vm437_vm13, %v6343_v15, %v435_v42  ;;  %vm441_vm15 = vcmp.eq.s32.totalorder %v4322_v38, 2 }
  0xa3   :  { %5422 = vmatpush3.bf16.msra.mxu1 %v6528_v13  ;;  %v442_v45 = vsel %vm440_vm14, %v6350_v18, %v438_v43  ;;  %v443_v46 = vsel %vm441_vm15, %v6350_v18, %v439_v44  ;;  %vm444_vm1 = vcmp.eq.s32.totalorder %v4321_v52, 3  ;;  %vm445_vm2 = vcmp.eq.s32.totalorder %v4322_v38, 3 }
  0xa4   :  { %5450 = vmatpush3.bf16.msra.mxu0 %v6516_v9  ;;  %5424 = vmatprep.subr.bf16.mxu1 %v6534_v24  ;;  %v446_v48 = vsel %vm444_vm1, %v6353_v19, %v442_v45  ;;  %v447_v53 = vsel %vm445_vm2, %v6353_v19, %v443_v46  ;;  %vm448_vm3 = vcmp.eq.s32.totalorder %v4321_v52, 4  ;;  %vm449_vm4 = vcmp.eq.s32.totalorder %v4322_v38, 4 }
  0xa5   :  { %5452 = vmatprep.subr.bf16.mxu0 %v6522_v16  ;;  %v450_v55 = vsel %vm448_vm3, %v6359_v22, %v446_v48  ;;  %v451_v56 = vsel %vm449_vm4, %v6359_v22, %v447_v53  ;;  %vm452_vm5 = vcmp.eq.s32.totalorder %v4321_v52, 5  ;;  %vm453_vm6 = vcmp.eq.s32.totalorder %v4322_v38, 5 }
  0xa6   :  { %v454_v58 = vsel %vm452_vm5, %v6361_v23, %v450_v55  ;;  %v455_v59 = vsel %vm453_vm6, %v6361_v23, %v451_v56  ;;  %vm487_vm7 = vcmp.eq.s32.totalorder %v6636_v39, 0  ;;  %vm488_vm8 = vcmp.eq.s32.totalorder %v6638_v40, 0 }
  0xa7   :  { %5426 = vmatpush3.bf16.msra.mxu1 %v6534_v24  ;;  %vm491_vm9 = vcmp.eq.s32.totalorder %v6636_v39, 1  ;;  %vm492_vm10 = vcmp.eq.s32.totalorder %v6638_v40, 1  ;;  %v461_v1 = vadd.f32 %v4169_v60, %v454_v58  ;;  %v462_v3 = vadd.f32 %v4170_v0, %v455_v59 }
  0xa8   :  { %5454 = vmatpush3.bf16.msra.mxu0 %v6522_v16  ;;  %5464 = vmatprep.subr.bf16.mxu1 %v5463_v32  ;;  %v489_v4 = vsel %vm487_vm7, %v6340_v14, 0.0  ;;  %v490_v6 = vsel %vm488_vm8, %v6340_v14, 0.0  ;;  %vm495_vm11 = vcmp.eq.s32.totalorder %v6636_v39, 2  ;;  %vm496_vm12 = vcmp.eq.s32.totalorder %v6638_v40, 2 }
  0xa9   :  { %5456 = vmatprep.subr.bf16.mxu0 %v6528_v13  ;;  %v493_v11 = vsel %vm491_vm9, %v6343_v15, %v489_v4  ;;  %v494_v12 = vsel %vm492_vm10, %v6343_v15, %v490_v6  ;;  %v417_v17 = vadd.f32 %v415_v8, %v6577_v7  ;;  %v418_v20 = vadd.f32 %v416_v10, %v6580_v27  ;;  %v4172_v27 = vld [vmem:[#allocation13 + $0x38] sm:$0xff]  }
  0xaa   :  { %v6669_v49 = vmul.f32 %v461_v1, %v6369_v26  ;;  %v6672_v21 = vmul.f32 %v462_v3, %v6369_v26  ;;  %v470_v25 = vmul.f32 %v461_v1, %v6408_v47  ;;  %v471_v50 = vmul.f32 %v462_v3, %v6408_v47 }
  0xab   :  { %v497_v30 = vsel %vm495_vm11, %v6350_v18, %v493_v11  ;;  %v498_v31 = vsel %vm496_vm12, %v6350_v18, %v494_v12  ;;  %vm499_vm13 = vcmp.eq.s32.totalorder %v6636_v39, 3  ;;  %vm500_vm14 = vcmp.eq.s32.totalorder %v6638_v40, 3 }
  0xac   :  { %5458 = vmatpush3.bf16.msra.mxu0 %v6528_v13  ;;  %v479_v7 = vadd.f32 %v6672_v21, %v418_v20  ;;  %vm503_vm15 = vcmp.eq.s32.totalorder %v6636_v39, 4  ;;  %vm504_vm1 = vcmp.eq.s32.totalorder %v6638_v40, 4  ;;  %vm507_vm2 = vcmp.eq.s32.totalorder %v6636_v39, 5 }
  0xad   :  { %5460 = vmatprep.subr.bf16.mxu0 %v6534_v24  ;;  %vm508_vm3 = vcmp.eq.s32.totalorder %v6638_v40, 5  ;;  %v4173_v52 = vunpack.c.l.bf16 %v4172_v27  ;;  %v4174_v38 = vunpack.c.h.bf16 %v4172_v27  ;;  %v472_v42 = vadd.f32 %v470_v25, %v6584_v28 }
  0xae   :  { %v473_v43 = vadd.f32 %v471_v50, %v6588_v29 }
  0xb0   :  { %5462 = vmatpush3.bf16.msra.mxu0 %v6534_v24 }
  0xb1   :  { %5500 = vmatprep.subr.bf16.mxu0 %v5499_v33 }
 0x15d   :  { %v4725_v34 = vpop.f32.mrb[0].mxu1 }
 0x15e   :  { %v1166_v35 = vpop.f32.mrb[1].mxu1 }
 0x15f   :  { %4758 = vmatprep.mubr.f32.mxu1 %v1166_v35 }
 0x160   :  { %4759 = vmatmul.mubr.f32.vlgmr.msra.gmra.mrb[2].mxu1 %v4725_v34  ;;  %v502_v34 = vsel %vm500_vm14, %v6353_v19, %v498_v31 }
 0x161   :  { %5466 = vmatpush3.bf16.msra.mxu1 %v5463_v32  ;;  %4807 = vmatprep.mubr.msk.f32.mxu1 %vm1093_vm0, %v6484_v57  ;;  %v478_v32 = vadd.f32 %v6669_v49, %v417_v17 }
 0x162   :  { %5468 = vmatprep.subr.bf16.mxu1 %v6488_v62 }
 0x163   :  { %v5535_v35 = vpack.c.bf16 %v479_v7, %v478_v32 }
 0x164   :  { %4808 = vmatmul.mubr.msk.f32.vlgmr.msra.gmra.mrb[4].mxu1 %vm1093_vm0, %v6486_v61 }
 0x165   :  { %5470 = vmatpush3.bf16.msra.mxu1 %v6488_v62 }
 0x166   :  { %v4767_v36 = vpop.f32.mrb[0].mxu0  ;;  %5472 = vmatprep.subr.bf16.mxu1 %v6492_v63 }
 0x167   :  { %v1344_v37 = vpop.f32.mrb[1].mxu0 }
 0x168   :  { %4800 = vmatprep.mubr.f32.mxu0 %v1344_v37  ;;  %v506_v37 = vsel %vm504_vm1, %v6359_v22, %v502_v34 }
 0x169   :  { %4801 = vmatmul.mubr.f32.vlgmr.msra.gmra.mrb[2].mxu0 %v4767_v36  ;;  %5474 = vmatpush3.bf16.msra.mxu1 %v6492_v63  ;;  %v510_v41 = vsel %vm508_vm3, %v6361_v23, %v506_v37 }
 0x16a   :  { %5502 = vmatpush3.bf16.msra.mxu0 %v5499_v33  ;;  %4849 = vmatprep.mubr.msk.f32.mxu0 %vm1093_vm0, %v6484_v57  ;;  %v501_v33 = vsel %vm499_vm13, %v6353_v19, %v497_v30  ;;  %v6696_v45 = vadd.f32 %v4174_v38, %v510_v41 }
 0x16b   :  { %5504 = vmatprep.subr.bf16.mxu0 %v6488_v62  ;;  %5476 = vmatprep.subr.bf16.mxu1 %v6504_v2  ;;  %v505_v36 = vsel %vm503_vm15, %v6359_v22, %v501_v33 }
 0x16c   :  { %v509_v51 = vsel %vm507_vm2, %v6361_v23, %v505_v36  ;;  %v6704_v40 = vmul.f32 %v6696_v45, %v6369_v26 }
 0x16d   :  { %4850 = vmatmul.mubr.msk.f32.vlgmr.msra.gmra.mrb[4].mxu0 %vm1093_vm0, %v6486_v61  ;;  %5478 = vmatpush3.bf16.msra.mxu1 %v6504_v2  ;;  %v6694_v44 = vadd.f32 %v4173_v52, %v509_v51 }
 0x16e   :  { %5506 = vmatpush3.bf16.msra.mxu0 %v6488_v62  ;;  %5480 = vmatprep.subr.bf16.mxu1 %v6510_v5  ;;  %v534_v48 = vadd.f32 %v6704_v40, %v473_v43 }
 0x16f   :  { %5508 = vmatprep.subr.bf16.mxu0 %v6492_v63  ;;  %v6700_v39 = vmul.f32 %v6694_v44, %v6369_v26 }
 0x171   :  { %5482 = vmatpush3.bf16.msra.mxu1 %v6510_v5  ;;  %v533_v46 = vadd.f32 %v6700_v39, %v472_v42 }
 0x172   :  { %5510 = vmatpush3.bf16.msra.mxu0 %v6492_v63  ;;  %5484 = vmatprep.subr.bf16.mxu1 %v6516_v9 }
 0x173   :  { %5512 = vmatprep.subr.bf16.mxu0 %v6504_v2  ;;  %v5571_v53 = vpack.c.bf16 %v534_v48, %v533_v46 }
 0x175   :  { %5486 = vmatpush3.bf16.msra.mxu1 %v6516_v9 }
 0x176   :  { %5514 = vmatpush3.bf16.msra.mxu0 %v6504_v2  ;;  %5488 = vmatprep.subr.bf16.mxu1 %v6522_v16 }
 0x177   :  { %5516 = vmatprep.subr.bf16.mxu0 %v6510_v5 }
 0x179   :  { %5490 = vmatpush3.bf16.msra.mxu1 %v6522_v16 }
 0x17a   :  { %5518 = vmatpush3.bf16.msra.mxu0 %v6510_v5  ;;  %5492 = vmatprep.subr.bf16.mxu1 %v6528_v13 }
 0x17b   :  { %5520 = vmatprep.subr.bf16.mxu0 %v6516_v9 }
 0x17d   :  { %5494 = vmatpush3.bf16.msra.mxu1 %v6528_v13 }
 0x17e   :  { %5522 = vmatpush3.bf16.msra.mxu0 %v6516_v9  ;;  %5496 = vmatprep.subr.bf16.mxu1 %v6534_v24 }
 0x17f   :  { %5524 = vmatprep.subr.bf16.mxu0 %v6522_v16 }
 0x181   :  { %5498 = vmatpush3.bf16.msra.mxu1 %v6534_v24 }
 0x182   :  { %5526 = vmatpush3.bf16.msra.mxu0 %v6522_v16  ;;  %5536 = vmatprep.subr.bf16.mxu1 %v5535_v35 }
 0x183   :  { %5528 = vmatprep.subr.bf16.mxu0 %v6528_v13 }
 0x186   :  { %5530 = vmatpush3.bf16.msra.mxu0 %v6528_v13 }
 0x187   :  { %5532 = vmatprep.subr.bf16.mxu0 %v6534_v24 }
 0x18a   :  { %5534 = vmatpush3.bf16.msra.mxu0 %v6534_v24 }
 0x18b   :  { %5572 = vmatprep.subr.bf16.mxu0 %v5571_v53 }
 0x233   :  { %v4760_v28 = vpop.f32.mrb[2].mxu1 }
 0x234   :  { %v1241_v29 = vpop.f32.mrb[3].mxu1 }
 0x235   :  { %v1250_v55 = vpack.c.bf16 %v4760_v28, %v1241_v29 }
 0x237   :  { %4219 = vst [vmem:[#allocation15] sm:$0xff] %v1250_v55   ;;  %v1260_v58 = vunpack.c.l.bf16 %v1250_v55  ;;  %v1261_v59 = vunpack.c.h.bf16 %v1250_v55  ;;  %v4809_v0 = vpop.f32.mrb[4].mxu1 }
 0x238   :  { %v1525_v1 = vpop.f32.mrb[5].mxu1 }
 0x239   :  { %v1262_v3 = vmin.f32 %v1260_v58, %v1261_v59  ;;  %v1269_v4 = vmax.f32 %v1260_v58, %v1261_v59  ;;  %4842 = vmatprep.mubr.f32.mxu1 %v1525_v1 }
 0x23a   :  { %4843 = vmatmul.mubr.f32.vlgmr.msra.gmra.mrb[6].mxu1 %v4809_v0 }
 0x23b   :  { %v1263_v12 = vrot.slane %v1262_v3, 4  ;;  %v1270_v17 = vrot.slane %v1269_v4, 4  ;;  %5538 = vmatpush3.bf16.msra.mxu1 %v5535_v35  ;;  %4891 = vmatprep.mubr.msk.f32.mxu1 %vm1093_vm0, %v6484_v57 }
 0x23c   :  { %v4802_v54 = vpop.f32.mrb[2].mxu0  ;;  %5540 = vmatprep.subr.bf16.mxu1 %v6488_v62 }
 0x23d   :  { %v1419_v56 = vpop.f32.mrb[3].mxu0  ;;  %v1264_v50 = vmin.f32 %v1262_v3, %v1263_v12  ;;  %v1271_v30 = vmax.f32 %v1269_v4, %v1270_v17  ;;  %v4176_v17 = vld [vmem:[#allocation13 + $0x40] sm:$0xff]  }
 0x23e   :  { %v1428_v60 = vpack.c.bf16 %v4802_v54, %v1419_v56  ;;  %4892 = vmatmul.mubr.msk.f32.vlgmr.msra.gmra.mrb[8].mxu1 %vm1093_vm0, %v6486_v61  ;;  %v4328_v56 = vld [vmem:[#allocation12 + $0x20] sm:$0xff]  }
 0x23f   :  { %v1265_v7 = vrot.slane %v1264_v50, 2  ;;  %v1272_v27 = vrot.slane %v1271_v30, 2  ;;  %5542 = vmatpush3.bf16.msra.mxu1 %v6488_v62  ;;  %v4329_v58 = vunpack.c.0.s8 %v4328_v56  ;;  %v4330_v59 = vunpack.c.1.s8 %v4328_v56 }
 0x240   :  { %4224 = vst [vmem:[#allocation15 + $0x8] sm:$0xff] %v1428_v60   ;;  %v1439_v6 = vunpack.c.l.bf16 %v1428_v60  ;;  %v1440_v8 = vunpack.c.h.bf16 %v1428_v60  ;;  %v4851_v10 = vpop.f32.mrb[4].mxu0  ;;  %5544 = vmatprep.subr.bf16.mxu1 %v6492_v63  ;;  %v6760_v60 = vunpack.c.2.s8 %v4328_v56  ;;  %v6762_v0 = vunpack.c.3.s8 %v4328_v56 }
 0x241   :  { %v1706_v11 = vpop.f32.mrb[5].mxu0  ;;  %v1266_v35 = vmin.f32 %v1264_v50, %v1265_v7  ;;  %v1273_v36 = vmax.f32 %v1271_v30, %v1272_v27  ;;  %vm542_vm4 = vcmp.eq.s32.totalorder %v4329_v58, 0  ;;  %vm543_vm5 = vcmp.eq.s32.totalorder %v4330_v59, 0 }
 0x242   :  { %v1441_v20 = vmin.f32 %v1439_v6, %v1440_v8  ;;  %v1448_v25 = vmax.f32 %v1439_v6, %v1440_v8  ;;  %4884 = vmatprep.mubr.f32.mxu0 %v1706_v11  ;;  %v544_v1 = vsel %vm542_vm4, %v6340_v14, 0.0  ;;  %v545_v3 = vsel %vm543_vm5, %v6340_v14, 0.0 }
 0x243   :  { %4885 = vmatmul.mubr.f32.vlgmr.msra.gmra.mrb[6].mxu0 %v4851_v10  ;;  %v1267_v52 = vrot.slane %v1266_v35, 1  ;;  %v1274_v38 = vrot.slane %v1273_v36, 1  ;;  %5546 = vmatpush3.bf16.msra.mxu1 %v6492_v63  ;;  %vm546_vm6 = vcmp.eq.s32.totalorder %v4329_v58, 1  ;;  %vm547_vm7 = vcmp.eq.s32.totalorder %v4330_v59, 1 }
 0x244   :  { %v1442_v31 = vrot.slane %v1441_v20, 4  ;;  %v1449_v32 = vrot.slane %v1448_v25, 4  ;;  %5574 = vmatpush3.bf16.msra.mxu0 %v5571_v53  ;;  %4933 = vmatprep.mubr.msk.f32.mxu0 %vm1093_vm0, %v6484_v57  ;;  %v548_v4 = vsel %vm546_vm6, %v6343_v15, %v544_v1  ;;  %v549_v6 = vsel %vm547_vm7, %v6343_v15, %v545_v3 }
 0x245   :  { %5576 = vmatprep.subr.bf16.mxu0 %v6488_v62  ;;  %5548 = vmatprep.subr.bf16.mxu1 %v6504_v2  ;;  %v6724_v43 = vmin.f32 %v1266_v35, %v1267_v52  ;;  %v6726_v46 = vmax.f32 %v1273_v36, %v1274_v38  ;;  %vm550_vm8 = vcmp.eq.s32.totalorder %v4329_v58, 2  ;;  %vm551_vm9 = vcmp.eq.s32.totalorder %v4330_v59, 2 }
 0x246   :  { %v1443_v33 = vmin.f32 %v1441_v20, %v1442_v31  ;;  %v1450_v34 = vmax.f32 %v1448_v25, %v1449_v32  ;;  %v552_v8 = vsel %vm550_vm8, %v6350_v18, %v548_v4  ;;  %v553_v10 = vsel %vm551_vm9, %v6350_v18, %v549_v6 }
 0x247   :  { %4934 = vmatmul.mubr.msk.f32.vlgmr.msra.gmra.mrb[8].mxu0 %vm1093_vm0, %v6486_v61  ;;  %5550 = vmatpush3.bf16.msra.mxu1 %v6504_v2  ;;  %vm554_vm10 = vcmp.eq.s32.totalorder %v4329_v58, 3  ;;  %vm555_vm11 = vcmp.eq.s32.totalorder %v4330_v59, 3  ;;  %vm558_vm12 = vcmp.eq.s32.totalorder %v4329_v58, 4  ;;  %vm559_vm13 = vcmp.eq.s32.totalorder %v4330_v59, 4 }
 0x248   :  { %v1444_v37 = vrot.slane %v1443_v33, 2  ;;  %v1451_v51 = vrot.slane %v1450_v34, 2  ;;  %5578 = vmatpush3.bf16.msra.mxu0 %v6488_v62  ;;  %5552 = vmatprep.subr.bf16.mxu1 %v6510_v5  ;;  %v556_v11 = vsel %vm554_vm10, %v6353_v19, %v552_v8  ;;  %v557_v12 = vsel %vm555_vm11, %v6353_v19, %v553_v10 }
 0x249   :  { %5580 = vmatprep.subr.bf16.mxu0 %v6492_v63  ;;  %v560_v20 = vsel %vm558_vm12, %v6359_v22, %v556_v11  ;;  %v561_v25 = vsel %vm559_vm13, %v6359_v22, %v557_v12  ;;  %vm562_vm14 = vcmp.eq.s32.totalorder %v4329_v58, 5  ;;  %vm563_vm15 = vcmp.eq.s32.totalorder %v4330_v59, 5 }
 0x24a   :  { %v1445_v41 = vmin.f32 %v1443_v33, %v1444_v37  ;;  %v1452_v42 = vmax.f32 %v1450_v34, %v1451_v51  ;;  %v564_v50 = vsel %vm562_vm14, %v6361_v23, %v560_v20  ;;  %v565_v30 = vsel %vm563_vm15, %v6361_v23, %v561_v25 }
 0x24b   :  { %5554 = vmatpush3.bf16.msra.mxu1 %v6510_v5  ;;  %v4177_v31 = vunpack.c.l.bf16 %v4176_v17  ;;  %v4178_v32 = vunpack.c.h.bf16 %v4176_v17  ;;  %vm597_vm1 = vcmp.eq.s32.totalorder %v6760_v60, 0  ;;  %vm598_vm2 = vcmp.eq.s32.totalorder %v6762_v0, 0 }
 0x24c   :  { %v1446_v48 = vrot.slane %v1445_v41, 1  ;;  %v1453_v53 = vrot.slane %v1452_v42, 1  ;;  %5582 = vmatpush3.bf16.msra.mxu0 %v6492_v63  ;;  %5556 = vmatprep.subr.bf16.mxu1 %v6516_v9  ;;  %vm601_vm3 = vcmp.eq.s32.totalorder %v6760_v60, 1  ;;  %vm602_vm4 = vcmp.eq.s32.totalorder %v6762_v0, 1 }
 0x24d   :  { %5584 = vmatprep.subr.bf16.mxu0 %v6504_v2  ;;  %v571_v7 = vadd.f32 %v4177_v31, %v564_v50  ;;  %v572_v27 = vadd.f32 %v4178_v32, %v565_v30  ;;  %v599_v33 = vsel %vm597_vm1, %v6340_v14, 0.0  ;;  %v600_v34 = vsel %vm598_vm2, %v6340_v14, 0.0 }
 0x24e   :  { %v6730_v28 = vmin.f32 %v1445_v41, %v1446_v48  ;;  %v6732_v29 = vmax.f32 %v1452_v42, %v1453_v53  ;;  %v525_v35 = vmul.f32 %v6694_v44, %v6408_v47  ;;  %v526_v36 = vmul.f32 %v6696_v45, %v6408_v47 }
 0x24f   :  { %5558 = vmatpush3.bf16.msra.mxu1 %v6516_v9  ;;  %v603_v37 = vsel %vm601_vm3, %v6343_v15, %v599_v33  ;;  %v604_v51 = vsel %vm602_vm4, %v6343_v15, %v600_v34  ;;  %vm605_vm5 = vcmp.eq.s32.totalorder %v6760_v60, 2  ;;  %vm606_vm6 = vcmp.eq.s32.totalorder %v6762_v0, 2 }
 0x250   :  { %v1455_v54 = vmin.f32 %v6724_v43, %v6730_v28  ;;  %v1456_v55 = vmax.f32 %v6726_v46, %v6732_v29  ;;  %5586 = vmatpush3.bf16.msra.mxu0 %v6504_v2  ;;  %5560 = vmatprep.subr.bf16.mxu1 %v6522_v16  ;;  %v527_v52 = vadd.f32 %v525_v35, %v6669_v49  ;;  %vm609_vm7 = vcmp.eq.s32.totalorder %v6760_v60, 3  ;;  %v4336_v46 = vld [vmem:[#allocation12 + $0x28] sm:$0xff]  }
 0x251   :  { %5588 = vmatprep.subr.bf16.mxu0 %v6510_v5  ;;  %v528_v38 = vadd.f32 %v526_v36, %v6672_v21  ;;  %v6793_v41 = vmul.f32 %v571_v7, %v6369_v26  ;;  %v6796_v44 = vmul.f32 %v572_v27, %v6369_v26  ;;  %v580_v45 = vmul.f32 %v571_v7, %v6408_v47  ;;  %v4180_v21 = vld [vmem:[#allocation13 + $0x48] sm:$0xff]  }
 0x252   :  { %v581_v42 = vmul.f32 %v572_v27, %v6408_v47  ;;  %v607_v48 = vsel %vm605_vm5, %v6350_v18, %v603_v37  ;;  %v608_v53 = vsel %vm606_vm6, %v6350_v18, %v604_v51  ;;  %vm610_vm8 = vcmp.eq.s32.totalorder %v6762_v0, 3 }
 0x253   :  { %5562 = vmatpush3.bf16.msra.mxu1 %v6522_v16  ;;  %v588_v56 = vadd.f32 %v6793_v41, %v527_v52  ;;  %v589_v49 = vadd.f32 %v6796_v44, %v528_v38  ;;  %v611_v58 = vsel %vm609_vm7, %v6353_v19, %v607_v48  ;;  %v612_v59 = vsel %vm610_vm8, %v6353_v19, %v608_v53 }
 0x254   :  { %5590 = vmatpush3.bf16.msra.mxu0 %v6510_v5  ;;  %5564 = vmatprep.subr.bf16.mxu1 %v6528_v13  ;;  %vm613_vm9 = vcmp.eq.s32.totalorder %v6760_v60, 4  ;;  %vm614_vm10 = vcmp.eq.s32.totalorder %v6762_v0, 4  ;;  %vm617_vm11 = vcmp.eq.s32.totalorder %v6760_v60, 5  ;;  %vm618_vm12 = vcmp.eq.s32.totalorder %v6762_v0, 5 }
 0x255   :  { %5592 = vmatprep.subr.bf16.mxu0 %v6516_v9  ;;  %v5607_v1 = vpack.c.bf16 %v589_v49, %v588_v56  ;;  %v615_v3 = vsel %vm613_vm9, %v6359_v22, %v611_v58  ;;  %v616_v4 = vsel %vm614_vm10, %v6359_v22, %v612_v59  ;;  %v4181_v8 = vunpack.c.l.bf16 %v4180_v21 }
 0x256   :  { %v619_v6 = vsel %vm617_vm11, %v6361_v23, %v615_v3  ;;  %v4182_v10 = vunpack.c.h.bf16 %v4180_v21  ;;  %v620_v11 = vsel %vm618_vm12, %v6361_v23, %v616_v4  ;;  %v582_v12 = vadd.f32 %v580_v45, %v6700_v39 }
 0x257   :  { %5566 = vmatpush3.bf16.msra.mxu1 %v6528_v13  ;;  %v583_v17 = vadd.f32 %v581_v42, %v6704_v40  ;;  %v6818_v20 = vadd.f32 %v4181_v8, %v619_v6  ;;  %v4337_v28 = vunpack.c.0.s8 %v4336_v46  ;;  %v4338_v29 = vunpack.c.1.s8 %v4336_v46 }
 0x258   :  { %5594 = vmatpush3.bf16.msra.mxu0 %v6516_v9  ;;  %5568 = vmatprep.subr.bf16.mxu1 %v6534_v24  ;;  %v6820_v25 = vadd.f32 %v4182_v10, %v620_v11 }
 0x259   :  { %5596 = vmatprep.subr.bf16.mxu0 %v6522_v16  ;;  %v6824_v60 = vmul.f32 %v6818_v20, %v6369_v26  ;;  %vm652_vm13 = vcmp.eq.s32.totalorder %v4337_v28, 0  ;;  %vm653_vm14 = vcmp.eq.s32.totalorder %v4338_v29, 0  ;;  %vm656_vm15 = vcmp.eq.s32.totalorder %v4337_v28, 1 }
 0x25a   :  { %v6828_v0 = vmul.f32 %v6820_v25, %v6369_v26  ;;  %vm657_vm1 = vcmp.eq.s32.totalorder %v4338_v29, 1  ;;  %vm660_vm2 = vcmp.eq.s32.totalorder %v4337_v28, 2  ;;  %vm661_vm3 = vcmp.eq.s32.totalorder %v4338_v29, 2 }
 0x25b   :  { %5570 = vmatpush3.bf16.msra.mxu1 %v6534_v24  ;;  %v643_v50 = vadd.f32 %v6824_v60, %v582_v12  ;;  %vm664_vm4 = vcmp.eq.s32.totalorder %v4337_v28, 3  ;;  %vm665_vm5 = vcmp.eq.s32.totalorder %v4338_v29, 3  ;;  %vm668_vm6 = vcmp.eq.s32.totalorder %v4337_v28, 4 }
 0x25c   :  { %5598 = vmatpush3.bf16.msra.mxu0 %v6522_v16  ;;  %5608 = vmatprep.subr.bf16.mxu1 %v5607_v1  ;;  %v644_v30 = vadd.f32 %v6828_v0, %v583_v17  ;;  %vm669_vm7 = vcmp.eq.s32.totalorder %v4338_v29, 4  ;;  %vm672_vm8 = vcmp.eq.s32.totalorder %v4337_v28, 5  ;;  %vm673_vm9 = vcmp.eq.s32.totalorder %v4338_v29, 5 }
 0x25d   :  { %5600 = vmatprep.subr.bf16.mxu0 %v6528_v13 }
 0x25e   :  { %v5643_v31 = vpack.c.bf16 %v644_v30, %v643_v50 }
 0x260   :  { %5602 = vmatpush3.bf16.msra.mxu0 %v6528_v13 }
 0x261   :  { %5604 = vmatprep.subr.bf16.mxu0 %v6534_v24 }
 0x264   :  { %5606 = vmatpush3.bf16.msra.mxu0 %v6534_v24 }
 0x265   :  { %5644 = vmatprep.subr.bf16.mxu0 %v5643_v31 }
 0x30d   :  { %v4844_v39 = vpop.f32.mrb[6].mxu1 }
 0x30e   :  { %v1600_v40 = vpop.f32.mrb[7].mxu1 }
 0x30f   :  { %v1609_v7 = vpack.c.bf16 %v4844_v39, %v1600_v40 }
 0x311   :  { %4229 = vst [vmem:[#allocation15 + $0x10] sm:$0xff] %v1609_v7   ;;  %v1620_v33 = vunpack.c.l.bf16 %v1609_v7  ;;  %v1621_v34 = vunpack.c.h.bf16 %v1609_v7  ;;  %v4893_v36 = vpop.f32.mrb[8].mxu1 }
 0x312   :  { %v1887_v37 = vpop.f32.mrb[9].mxu1 }
 0x313   :  { %v1622_v51 = vmin.f32 %v1620_v33, %v1621_v34  ;;  %v1629_v52 = vmax.f32 %v1620_v33, %v1621_v34  ;;  %4926 = vmatprep.mubr.f32.mxu1 %v1887_v37  ;;  %v654_v37 = vsel %vm652_vm13, %v6340_v14, 0.0 }
 0x314   :  { %4927 = vmatmul.mubr.f32.vlgmr.msra.gmra.mrb[10].mxu1 %v4893_v36 }
 0x315   :  { %v1623_v53 = vrot.slane %v1622_v51, 4  ;;  %v1630_v56 = vrot.slane %v1629_v52, 4  ;;  %5610 = vmatpush3.bf16.msra.mxu1 %v5607_v1  ;;  %4975 = vmatprep.mubr.msk.f32.mxu1 %vm1093_vm0, %v6484_v57 }
 0x316   :  { %v4886_v32 = vpop.f32.mrb[6].mxu0  ;;  %5612 = vmatprep.subr.bf16.mxu1 %v6488_v62 }
 0x317   :  { %v1781_v27 = vpop.f32.mrb[7].mxu0  ;;  %v1624_v58 = vmin.f32 %v1622_v51, %v1623_v53  ;;  %v1631_v59 = vmax.f32 %v1629_v52, %v1630_v56  ;;  %v655_v51 = vsel %vm653_vm14, %v6340_v14, 0.0  ;;  %v658_v52 = vsel %vm656_vm15, %v6343_v15, %v654_v37  ;;  %v4184_v56 = vld [vmem:[#allocation13 + $0x50] sm:$0xff]  }
 0x318   :  { %v1790_v35 = vpack.c.bf16 %v4886_v32, %v1781_v27  ;;  %4976 = vmatmul.mubr.msk.f32.vlgmr.msra.gmra.mrb[12].mxu1 %vm1093_vm0, %v6486_v61 }
 0x319   :  { %v1625_v6 = vrot.slane %v1624_v58, 2  ;;  %v1632_v8 = vrot.slane %v1631_v59, 2  ;;  %5614 = vmatpush3.bf16.msra.mxu1 %v6488_v62 }
 0x31a   :  { %4234 = vst [vmem:[#allocation15 + $0x18] sm:$0xff] %v1790_v35   ;;  %v1801_v38 = vunpack.c.l.bf16 %v1790_v35  ;;  %v1802_v45 = vunpack.c.h.bf16 %v1790_v35  ;;  %v4935_v42 = vpop.f32.mrb[8].mxu0  ;;  %5616 = vmatprep.subr.bf16.mxu1 %v6492_v63 }
 0x31b   :  { %v2068_v48 = vpop.f32.mrb[9].mxu0  ;;  %v1626_v11 = vmin.f32 %v1624_v58, %v1625_v6 }
 0x31c   :  { %v1803_v49 = vmin.f32 %v1801_v38, %v1802_v45  ;;  %v1810_v21 = vmax.f32 %v1801_v38, %v1802_v45  ;;  %4968 = vmatprep.mubr.f32.mxu0 %v2068_v48  ;;  %v659_v38 = vsel %vm657_vm1, %v6343_v15, %v655_v51  ;;  %v662_v45 = vsel %vm660_vm2, %v6350_v18, %v658_v52 }
 0x31d   :  { %4969 = vmatmul.mubr.f32.vlgmr.msra.gmra.mrb[10].mxu0 %v4935_v42  ;;  %v1627_v50 = vrot.slane %v1626_v11, 1  ;;  %5618 = vmatpush3.bf16.msra.mxu1 %v6492_v63  ;;  %v663_v42 = vsel %vm661_vm3, %v6350_v18, %v659_v38  ;;  %v666_v48 = vsel %vm664_vm4, %v6353_v19, %v662_v45 }
 0x31e   :  { %v1804_v3 = vrot.slane %v1803_v49, 4  ;;  %v1811_v4 = vrot.slane %v1810_v21, 4  ;;  %5646 = vmatpush3.bf16.msra.mxu0 %v5643_v31  ;;  %5017 = vmatprep.mubr.msk.f32.mxu0 %vm1093_vm0, %v6484_v57  ;;  %v1633_v57 = vmax.f32 %v1631_v59, %v1632_v8  ;;  %v667_v53 = vsel %vm665_vm5, %v6353_v19, %v663_v42 }
 0x31f   :  { %5648 = vmatprep.subr.bf16.mxu0 %v6488_v62  ;;  %5620 = vmatprep.subr.bf16.mxu1 %v6504_v2  ;;  %v1628_v40 = vmin.f32 %v1626_v11, %v1627_v50  ;;  %v635_v11 = vmul.f32 %v6818_v20, %v6408_v47 }
 0x320   :  { %v1805_v1 = vmin.f32 %v1803_v49, %v1804_v3  ;;  %v1812_v10 = vmax.f32 %v1810_v21, %v1811_v4  ;;  %v1634_v30 = vrot.slane %v1633_v57, 1  ;;  %v670_v49 = vsel %vm668_vm6, %v6359_v22, %v666_v48 }
 0x321   :  { %5018 = vmatmul.mubr.msk.f32.vlgmr.msra.gmra.mrb[12].mxu0 %vm1093_vm0, %v6486_v61  ;;  %v6853_v27 = vmin.f32 %v1455_v54, %v1628_v40  ;;  %5622 = vmatpush3.bf16.msra.mxu1 %v6504_v2  ;;  %v6890_v54 = vunpack.c.2.s8 %v4336_v46  ;;  %v671_v21 = vsel %vm669_vm7, %v6359_v22, %v667_v53  ;;  %v674_v58 = vsel %vm672_vm8, %v6361_v23, %v670_v49 }
 0x322   :  { %v1806_v12 = vrot.slane %v1805_v1, 2  ;;  %v1813_v17 = vrot.slane %v1812_v10, 2  ;;  %5650 = vmatpush3.bf16.msra.mxu0 %v6488_v62  ;;  %v1635_v61 = vmax.f32 %v1633_v57, %v1634_v30  ;;  %5624 = vmatprep.subr.bf16.mxu1 %v6510_v5  ;;  %v675_v59 = vsel %vm673_vm9, %v6361_v23, %v671_v21 }
 0x323   :  { %5652 = vmatprep.subr.bf16.mxu0 %v6492_v63  ;;  %v4185_v3 = vunpack.c.l.bf16 %v4184_v56  ;;  %v4186_v4 = vunpack.c.h.bf16 %v4184_v56  ;;  %vm707_vm10 = vcmp.eq.s32.totalorder %v6890_v54, 0  ;;  %vm711_vm12 = vcmp.eq.s32.totalorder %v6890_v54, 1 }
 0x324   :  { %v1807_v31 = vmin.f32 %v1805_v1, %v1806_v12  ;;  %v1814_v39 = vmax.f32 %v1812_v10, %v1813_v17  ;;  %v6858_v33 = vmax.f32 %v1456_v55, %v1635_v61  ;;  %v6892_v55 = vunpack.c.3.s8 %v4336_v46 }
 0x325   :  { %5626 = vmatpush3.bf16.msra.mxu1 %v6510_v5  ;;  %v681_v6 = vadd.f32 %v4185_v3, %v674_v58  ;;  %v682_v8 = vadd.f32 %v4186_v4, %v675_v59  ;;  %v709_v1 = vsel %vm707_vm10, %v6340_v14, 0.0  ;;  %v636_v57 = vmul.f32 %v6820_v25, %v6408_v47 }
 0x326   :  { %v1808_v32 = vrot.slane %v1807_v31, 1  ;;  %v1815_v7 = vrot.slane %v1814_v39, 1  ;;  %5654 = vmatpush3.bf16.msra.mxu0 %v6492_v63  ;;  %5628 = vmatprep.subr.bf16.mxu1 %v6516_v9  ;;  %vm708_vm11 = vcmp.eq.s32.totalorder %v6892_v55, 0  ;;  %vm712_vm13 = vcmp.eq.s32.totalorder %v6892_v55, 1 }
 0x327   :  { %5656 = vmatprep.subr.bf16.mxu0 %v6504_v2  ;;  %v710_v10 = vsel %vm708_vm11, %v6340_v14, 0.0  ;;  %v713_v12 = vsel %vm711_vm12, %v6343_v15, %v709_v1  ;;  %vm715_vm14 = vcmp.eq.s32.totalorder %v6890_v54, 2  ;;  %vm716_vm15 = vcmp.eq.s32.totalorder %v6892_v55, 2 }
 0x328   :  { %v6860_v34 = vmin.f32 %v1807_v31, %v1808_v32  ;;  %v6862_v35 = vmax.f32 %v1814_v39, %v1815_v7  ;;  %v714_v17 = vsel %vm712_vm13, %v6343_v15, %v710_v10  ;;  %v637_v50 = vadd.f32 %v635_v11, %v6793_v41 }
 0x329   :  { %5630 = vmatpush3.bf16.msra.mxu1 %v6516_v9  ;;  %v638_v30 = vadd.f32 %v636_v57, %v6796_v44  ;;  %v6923_v31 = vmul.f32 %v681_v6, %v6369_v26  ;;  %v6926_v20 = vmul.f32 %v682_v8, %v6369_v26  ;;  %v690_v25 = vmul.f32 %v681_v6, %v6408_v47  ;;  %v4188_v44 = vld [vmem:[#allocation13 + $0x58] sm:$0xff]  }
 0x32a   :  { %v1817_v36 = vmin.f32 %v6853_v27, %v6860_v34  ;;  %v1818_v43 = vmax.f32 %v6858_v33, %v6862_v35  ;;  %5658 = vmatpush3.bf16.msra.mxu0 %v6504_v2  ;;  %5632 = vmatprep.subr.bf16.mxu1 %v6522_v16  ;;  %v691_v39 = vmul.f32 %v682_v8, %v6408_v47  ;;  %vm719_vm1 = vcmp.eq.s32.totalorder %v6890_v54, 3  ;;  %v4344_v33 = vld [vmem:[#allocation12 + $0x30] sm:$0xff]  }
 0x32b   :  { %5660 = vmatprep.subr.bf16.mxu0 %v6510_v5  ;;  %v717_v40 = vsel %vm715_vm14, %v6350_v18, %v713_v12  ;;  %v718_v61 = vsel %vm716_vm15, %v6350_v18, %v714_v17  ;;  %v698_v32 = vadd.f32 %v6923_v31, %v637_v50  ;;  %v699_v41 = vadd.f32 %v6926_v20, %v638_v30 }
 0x32c   :  { %vm720_vm2 = vcmp.eq.s32.totalorder %v6892_v55, 3  ;;  %v721_v7 = vsel %vm719_vm1, %v6353_v19, %v717_v40  ;;  %vm723_vm3 = vcmp.eq.s32.totalorder %v6890_v54, 4  ;;  %vm724_vm4 = vcmp.eq.s32.totalorder %v6892_v55, 4 }
 0x32d   :  { %5634 = vmatpush3.bf16.msra.mxu1 %v6522_v16  ;;  %v722_v46 = vsel %vm720_vm2, %v6353_v19, %v718_v61  ;;  %v5679_v28 = vpack.c.bf16 %v699_v41, %v698_v32  ;;  %v725_v29 = vsel %vm723_vm3, %v6359_v22, %v721_v7  ;;  %vm727_vm5 = vcmp.eq.s32.totalorder %v6890_v54, 5  ;;  %v6962_v41 = vld [vmem:[#allocation9] sm:$0xff] }
 0x32e   :  { %5662 = vmatpush3.bf16.msra.mxu0 %v6510_v5  ;;  %5636 = vmatprep.subr.bf16.mxu1 %v6528_v13  ;;  %v726_v37 = vsel %vm724_vm4, %v6359_v22, %v722_v46  ;;  %vm728_vm6 = vcmp.eq.s32.totalorder %v6892_v55, 5  ;;  %v729_v51 = vsel %vm727_vm5, %v6361_v23, %v725_v29  ;;  %v4189_v52 = vunpack.c.l.bf16 %v4188_v44 }
 0x32f   :  { %5664 = vmatprep.subr.bf16.mxu0 %v6516_v9  ;;  %v4190_v38 = vunpack.c.h.bf16 %v4188_v44  ;;  %v730_v45 = vsel %vm728_vm6, %v6361_v23, %v726_v37  ;;  %v692_v42 = vadd.f32 %v690_v25, %v6824_v60  ;;  %v693_v48 = vadd.f32 %v691_v39, %v6828_v0  ;;  %v6968_v37 = vld [vmem:[#allocation9 + $0x8] sm:$0xff] }
 0x330   :  { %v6948_v53 = vadd.f32 %v4189_v52, %v729_v51  ;;  %v4345_v34 = vunpack.c.0.s8 %v4344_v33  ;;  %v4346_v35 = vunpack.c.1.s8 %v4344_v33 }
 0x331   :  { %5638 = vmatpush3.bf16.msra.mxu1 %v6528_v13  ;;  %v6950_v56 = vadd.f32 %v4190_v38, %v730_v45 }
 0x332   :  { %5666 = vmatpush3.bf16.msra.mxu0 %v6516_v9  ;;  %5640 = vmatprep.subr.bf16.mxu1 %v6534_v24  ;;  %v6954_v54 = vmul.f32 %v6948_v53, %v6369_v26  ;;  %vm762_vm7 = vcmp.eq.s32.totalorder %v4345_v34, 0  ;;  %vm763_vm8 = vcmp.eq.s32.totalorder %v4346_v35, 0  ;;  %vm766_vm9 = vcmp.eq.s32.totalorder %v4345_v34, 1 }
 0x333   :  { %5668 = vmatprep.subr.bf16.mxu0 %v6522_v16  ;;  %v6958_v55 = vmul.f32 %v6950_v56, %v6369_v26  ;;  %vm767_vm10 = vcmp.eq.s32.totalorder %v4346_v35, 1  ;;  %vm770_vm11 = vcmp.eq.s32.totalorder %v4345_v34, 2  ;;  %vm771_vm12 = vcmp.eq.s32.totalorder %v4346_v35, 2 }
 0x334   :  { %v753_v49 = vadd.f32 %v6954_v54, %v692_v42  ;;  %vm774_vm13 = vcmp.eq.s32.totalorder %v4345_v34, 3  ;;  %vm775_vm14 = vcmp.eq.s32.totalorder %v4346_v35, 3  ;;  %vm778_vm15 = vcmp.eq.s32.totalorder %v4345_v34, 4 }
 0x335   :  { %5642 = vmatpush3.bf16.msra.mxu1 %v6534_v24  ;;  %v754_v21 = vadd.f32 %v6958_v55, %v693_v48  ;;  %vm779_vm1 = vcmp.eq.s32.totalorder %v4346_v35, 4  ;;  %vm782_vm2 = vcmp.eq.s32.totalorder %v4345_v34, 5  ;;  %vm783_vm3 = vcmp.eq.s32.totalorder %v4346_v35, 5 }
 0x336   :  { %5670 = vmatpush3.bf16.msra.mxu0 %v6522_v16  ;;  %5680 = vmatprep.subr.bf16.mxu1 %v5679_v28 }
 0x337   :  { %5672 = vmatprep.subr.bf16.mxu0 %v6528_v13  ;;  %v5715_v58 = vpack.c.bf16 %v754_v21, %v753_v49 }
 0x33a   :  { %5674 = vmatpush3.bf16.msra.mxu0 %v6528_v13 }
 0x33b   :  { %5676 = vmatprep.subr.bf16.mxu0 %v6534_v24 }
 0x33e   :  { %5678 = vmatpush3.bf16.msra.mxu0 %v6534_v24 }
 0x33f   :  { %5716 = vmatprep.subr.bf16.mxu0 %v5715_v58 }
 0x3e7   :  { %v4928_v60 = vpop.f32.mrb[10].mxu1 }
 0x3e8   :  { %v1962_v0 = vpop.f32.mrb[11].mxu1 }
 0x3e9   :  { %v1971_v3 = vpack.c.bf16 %v4928_v60, %v1962_v0 }
 0x3eb   :  { %4239 = vst [vmem:[#allocation15 + $0x20] sm:$0xff] %v1971_v3   ;;  %v1982_v6 = vunpack.c.l.bf16 %v1971_v3  ;;  %v1983_v8 = vunpack.c.h.bf16 %v1971_v3  ;;  %v4977_v10 = vpop.f32.mrb[12].mxu1 }
 0x3ec   :  { %v2249_v11 = vpop.f32.mrb[13].mxu1 }
 0x3ed   :  { %v1984_v57 = vmin.f32 %v1982_v6, %v1983_v8  ;;  %v1991_v12 = vmax.f32 %v1982_v6, %v1983_v8  ;;  %5010 = vmatprep.mubr.f32.mxu1 %v2249_v11 }
 0x3ee   :  { %5011 = vmatmul.mubr.f32.vlgmr.msra.gmra.mrb[14].mxu1 %v4977_v10 }
 0x3ef   :  { %v1985_v39 = vrot.slane %v1984_v57, 4  ;;  %v1992_v40 = vrot.slane %v1991_v12, 4  ;;  %5682 = vmatpush3.bf16.msra.mxu1 %v5679_v28  ;;  %5059 = vmatprep.mubr.msk.f32.mxu1 %vm1093_vm0, %v6962_v41 }
 0x3f0   :  { %v4970_v59 = vpop.f32.mrb[10].mxu0  ;;  %5684 = vmatprep.subr.bf16.mxu1 %v6488_v62 }
 0x3f1   :  { %v2143_v4 = vpop.f32.mrb[11].mxu0  ;;  %v1986_v44 = vmin.f32 %v1984_v57, %v1985_v39  ;;  %v1993_v7 = vmax.f32 %v1991_v12, %v1992_v40  ;;  %v764_v12 = vsel %vm762_vm7, %v6340_v14, 0.0 }
 0x3f2   :  { %v2152_v1 = vpack.c.bf16 %v4970_v59, %v2143_v4  ;;  %5060 = vmatmul.mubr.msk.f32.vlgmr.msra.gmra.mrb[16].mxu1 %vm1093_vm0, %v6968_v37 }
 0x3f3   :  { %v1987_v28 = vrot.slane %v1986_v44, 2  ;;  %v1994_v51 = vrot.slane %v1993_v7, 2  ;;  %5686 = vmatpush3.bf16.msra.mxu1 %v6488_v62 }
 0x3f4   :  { %4244 = vst [vmem:[#allocation15 + $0x28] sm:$0xff] %v2152_v1   ;;  %v2163_v17 = vunpack.c.l.bf16 %v2152_v1  ;;  %v2164_v50 = vunpack.c.h.bf16 %v2152_v1  ;;  %v5019_v30 = vpop.f32.mrb[12].mxu0  ;;  %5688 = vmatprep.subr.bf16.mxu1 %v6492_v63 }
 0x3f5   :  { %v2430_v25 = vpop.f32.mrb[13].mxu0  ;;  %v1988_v45 = vmin.f32 %v1986_v44, %v1987_v28  ;;  %v1995_v42 = vmax.f32 %v1993_v7, %v1994_v51 }
 0x3f6   :  { %v2165_v61 = vmin.f32 %v2163_v17, %v2164_v50  ;;  %v2172_v32 = vmax.f32 %v2163_v17, %v2164_v50  ;;  %5052 = vmatprep.mubr.f32.mxu0 %v2430_v25  ;;  %v765_v17 = vsel %vm763_vm8, %v6340_v14, 0.0  ;;  %v768_v50 = vsel %vm766_vm9, %v6343_v15, %v764_v12 }
 0x3f7   :  { %5053 = vmatmul.mubr.f32.vlgmr.msra.gmra.mrb[14].mxu0 %v5019_v30  ;;  %v1989_v21 = vrot.slane %v1988_v45, 1  ;;  %5690 = vmatpush3.bf16.msra.mxu1 %v6492_v63  ;;  %v769_v30 = vsel %vm767_vm10, %v6343_v15, %v765_v17  ;;  %v772_v25 = vsel %vm770_vm11, %v6350_v18, %v768_v50 }
 0x3f8   :  { %v2166_v46 = vrot.slane %v2165_v61, 4  ;;  %v2173_v29 = vrot.slane %v2172_v32, 4  ;;  %5718 = vmatpush3.bf16.msra.mxu0 %v5715_v58  ;;  %5101 = vmatprep.mubr.msk.f32.mxu0 %vm1093_vm0, %v6962_v41  ;;  %v1996_v58 = vrot.slane %v1995_v42, 1  ;;  %v773_v39 = vsel %vm771_vm12, %v6350_v18, %v769_v30 }
 0x3f9   :  { %5720 = vmatprep.subr.bf16.mxu0 %v6488_v62  ;;  %5692 = vmatprep.subr.bf16.mxu1 %v6504_v2  ;;  %v1990_v59 = vmin.f32 %v1988_v45, %v1989_v21  ;;  %v776_v40 = vsel %vm774_vm13, %v6353_v19, %v772_v25 }
 0x3fa   :  { %v2167_v52 = vmin.f32 %v2165_v61, %v2166_v46  ;;  %v2174_v38 = vmax.f32 %v2172_v32, %v2173_v29  ;;  %v1997_v3 = vmax.f32 %v1995_v42, %v1996_v58  ;;  %v777_v61 = vsel %vm775_vm14, %v6353_v19, %v773_v39  ;;  %v4192_v32 = vld [vmem:[#allocation13 + $0x60] sm:$0xff]  }
 0x3fb   :  { %5102 = vmatmul.mubr.msk.f32.vlgmr.msra.gmra.mrb[16].mxu0 %vm1093_vm0, %v6968_v37  ;;  %v6987_v8 = vmin.f32 %v1817_v36, %v1990_v59  ;;  %5694 = vmatpush3.bf16.msra.mxu1 %v6504_v2  ;;  %v7024_v36 = vunpack.c.2.s8 %v4344_v33  ;;  %v780_v44 = vsel %vm778_vm15, %v6359_v22, %v776_v40  ;;  %v781_v7 = vsel %vm779_vm1, %v6359_v22, %v777_v61 }
 0x3fc   :  { %v2168_v48 = vrot.slane %v2167_v52, 2  ;;  %v2175_v49 = vrot.slane %v2174_v38, 2  ;;  %5722 = vmatpush3.bf16.msra.mxu0 %v6488_v62  ;;  %v6992_v1 = vmax.f32 %v1818_v43, %v1997_v3  ;;  %5696 = vmatprep.subr.bf16.mxu1 %v6510_v5  ;;  %v7026_v43 = vunpack.c.3.s8 %v4344_v33 }
 0x3fd   :  { %5724 = vmatprep.subr.bf16.mxu0 %v6492_v63  ;;  %v784_v46 = vsel %vm782_vm2, %v6361_v23, %v780_v44  ;;  %v785_v29 = vsel %vm783_vm3, %v6361_v23, %v781_v7  ;;  %v4193_v28 = vunpack.c.l.bf16 %v4192_v32  ;;  %v4194_v51 = vunpack.c.h.bf16 %v4192_v32 }
 0x3fe   :  { %v2169_v60 = vmin.f32 %v2167_v52, %v2168_v48  ;;  %v2176_v0 = vmax.f32 %v2174_v38, %v2175_v49  ;;  %vm817_vm4 = vcmp.eq.s32.totalorder %v7024_v36, 0  ;;  %vm818_vm5 = vcmp.eq.s32.totalorder %v7026_v43, 0 }
 0x3ff   :  { %5698 = vmatpush3.bf16.msra.mxu1 %v6510_v5  ;;  %vm821_vm6 = vcmp.eq.s32.totalorder %v7024_v36, 1  ;;  %vm822_vm7 = vcmp.eq.s32.totalorder %v7026_v43, 1  ;;  %v791_v52 = vadd.f32 %v4193_v28, %v784_v46  ;;  %v792_v38 = vadd.f32 %v4194_v51, %v785_v29 }
 0x400   :  { %v2170_v4 = vrot.slane %v2169_v60, 1  ;;  %v2177_v6 = vrot.slane %v2176_v0, 1  ;;  %5726 = vmatpush3.bf16.msra.mxu0 %v6492_v63  ;;  %5700 = vmatprep.subr.bf16.mxu1 %v6516_v9  ;;  %v819_v45 = vsel %vm817_vm4, %v6340_v14, 0.0  ;;  %v820_v42 = vsel %vm818_vm5, %v6340_v14, 0.0 }
 0x401   :  { %5728 = vmatprep.subr.bf16.mxu0 %v6504_v2  ;;  %v745_v48 = vmul.f32 %v6948_v53, %v6408_v47  ;;  %v746_v49 = vmul.f32 %v6950_v56, %v6408_v47  ;;  %v823_v21 = vsel %vm821_vm6, %v6343_v15, %v819_v45  ;;  %v824_v58 = vsel %vm822_vm7, %v6343_v15, %v820_v42 }
 0x402   :  { %v6994_v10 = vmin.f32 %v2169_v60, %v2170_v4  ;;  %v6996_v11 = vmax.f32 %v2176_v0, %v2177_v6  ;;  %vm825_vm8 = vcmp.eq.s32.totalorder %v7024_v36, 2  ;;  %vm826_vm9 = vcmp.eq.s32.totalorder %v7026_v43, 2 }
 0x403   :  { %5702 = vmatpush3.bf16.msra.mxu1 %v6516_v9  ;;  %v747_v60 = vadd.f32 %v745_v48, %v6923_v31  ;;  %v748_v0 = vadd.f32 %v746_v49, %v6926_v20  ;;  %v7057_v59 = vmul.f32 %v791_v52, %v6369_v26  ;;  %v7060_v53 = vmul.f32 %v792_v38, %v6369_v26  ;;  %v4196_v20 = vld [vmem:[#allocation13 + $0x68] sm:$0xff]  }
 0x404   :  { %v2179_v57 = vmin.f32 %v6987_v8, %v6994_v10  ;;  %v2180_v27 = vmax.f32 %v6992_v1, %v6996_v11  ;;  %5730 = vmatpush3.bf16.msra.mxu0 %v6504_v2  ;;  %5704 = vmatprep.subr.bf16.mxu1 %v6522_v16  ;;  %v800_v56 = vmul.f32 %v791_v52, %v6408_v47  ;;  %vm829_vm10 = vcmp.eq.s32.totalorder %v7024_v36, 3  ;;  %v4352_v1 = vld [vmem:[#allocation12 + $0x38] sm:$0xff]  }
 0x405   :  { %5732 = vmatprep.subr.bf16.mxu0 %v6510_v5  ;;  %v801_v3 = vmul.f32 %v792_v38, %v6408_v47  ;;  %v827_v4 = vsel %vm825_vm8, %v6350_v18, %v823_v21  ;;  %v828_v6 = vsel %vm826_vm9, %v6350_v18, %v824_v58  ;;  %v808_v33 = vadd.f32 %v7057_v59, %v747_v60 }
 0x406   :  { %v809_v31 = vadd.f32 %v7060_v53, %v748_v0  ;;  %vm830_vm11 = vcmp.eq.s32.totalorder %v7026_v43, 3  ;;  %v831_v34 = vsel %vm829_vm10, %v6353_v19, %v827_v4  ;;  %vm833_vm12 = vcmp.eq.s32.totalorder %v7024_v36, 4 }
 0x407   :  { %5706 = vmatpush3.bf16.msra.mxu1 %v6522_v16  ;;  %v832_v35 = vsel %vm830_vm11, %v6353_v19, %v828_v6  ;;  %vm834_vm13 = vcmp.eq.s32.totalorder %v7026_v43, 4  ;;  %v835_v17 = vsel %vm833_vm12, %v6359_v22, %v831_v34  ;;  %vm837_vm14 = vcmp.eq.s32.totalorder %v7024_v36, 5 }
 0x408   :  { %5734 = vmatpush3.bf16.msra.mxu0 %v6510_v5  ;;  %5708 = vmatprep.subr.bf16.mxu1 %v6528_v13  ;;  %v5751_v12 = vpack.c.bf16 %v809_v31, %v808_v33  ;;  %v836_v50 = vsel %vm834_vm13, %v6359_v22, %v832_v35  ;;  %vm838_vm15 = vcmp.eq.s32.totalorder %v7026_v43, 5  ;;  %v839_v30 = vsel %vm837_vm14, %v6361_v23, %v835_v17 }
 0x409   :  { %5736 = vmatprep.subr.bf16.mxu0 %v6516_v9  ;;  %v4197_v25 = vunpack.c.l.bf16 %v4196_v20  ;;  %v4198_v39 = vunpack.c.h.bf16 %v4196_v20  ;;  %v840_v40 = vsel %vm838_vm15, %v6361_v23, %v836_v50  ;;  %v802_v61 = vadd.f32 %v800_v56, %v6954_v54 }
 0x40a   :  { %v803_v32 = vadd.f32 %v801_v3, %v6958_v55  ;;  %v4353_v10 = vunpack.c.0.s8 %v4352_v1  ;;  %v4354_v11 = vunpack.c.1.s8 %v4352_v1 }
 0x40b   :  { %5710 = vmatpush3.bf16.msra.mxu1 %v6528_v13  ;;  %v7082_v44 = vadd.f32 %v4197_v25, %v839_v30  ;;  %v7084_v7 = vadd.f32 %v4198_v39, %v840_v40 }
 0x40c   :  { %5738 = vmatpush3.bf16.msra.mxu0 %v6516_v9  ;;  %5712 = vmatprep.subr.bf16.mxu1 %v6534_v24  ;;  %vm872_vm1 = vcmp.eq.s32.totalorder %v4353_v10, 0  ;;  %vm873_vm2 = vcmp.eq.s32.totalorder %v4354_v11, 0  ;;  %vm876_vm3 = vcmp.eq.s32.totalorder %v4353_v10, 1  ;;  %vm877_vm4 = vcmp.eq.s32.totalorder %v4354_v11, 1 }
 0x40d   :  { %5740 = vmatprep.subr.bf16.mxu0 %v6522_v16  ;;  %v7088_v36 = vmul.f32 %v7082_v44, %v6369_v26  ;;  %v7092_v43 = vmul.f32 %v7084_v7, %v6369_v26  ;;  %vm880_vm5 = vcmp.eq.s32.totalorder %v4353_v10, 2  ;;  %vm881_vm6 = vcmp.eq.s32.totalorder %v4354_v11, 2 }
 0x40e   :  { %vm884_vm7 = vcmp.eq.s32.totalorder %v4353_v10, 3  ;;  %vm885_vm8 = vcmp.eq.s32.totalorder %v4354_v11, 3  ;;  %vm888_vm9 = vcmp.eq.s32.totalorder %v4353_v10, 4  ;;  %vm889_vm10 = vcmp.eq.s32.totalorder %v4354_v11, 4 }
 0x40f   :  { %5714 = vmatpush3.bf16.msra.mxu1 %v6534_v24  ;;  %v863_v46 = vadd.f32 %v7088_v36, %v802_v61  ;;  %v864_v29 = vadd.f32 %v7092_v43, %v803_v32  ;;  %vm892_vm11 = vcmp.eq.s32.totalorder %v4353_v10, 5  ;;  %vm893_vm12 = vcmp.eq.s32.totalorder %v4354_v11, 5 }
 0x410   :  { %5742 = vmatpush3.bf16.msra.mxu0 %v6522_v16  ;;  %5752 = vmatprep.subr.bf16.mxu1 %v5751_v12 }
 0x411   :  { %5744 = vmatprep.subr.bf16.mxu0 %v6528_v13  ;;  %v5787_v28 = vpack.c.bf16 %v864_v29, %v863_v46 }
 0x414   :  { %5746 = vmatpush3.bf16.msra.mxu0 %v6528_v13 }
 0x415   :  { %5748 = vmatprep.subr.bf16.mxu0 %v6534_v24 }
 0x418   :  { %5750 = vmatpush3.bf16.msra.mxu0 %v6534_v24 }
 0x419   :  { %5788 = vmatprep.subr.bf16.mxu0 %v5787_v28 }
 0x4c1   :  { %v5012_v54 = vpop.f32.mrb[14].mxu1 }
 0x4c2   :  { %v2324_v55 = vpop.f32.mrb[15].mxu1 }
 0x4c3   :  { %v2333_v52 = vpack.c.bf16 %v5012_v54, %v2324_v55 }
 0x4c5   :  { %4249 = vst [vmem:[#allocation15 + $0x30] sm:$0xff] %v2333_v52   ;;  %v2344_v45 = vunpack.c.l.bf16 %v2333_v52  ;;  %v2345_v42 = vunpack.c.h.bf16 %v2333_v52  ;;  %v5061_v49 = vpop.f32.mrb[16].mxu1 }
 0x4c6   :  { %v2611_v21 = vpop.f32.mrb[17].mxu1 }
 0x4c7   :  { %v2346_v58 = vmin.f32 %v2344_v45, %v2345_v42  ;;  %v2353_v60 = vmax.f32 %v2344_v45, %v2345_v42  ;;  %5094 = vmatprep.mubr.f32.mxu1 %v2611_v21 }
 0x4c8   :  { %5095 = vmatmul.mubr.f32.vlgmr.msra.gmra.mrb[18].mxu1 %v5061_v49 }
 0x4c9   :  { %v2347_v6 = vrot.slane %v2346_v58, 4  ;;  %v2354_v33 = vrot.slane %v2353_v60, 4  ;;  %5754 = vmatpush3.bf16.msra.mxu1 %v5751_v12  ;;  %5143 = vmatprep.mubr.msk.f32.mxu1 %vm1093_vm0, %v6962_v41 }
 0x4ca   :  { %v5054_v51 = vpop.f32.mrb[14].mxu0  ;;  %5756 = vmatprep.subr.bf16.mxu1 %v6488_v62 }
 0x4cb   :  { %v2505_v38 = vpop.f32.mrb[15].mxu0  ;;  %v2348_v34 = vmin.f32 %v2346_v58, %v2347_v6  ;;  %v2355_v35 = vmax.f32 %v2353_v60, %v2354_v33  ;;  %v874_v60 = vsel %vm872_vm1, %v6340_v14, 0.0 }
 0x4cc   :  { %v2514_v48 = vpack.c.bf16 %v5054_v51, %v2505_v38  ;;  %5144 = vmatmul.mubr.msk.f32.vlgmr.msra.gmra.mrb[20].mxu1 %vm1093_vm0, %v6968_v37 }
 0x4cd   :  { %v2349_v30 = vrot.slane %v2348_v34, 2  ;;  %v2356_v25 = vrot.slane %v2355_v35, 2  ;;  %5758 = vmatpush3.bf16.msra.mxu1 %v6488_v62 }
 0x4ce   :  { %4254 = vst [vmem:[#allocation15 + $0x38] sm:$0xff] %v2514_v48   ;;  %v2525_v0 = vunpack.c.l.bf16 %v2514_v48  ;;  %v2526_v56 = vunpack.c.h.bf16 %v2514_v48  ;;  %v5103_v3 = vpop.f32.mrb[16].mxu0  ;;  %5760 = vmatprep.subr.bf16.mxu1 %v6492_v63 }
 0x4cf   :  { %v2792_v4 = vpop.f32.mrb[17].mxu0  ;;  %v2350_v40 = vmin.f32 %v2348_v34, %v2349_v30  ;;  %v2357_v61 = vmax.f32 %v2355_v35, %v2356_v25 }
 0x4d0   :  { %v2527_v31 = vmin.f32 %v2525_v0, %v2526_v56  ;;  %v2534_v20 = vmax.f32 %v2525_v0, %v2526_v56  ;;  %5136 = vmatprep.mubr.f32.mxu0 %v2792_v4  ;;  %v875_v0 = vsel %vm873_vm2, %v6340_v14, 0.0  ;;  %v878_v56 = vsel %vm876_vm3, %v6343_v15, %v874_v60 }
 0x4d1   :  { %5137 = vmatmul.mubr.f32.vlgmr.msra.gmra.mrb[18].mxu0 %v5103_v3  ;;  %v2351_v29 = vrot.slane %v2350_v40, 1  ;;  %5762 = vmatpush3.bf16.msra.mxu1 %v6492_v63  ;;  %v879_v3 = vsel %vm877_vm4, %v6343_v15, %v875_v0  ;;  %v882_v4 = vsel %vm880_vm5, %v6350_v18, %v878_v56 }
 0x4d2   :  { %v2528_v17 = vrot.slane %v2527_v31, 4  ;;  %v2535_v50 = vrot.slane %v2534_v20, 4  ;;  %5790 = vmatpush3.bf16.msra.mxu0 %v5787_v28  ;;  %5185 = vmatprep.mubr.msk.f32.mxu0 %vm1093_vm0, %v6962_v41  ;;  %v2358_v28 = vrot.slane %v2357_v61, 1  ;;  %v883_v6 = vsel %vm881_vm6, %v6350_v18, %v879_v3 }
 0x4d3   :  { %5792 = vmatprep.subr.bf16.mxu0 %v6488_v62  ;;  %5764 = vmatprep.subr.bf16.mxu1 %v6504_v2  ;;  %v2352_v51 = vmin.f32 %v2350_v40, %v2351_v29  ;;  %v886_v33 = vsel %vm884_vm7, %v6353_v19, %v882_v4 }
 0x4d4   :  { %v2529_v12 = vmin.f32 %v2527_v31, %v2528_v17  ;;  %v2536_v39 = vmax.f32 %v2534_v20, %v2535_v50  ;;  %v2359_v52 = vmax.f32 %v2357_v61, %v2358_v28  ;;  %v887_v31 = vsel %vm885_vm8, %v6353_v19, %v883_v6  ;;  %v4200_v20 = vld [vmem:[#allocation13 + $0x70] sm:$0xff]  }
 0x4d5   :  { %5186 = vmatmul.mubr.msk.f32.vlgmr.msra.gmra.mrb[20].mxu0 %vm1093_vm0, %v6968_v37  ;;  %v7117_v42 = vmin.f32 %v2179_v57, %v2352_v51  ;;  %5766 = vmatpush3.bf16.msra.mxu1 %v6504_v2  ;;  %v7154_v57 = vunpack.c.2.s8 %v4352_v1  ;;  %v890_v34 = vsel %vm888_vm9, %v6359_v22, %v886_v33  ;;  %v891_v35 = vsel %vm889_vm10, %v6359_v22, %v887_v31 }
 0x4d6   :  { %v2530_v32 = vrot.slane %v2529_v12, 2  ;;  %v2537_v46 = vrot.slane %v2536_v39, 2  ;;  %5794 = vmatpush3.bf16.msra.mxu0 %v6488_v62  ;;  %v7122_v48 = vmax.f32 %v2180_v27, %v2359_v52  ;;  %5768 = vmatprep.subr.bf16.mxu1 %v6510_v5  ;;  %v7156_v27 = vunpack.c.3.s8 %v4352_v1 }
 0x4d7   :  { %5796 = vmatprep.subr.bf16.mxu0 %v6492_v63  ;;  %v894_v17 = vsel %vm892_vm11, %v6361_v23, %v890_v34  ;;  %v895_v50 = vsel %vm893_vm12, %v6361_v23, %v891_v35  ;;  %v4201_v30 = vunpack.c.l.bf16 %v4200_v20  ;;  %v4202_v25 = vunpack.c.h.bf16 %v4200_v20 }
 0x4d8   :  { %v2531_v54 = vmin.f32 %v2529_v12, %v2530_v32  ;;  %v2538_v55 = vmax.f32 %v2536_v39, %v2537_v46  ;;  %vm927_vm13 = vcmp.eq.s32.totalorder %v7154_v57, 0  ;;  %vm928_vm14 = vcmp.eq.s32.totalorder %v7156_v27, 0 }
 0x4d9   :  { %5770 = vmatpush3.bf16.msra.mxu1 %v6510_v5  ;;  %vm931_vm15 = vcmp.eq.s32.totalorder %v7154_v57, 1  ;;  %vm932_vm1 = vcmp.eq.s32.totalorder %v7156_v27, 1  ;;  %v901_v12 = vadd.f32 %v4201_v30, %v894_v17  ;;  %v902_v39 = vadd.f32 %v4202_v25, %v895_v50 }
 0x4da   :  { %v2532_v38 = vrot.slane %v2531_v54, 1  ;;  %v2539_v45 = vrot.slane %v2538_v55, 1  ;;  %5798 = vmatpush3.bf16.msra.mxu0 %v6492_v63  ;;  %5772 = vmatprep.subr.bf16.mxu1 %v6516_v9  ;;  %v929_v40 = vsel %vm927_vm13, %v6340_v14, 0.0  ;;  %v930_v61 = vsel %vm928_vm14, %v6340_v14, 0.0 }
 0x4db   :  { %5800 = vmatprep.subr.bf16.mxu0 %v6504_v2  ;;  %v855_v32 = vmul.f32 %v7082_v44, %v6408_v47  ;;  %v856_v46 = vmul.f32 %v7084_v7, %v6408_v47  ;;  %v933_v29 = vsel %vm931_vm15, %v6343_v15, %v929_v40  ;;  %v934_v28 = vsel %vm932_vm1, %v6343_v15, %v930_v61 }
 0x4dc   :  { %v7124_v49 = vmin.f32 %v2531_v54, %v2532_v38  ;;  %v7126_v21 = vmax.f32 %v2538_v55, %v2539_v45  ;;  %vm935_vm2 = vcmp.eq.s32.totalorder %v7154_v57, 2  ;;  %vm936_vm3 = vcmp.eq.s32.totalorder %v7156_v27, 2 }
 0x4dd   :  { %5774 = vmatpush3.bf16.msra.mxu1 %v6516_v9  ;;  %v857_v54 = vadd.f32 %v855_v32, %v7057_v59  ;;  %v858_v55 = vadd.f32 %v856_v46, %v7060_v53  ;;  %v7187_v51 = vmul.f32 %v901_v12, %v6369_v26  ;;  %v7190_v44 = vmul.f32 %v902_v39, %v6369_v26  ;;  %v4204_v53 = vld [vmem:[#allocation13 + $0x78] sm:$0xff]  }
 0x4de   :  { %v2541_v58 = vmin.f32 %v7117_v42, %v7124_v49  ;;  %v2542_v8 = vmax.f32 %v7122_v48, %v7126_v21  ;;  %5802 = vmatpush3.bf16.msra.mxu0 %v6504_v2  ;;  %5776 = vmatprep.subr.bf16.mxu1 %v6522_v16  ;;  %v910_v7 = vmul.f32 %v901_v12, %v6408_v47  ;;  %vm939_vm4 = vcmp.eq.s32.totalorder %v7154_v57, 3  ;;  %v4360_v42 = vld [vmem:[#allocation12 + $0x40] sm:$0xff]  }
 0x4df   :  { %5804 = vmatprep.subr.bf16.mxu0 %v6510_v5  ;;  %v911_v52 = vmul.f32 %v902_v39, %v6408_v47  ;;  %v937_v38 = vsel %vm935_vm2, %v6350_v18, %v933_v29  ;;  %v938_v45 = vsel %vm936_vm3, %v6350_v18, %v934_v28  ;;  %v918_v1 = vadd.f32 %v7187_v51, %v857_v54 }
 0x4e0   :  { %v919_v59 = vadd.f32 %v7190_v44, %v858_v55  ;;  %vm940_vm5 = vcmp.eq.s32.totalorder %v7156_v27, 3  ;;  %v941_v10 = vsel %vm939_vm4, %v6353_v19, %v937_v38  ;;  %vm943_vm6 = vcmp.eq.s32.totalorder %v7154_v57, 4 }
 0x4e1   :  { %5778 = vmatpush3.bf16.msra.mxu1 %v6522_v16  ;;  %v942_v11 = vsel %vm940_vm5, %v6353_v19, %v938_v45  ;;  %vm944_vm7 = vcmp.eq.s32.totalorder %v7156_v27, 4  ;;  %v945_v0 = vsel %vm943_vm6, %v6359_v22, %v941_v10  ;;  %vm947_vm8 = vcmp.eq.s32.totalorder %v7154_v57, 5 }
 0x4e2   :  { %5806 = vmatpush3.bf16.msra.mxu0 %v6510_v5  ;;  %5780 = vmatprep.subr.bf16.mxu1 %v6528_v13  ;;  %v5823_v60 = vpack.c.bf16 %v919_v59, %v918_v1  ;;  %v946_v56 = vsel %vm944_vm7, %v6359_v22, %v942_v11  ;;  %vm948_vm9 = vcmp.eq.s32.totalorder %v7156_v27, 5  ;;  %v949_v3 = vsel %vm947_vm8, %v6361_v23, %v945_v0 }
 0x4e3   :  { %5808 = vmatprep.subr.bf16.mxu0 %v6516_v9  ;;  %v4205_v4 = vunpack.c.l.bf16 %v4204_v53  ;;  %v4206_v6 = vunpack.c.h.bf16 %v4204_v53  ;;  %v950_v33 = vsel %vm948_vm9, %v6361_v23, %v946_v56  ;;  %v912_v31 = vadd.f32 %v910_v7, %v7088_v36 }
 0x4e4   :  { %v913_v20 = vadd.f32 %v911_v52, %v7092_v43  ;;  %v4361_v49 = vunpack.c.0.s8 %v4360_v42 }
 0x4e5   :  { %5782 = vmatpush3.bf16.msra.mxu1 %v6528_v13  ;;  %v7212_v34 = vadd.f32 %v4205_v4, %v949_v3  ;;  %v7214_v35 = vadd.f32 %v4206_v6, %v950_v33 }
 0x4e6   :  { %5810 = vmatpush3.bf16.msra.mxu0 %v6516_v9  ;;  %5784 = vmatprep.subr.bf16.mxu1 %v6534_v24  ;;  %vm982_vm10 = vcmp.eq.s32.totalorder %v4361_v49, 0  ;;  %vm986_vm12 = vcmp.eq.s32.totalorder %v4361_v49, 1  ;;  %vm990_vm14 = vcmp.eq.s32.totalorder %v4361_v49, 2  ;;  %vm994_vm1 = vcmp.eq.s32.totalorder %v4361_v49, 3 }
 0x4e7   :  { %5812 = vmatprep.subr.bf16.mxu0 %v6522_v16  ;;  %v7218_v57 = vmul.f32 %v7212_v34, %v6369_v26  ;;  %v7222_v27 = vmul.f32 %v7214_v35, %v6369_v26  ;;  %vm998_vm3 = vcmp.eq.s32.totalorder %v4361_v49, 4  ;;  %vm1002_vm5 = vcmp.eq.s32.totalorder %v4361_v49, 5 }
 0x4e9   :  { %5786 = vmatpush3.bf16.msra.mxu1 %v6534_v24  ;;  %v973_v17 = vadd.f32 %v7218_v57, %v912_v31  ;;  %v974_v50 = vadd.f32 %v7222_v27, %v913_v20 }
 0x4ea   :  { %5814 = vmatpush3.bf16.msra.mxu0 %v6522_v16  ;;  %5824 = vmatprep.subr.bf16.mxu1 %v5823_v60 }
 0x4eb   :  { %5816 = vmatprep.subr.bf16.mxu0 %v6528_v13  ;;  %v5859_v30 = vpack.c.bf16 %v974_v50, %v973_v17 }
 0x4ee   :  { %5818 = vmatpush3.bf16.msra.mxu0 %v6528_v13 }
 0x4ef   :  { %5820 = vmatprep.subr.bf16.mxu0 %v6534_v24 }
 0x4f2   :  { %5822 = vmatpush3.bf16.msra.mxu0 %v6534_v24 }
 0x4f3   :  { %5860 = vmatprep.subr.bf16.mxu0 %v5859_v30 }
 0x59b   :  { %v5096_v36 = vpop.f32.mrb[18].mxu1 }
 0x59c   :  { %v2686_v43 = vpop.f32.mrb[19].mxu1 }
 0x59d   :  { %v2695_v12 = vpack.c.bf16 %v5096_v36, %v2686_v43 }
 0x59f   :  { %4259 = vst [vmem:[#allocation15 + $0x40] sm:$0xff] %v2695_v12   ;;  %v2706_v40 = vunpack.c.l.bf16 %v2695_v12  ;;  %v2707_v61 = vunpack.c.h.bf16 %v2695_v12  ;;  %v5145_v46 = vpop.f32.mrb[20].mxu1 }
 0x5a0   :  { %v2973_v29 = vpop.f32.mrb[21].mxu1 }
 0x5a1   :  { %v2708_v28 = vmin.f32 %v2706_v40, %v2707_v61  ;;  %v2715_v54 = vmax.f32 %v2706_v40, %v2707_v61  ;;  %5178 = vmatprep.mubr.f32.mxu1 %v2973_v29  ;;  %v984_v29 = vsel %vm982_vm10, %v6340_v14, 0.0 }
 0x5a2   :  { %5179 = vmatmul.mubr.f32.vlgmr.msra.gmra.mrb[22].mxu1 %v5145_v46  ;;  %v7286_v46 = vunpack.c.3.s8 %v4360_v42 }
 0x5a3   :  { %v2709_v45 = vrot.slane %v2708_v28, 4  ;;  %v2716_v1 = vrot.slane %v2715_v54, 4  ;;  %5826 = vmatpush3.bf16.msra.mxu1 %v5823_v60  ;;  %5227 = vmatprep.mubr.msk.f32.mxu1 %vm1093_vm0, %v6962_v41 }
 0x5a4   :  { %v5138_v25 = vpop.f32.mrb[18].mxu0  ;;  %5828 = vmatprep.subr.bf16.mxu1 %v6488_v62  ;;  %vm1035_vm8 = vcmp.eq.s32.totalorder %v7286_v46, 0  ;;  %vm1039_vm10 = vcmp.eq.s32.totalorder %v7286_v46, 1 }
 0x5a5   :  { %v2867_v39 = vpop.f32.mrb[19].mxu0  ;;  %v2710_v10 = vmin.f32 %v2708_v28, %v2709_v45  ;;  %v2717_v11 = vmax.f32 %v2715_v54, %v2716_v1  ;;  %v988_v54 = vsel %vm986_vm12, %v6343_v15, %v984_v29  ;;  %v4208_v1 = vld [vmem:[#allocation13 + $0x80] sm:$0xff]   ;;  %vm1043_vm12 = vcmp.eq.s32.totalorder %v7286_v46, 2 }
 0x5a6   :  { %v2876_v32 = vpack.c.bf16 %v5138_v25, %v2867_v39  ;;  %5228 = vmatmul.mubr.msk.f32.vlgmr.msra.gmra.mrb[24].mxu1 %vm1093_vm0, %v6968_v37 }
 0x5a7   :  { %v2711_v3 = vrot.slane %v2710_v10, 2  ;;  %v2718_v4 = vrot.slane %v2717_v11, 2  ;;  %5830 = vmatpush3.bf16.msra.mxu1 %v6488_v62 }
 0x5a8   :  { %4264 = vst [vmem:[#allocation15 + $0x48] sm:$0xff] %v2876_v32   ;;  %v2887_v55 = vunpack.c.l.bf16 %v2876_v32  ;;  %v2888_v7 = vunpack.c.h.bf16 %v2876_v32  ;;  %v5187_v52 = vpop.f32.mrb[20].mxu0  ;;  %5832 = vmatprep.subr.bf16.mxu1 %v6492_v63 }
 0x5a9   :  { %v3154_v38 = vpop.f32.mrb[21].mxu0  ;;  %v2712_v33 = vmin.f32 %v2710_v10, %v2711_v3 }
 0x5aa   :  { %v2889_v59 = vmin.f32 %v2887_v55, %v2888_v7  ;;  %v2896_v53 = vmax.f32 %v2887_v55, %v2888_v7  ;;  %5220 = vmatprep.mubr.f32.mxu0 %v3154_v38  ;;  %v992_v7 = vsel %vm990_vm14, %v6350_v18, %v988_v54  ;;  %vm1047_vm14 = vcmp.eq.s32.totalorder %v7286_v46, 3 }
 0x5ab   :  { %5221 = vmatmul.mubr.f32.vlgmr.msra.gmra.mrb[22].mxu0 %v5187_v52  ;;  %v2713_v17 = vrot.slane %v2712_v33, 1  ;;  %5834 = vmatpush3.bf16.msra.mxu1 %v6492_v63  ;;  %v996_v38 = vsel %vm994_vm1, %v6353_v19, %v992_v7  ;;  %vm1051_vm1 = vcmp.eq.s32.totalorder %v7286_v46, 4 }
 0x5ac   :  { %v2890_v0 = vrot.slane %v2889_v59, 4  ;;  %v2897_v56 = vrot.slane %v2896_v53, 4  ;;  %5862 = vmatpush3.bf16.msra.mxu0 %v5859_v30  ;;  %5269 = vmatprep.mubr.msk.f32.mxu0 %vm1093_vm0, %v6962_v41  ;;  %v2719_v41 = vmax.f32 %v2717_v11, %v2718_v4 }
 0x5ad   :  { %5864 = vmatprep.subr.bf16.mxu0 %v6488_v62  ;;  %5836 = vmatprep.subr.bf16.mxu1 %v6504_v2  ;;  %v2714_v43 = vmin.f32 %v2712_v33, %v2713_v17  ;;  %v965_v33 = vmul.f32 %v7212_v34, %v6408_v47 }
 0x5ae   :  { %v2891_v60 = vmin.f32 %v2889_v59, %v2890_v0  ;;  %v2898_v6 = vmax.f32 %v2896_v53, %v2897_v56  ;;  %v2720_v50 = vrot.slane %v2719_v41, 1  ;;  %v1000_v59 = vsel %vm998_vm3, %v6359_v22, %v996_v38 }
 0x5af   :  { %5270 = vmatmul.mubr.msk.f32.vlgmr.msra.gmra.mrb[24].mxu0 %vm1093_vm0, %v6968_v37  ;;  %5838 = vmatpush3.bf16.msra.mxu1 %v6504_v2  ;;  %v7257_v32 = vmin.f32 %v2541_v58, %v2714_v43  ;;  %v4362_v58 = vunpack.c.1.s8 %v4360_v42  ;;  %v1004_v10 = vsel %vm1002_vm5, %v6361_v23, %v1000_v59  ;;  %v4209_v0 = vunpack.c.l.bf16 %v4208_v1 }
 0x5b0   :  { %v2892_v31 = vrot.slane %v2891_v60, 2  ;;  %v2899_v20 = vrot.slane %v2898_v6, 2  ;;  %5866 = vmatpush3.bf16.msra.mxu0 %v6488_v62  ;;  %v2721_v37 = vmax.f32 %v2719_v41, %v2720_v50  ;;  %5840 = vmatprep.subr.bf16.mxu1 %v6510_v5  ;;  %v4210_v56 = vunpack.c.h.bf16 %v4208_v1 }
 0x5b1   :  { %5868 = vmatprep.subr.bf16.mxu0 %v6492_v63  ;;  %vm983_vm11 = vcmp.eq.s32.totalorder %v4362_v58, 0  ;;  %vm987_vm13 = vcmp.eq.s32.totalorder %v4362_v58, 1  ;;  %vm991_vm15 = vcmp.eq.s32.totalorder %v4362_v58, 2  ;;  %vm995_vm2 = vcmp.eq.s32.totalorder %v4362_v58, 3 }
 0x5b2   :  { %v2893_v30 = vmin.f32 %v2891_v60, %v2892_v31  ;;  %v2900_v36 = vmax.f32 %v2898_v6, %v2899_v20  ;;  %v7247_v39 = vmax.f32 %v2542_v8, %v2721_v37  ;;  %v7284_v8 = vunpack.c.2.s8 %v4360_v42 }
 0x5b3   :  { %5842 = vmatpush3.bf16.msra.mxu1 %v6510_v5  ;;  %v985_v28 = vsel %vm983_vm11, %v6340_v14, 0.0  ;;  %vm999_vm4 = vcmp.eq.s32.totalorder %v4362_v58, 4  ;;  %vm1003_vm6 = vcmp.eq.s32.totalorder %v4362_v58, 5  ;;  %v1011_v3 = vadd.f32 %v4209_v0, %v1004_v10 }
 0x5b4   :  { %v2894_v25 = vrot.slane %v2893_v30, 1  ;;  %v2901_v12 = vrot.slane %v2900_v36, 1  ;;  %5870 = vmatpush3.bf16.msra.mxu0 %v6492_v63  ;;  %5844 = vmatprep.subr.bf16.mxu1 %v6516_v9  ;;  %v989_v55 = vsel %vm987_vm13, %v6343_v15, %v985_v28  ;;  %vm1034_vm7 = vcmp.eq.s32.totalorder %v7284_v8, 0 }
 0x5b5   :  { %5872 = vmatprep.subr.bf16.mxu0 %v6504_v2  ;;  %v993_v52 = vsel %vm991_vm15, %v6350_v18, %v989_v55  ;;  %vm1038_vm9 = vcmp.eq.s32.totalorder %v7284_v8, 1  ;;  %v1036_v60 = vsel %vm1034_vm7, %v6340_v14, 0.0  ;;  %v1037_v6 = vsel %vm1035_vm8, %v6340_v14, 0.0 }
 0x5b6   :  { %v7249_v40 = vmin.f32 %v2893_v30, %v2894_v25  ;;  %v7251_v61 = vmax.f32 %v2900_v36, %v2901_v12  ;;  %v997_v45 = vsel %vm995_vm2, %v6353_v19, %v993_v52  ;;  %v966_v41 = vmul.f32 %v7214_v35, %v6408_v47 }
 0x5b7   :  { %5846 = vmatpush3.bf16.msra.mxu1 %v6516_v9  ;;  %v1001_v53 = vsel %vm999_vm4, %v6359_v22, %v997_v45  ;;  %v1040_v31 = vsel %vm1038_vm9, %v6343_v15, %v1036_v60  ;;  %v1041_v20 = vsel %vm1039_vm10, %v6343_v15, %v1037_v6  ;;  %vm1042_vm11 = vcmp.eq.s32.totalorder %v7284_v8, 2 }
 0x5b8   :  { %5874 = vmatpush3.bf16.msra.mxu0 %v6504_v2  ;;  %v2903_v48 = vmin.f32 %v7257_v32, %v7249_v40  ;;  %v2904_v21 = vmax.f32 %v7247_v39, %v7251_v61  ;;  %5848 = vmatprep.subr.bf16.mxu1 %v6522_v16  ;;  %v1005_v11 = vsel %vm1003_vm6, %v6361_v23, %v1001_v53  ;;  %vm1046_vm13 = vcmp.eq.s32.totalorder %v7284_v8, 3 }
 0x5b9   :  { %5876 = vmatprep.subr.bf16.mxu0 %v6510_v5  ;;  %v1012_v4 = vadd.f32 %v4210_v56, %v1005_v11  ;;  %v967_v17 = vadd.f32 %v965_v33, %v7187_v51  ;;  %v968_v50 = vadd.f32 %v966_v41, %v7190_v44  ;;  %v1013_v14 = vmul.f32 %v1011_v3, %v6369_v26  ;;  %v4212_v51 = vld [vmem:[#allocation13 + $0x88] sm:$0xff]  }
 0x5ba   :  { %v1017_v34 = vmul.f32 %v1011_v3, %v6408_v47  ;;  %v1044_v36 = vsel %vm1042_vm11, %v6350_v18, %v1040_v31  ;;  %v1045_v15 = vsel %vm1043_vm12, %v6350_v18, %v1041_v20  ;;  %vm1050_vm15 = vcmp.eq.s32.totalorder %v7284_v8, 4  ;;  %v5984_v20 = vld [vmem:[#allocation9] sm:$0xff] }
 0x5bb   :  { %5850 = vmatpush3.bf16.msra.mxu1 %v6522_v16  ;;  %v1014_v30 = vmul.f32 %v1012_v4, %v6369_v26  ;;  %v1018_v35 = vmul.f32 %v1012_v4, %v6408_v47  ;;  %v1025_v43 = vadd.f32 %v1013_v14, %v967_v17  ;;  %v1048_v44 = vsel %vm1046_vm13, %v6353_v19, %v1044_v36 }
 0x5bc   :  { %5878 = vmatpush3.bf16.msra.mxu0 %v6510_v5  ;;  %5852 = vmatprep.subr.bf16.mxu1 %v6528_v13  ;;  %v1049_v25 = vsel %vm1047_vm14, %v6353_v19, %v1045_v15  ;;  %v1052_v12 = vsel %vm1050_vm15, %v6359_v22, %v1048_v44  ;;  %vm1054_vm2 = vcmp.eq.s32.totalorder %v7284_v8, 5  ;;  %vm1055_vm3 = vcmp.eq.s32.totalorder %v7286_v46, 5 }
 0x5bd   :  { %5880 = vmatprep.subr.bf16.mxu0 %v6516_v9  ;;  %v1026_v37 = vadd.f32 %v1014_v30, %v968_v50  ;;  %v1053_v18 = vsel %vm1051_vm1, %v6359_v22, %v1049_v25  ;;  %v1056_v42 = vsel %vm1054_vm2, %v6361_v23, %v1052_v12  ;;  %v4213_v49 = vunpack.c.l.bf16 %v4212_v51 }
 0x5be   :  { %v4214_v58 = vunpack.c.h.bf16 %v4212_v51  ;;  %v1057_v19 = vsel %vm1055_vm3, %v6361_v23, %v1053_v18  ;;  %v1019_v29 = vadd.f32 %v1017_v34, %v7218_v57  ;;  %v1020_v28 = vadd.f32 %v1018_v35, %v7222_v27  ;;  %v5985_v34 = vld [vmem:[#allocation9 + $0x8] sm:$0xff] }
 0x5bf   :  { %5854 = vmatpush3.bf16.msra.mxu1 %v6528_v13  ;;  %v5895_v47 = vpack.c.bf16 %v1026_v37, %v1025_v43  ;;  %v1063_v54 = vadd.f32 %v4213_v49, %v1056_v42 }
 0x5c0   :  { %5882 = vmatpush3.bf16.msra.mxu0 %v6516_v9  ;;  %5856 = vmatprep.subr.bf16.mxu1 %v6534_v24  ;;  %v1064_v55 = vadd.f32 %v4214_v58, %v1057_v19 }
 0x5c1   :  { %5884 = vmatprep.subr.bf16.mxu0 %v6522_v16  ;;  %v1065_v7 = vmul.f32 %v1063_v54, %v6369_v26 }
 0x5c2   :  { %v1066_v22 = vmul.f32 %v1064_v55, %v6369_v26 }
 0x5c3   :  { %5858 = vmatpush3.bf16.msra.mxu1 %v6534_v24  ;;  %v1069_v8 = vadd.f32 %v1065_v7, %v1019_v29 }
 0x5c4   :  { %5886 = vmatpush3.bf16.msra.mxu0 %v6522_v16  ;;  %5896 = vmatprep.subr.bf16.mxu1 %v5895_v47  ;;  %v1070_v52 = vadd.f32 %v1066_v22, %v1020_v28 }
 0x5c5   :  { %5888 = vmatprep.subr.bf16.mxu0 %v6528_v13 }
 0x5c6   :  { %v5931_v46 = vpack.c.bf16 %v1070_v52, %v1069_v8 }
 0x5c8   :  { %5890 = vmatpush3.bf16.msra.mxu0 %v6528_v13 }
 0x5c9   :  { %5892 = vmatprep.subr.bf16.mxu0 %v6534_v24 }
 0x5cc   :  { %5894 = vmatpush3.bf16.msra.mxu0 %v6534_v24 }
 0x5cd   :  { %5932 = vmatprep.subr.bf16.mxu0 %v5931_v46 }
 0x675   :  { %v5180_v38 = vpop.f32.mrb[22].mxu1 }
 0x676   :  { %v3048_v45 = vpop.f32.mrb[23].mxu1 }
 0x677   :  { %v3057_v59 = vpack.c.bf16 %v5180_v38, %v3048_v45 }
 0x679   :  { %4269 = vst [vmem:[#allocation15 + $0x50] sm:$0xff] %v3057_v59   ;;  %v3068_v23 = vunpack.c.l.bf16 %v3057_v59  ;;  %v3069_v57 = vunpack.c.h.bf16 %v3057_v59  ;;  %v5229_v27 = vpop.f32.mrb[24].mxu1 }
 0x67a   :  { %v3335_v11 = vpop.f32.mrb[25].mxu1 }
 0x67b   :  { %v3070_v0 = vmin.f32 %v3068_v23, %v3069_v57  ;;  %v3077_v56 = vmax.f32 %v3068_v23, %v3069_v57  ;;  %5262 = vmatprep.mubr.f32.mxu1 %v3335_v11 }
 0x67c   :  { %5263 = vmatmul.mubr.f32.vlgmr.msra.gmra.mrb[26].mxu1 %v5229_v27 }
 0x67d   :  { %v3071_v6 = vrot.slane %v3070_v0, 4  ;;  %v3078_v33 = vrot.slane %v3077_v56, 4  ;;  %5898 = vmatpush3.bf16.msra.mxu1 %v5895_v47  ;;  %5311 = vmatprep.mubr.msk.f32.mxu1 %vm1093_vm0, %v5984_v20 }
 0x67e   :  { %v5222_v1 = vpop.f32.mrb[22].mxu0  ;;  %5900 = vmatprep.subr.bf16.mxu1 %v6488_v62 }
 0x67f   :  { %v3229_v53 = vpop.f32.mrb[23].mxu0  ;;  %v3072_v17 = vmin.f32 %v3070_v0, %v3071_v6  ;;  %v3079_v50 = vmax.f32 %v3077_v56, %v3078_v33 }
 0x680   :  { %v3238_v10 = vpack.c.bf16 %v5222_v1, %v3229_v53  ;;  %5312 = vmatmul.mubr.msk.f32.vlgmr.msra.gmra.mrb[28].mxu1 %vm1093_vm0, %v5985_v34 }
 0x681   :  { %v3073_v35 = vrot.slane %v3072_v17, 2  ;;  %v3080_v36 = vrot.slane %v3079_v50, 2  ;;  %5902 = vmatpush3.bf16.msra.mxu1 %v6488_v62 }
 0x682   :  { %4274 = vst [vmem:[#allocation15 + $0x58] sm:$0xff] %v3238_v10   ;;  %v3249_v3 = vunpack.c.l.bf16 %v3238_v10  ;;  %v3250_v26 = vunpack.c.h.bf16 %v3238_v10  ;;  %v5271_v4 = vpop.f32.mrb[24].mxu0  ;;  %5904 = vmatprep.subr.bf16.mxu1 %v6492_v63 }
 0x683   :  { %v3516_v60 = vpop.f32.mrb[25].mxu0  ;;  %v3074_v37 = vmin.f32 %v3072_v17, %v3073_v35  ;;  %v3081_v51 = vmax.f32 %v3079_v50, %v3080_v36 }
 0x684   :  { %v3251_v41 = vmin.f32 %v3249_v3, %v3250_v26  ;;  %v3258_v31 = vmax.f32 %v3249_v3, %v3250_v26  ;;  %5304 = vmatprep.mubr.f32.mxu0 %v3516_v60 }
 0x685   :  { %5305 = vmatmul.mubr.f32.vlgmr.msra.gmra.mrb[26].mxu0 %v5271_v4  ;;  %v3075_v47 = vrot.slane %v3074_v37, 1  ;;  %v3082_v12 = vrot.slane %v3081_v51, 1  ;;  %5906 = vmatpush3.bf16.msra.mxu1 %v6492_v63 }
 0x686   :  { %v3252_v14 = vrot.slane %v3251_v41, 4  ;;  %v3259_v30 = vrot.slane %v3258_v31, 4  ;;  %5934 = vmatpush3.bf16.msra.mxu0 %v5931_v46  ;;  %5353 = vmatprep.mubr.msk.f32.mxu0 %vm1093_vm0, %v5984_v20 }
 0x687   :  { %5936 = vmatprep.subr.bf16.mxu0 %v6488_v62  ;;  %5908 = vmatprep.subr.bf16.mxu1 %v6504_v2  ;;  %v3083_v49 = vmax.f32 %v3081_v51, %v3082_v12  ;;  %v3076_v19 = vmin.f32 %v3074_v37, %v3075_v47 }
 0x688   :  { %v3253_v15 = vmin.f32 %v3251_v41, %v3252_v14  ;;  %v3260_v43 = vmax.f32 %v3258_v31, %v3259_v30 }
 0x689   :  { %5354 = vmatmul.mubr.msk.f32.vlgmr.msra.gmra.mrb[28].mxu0 %vm1093_vm0, %v5985_v34  ;;  %5910 = vmatpush3.bf16.msra.mxu1 %v6504_v2  ;;  %v7363_v54 = vmax.f32 %v2904_v21, %v3083_v49 }
 0x68a   :  { %v3254_v44 = vrot.slane %v3253_v15, 2  ;;  %v3261_v25 = vrot.slane %v3260_v43, 2  ;;  %5938 = vmatpush3.bf16.msra.mxu0 %v6488_v62  ;;  %v7356_v62 = vmin.f32 %v2903_v48, %v3076_v19  ;;  %5912 = vmatprep.subr.bf16.mxu1 %v6510_v5 }
 0x68b   :  { %5940 = vmatprep.subr.bf16.mxu0 %v6492_v63 }
 0x68c   :  { %v3255_v18 = vmin.f32 %v3253_v15, %v3254_v44  ;;  %v3262_v42 = vmax.f32 %v3260_v43, %v3261_v25 }
 0x68d   :  { %5914 = vmatpush3.bf16.msra.mxu1 %v6510_v5 }
 0x68e   :  { %v3263_v58 = vrot.slane %v3262_v42, 1  ;;  %5942 = vmatpush3.bf16.msra.mxu0 %v6492_v63  ;;  %v3256_v29 = vrot.slane %v3255_v18, 1  ;;  %5916 = vmatprep.subr.bf16.mxu1 %v6516_v9 }
 0x68f   :  { %5944 = vmatprep.subr.bf16.mxu0 %v6504_v2 }
 0x690   :  { %v7358_v28 = vmin.f32 %v3255_v18, %v3256_v29  ;;  %v7365_v55 = vmax.f32 %v3262_v42, %v3263_v58 }
 0x691   :  { %5918 = vmatpush3.bf16.msra.mxu1 %v6516_v9 }
 0x692   :  { %5946 = vmatpush3.bf16.msra.mxu0 %v6504_v2  ;;  %v3265_v63 = vmin.f32 %v7356_v62, %v7358_v28  ;;  %v3266_v40 = vmax.f32 %v7363_v54, %v7365_v55  ;;  %5920 = vmatprep.subr.bf16.mxu1 %v6522_v16 }
 0x693   :  { %5948 = vmatprep.subr.bf16.mxu0 %v6510_v5 }
 0x695   :  { %5922 = vmatpush3.bf16.msra.mxu1 %v6522_v16 }
 0x696   :  { %5950 = vmatpush3.bf16.msra.mxu0 %v6510_v5  ;;  %5924 = vmatprep.subr.bf16.mxu1 %v6528_v13 }
 0x697   :  { %5952 = vmatprep.subr.bf16.mxu0 %v6516_v9 }
 0x699   :  { %5926 = vmatpush3.bf16.msra.mxu1 %v6528_v13 }
 0x69a   :  { %5954 = vmatpush3.bf16.msra.mxu0 %v6516_v9  ;;  %5928 = vmatprep.subr.bf16.mxu1 %v6534_v24 }
 0x69b   :  { %5956 = vmatprep.subr.bf16.mxu0 %v6522_v16 }
 0x69d   :  { %5930 = vmatpush3.bf16.msra.mxu1 %v6534_v24 }
 0x69e   :  { %5958 = vmatpush3.bf16.msra.mxu0 %v6522_v16 }
 0x69f   :  { %5960 = vmatprep.subr.bf16.mxu0 %v6528_v13 }
 0x6a2   :  { %5962 = vmatpush3.bf16.msra.mxu0 %v6528_v13 }
 0x6a3   :  { %5964 = vmatprep.subr.bf16.mxu0 %v6534_v24 }
 0x6a6   :  { %5966 = vmatpush3.bf16.msra.mxu0 %v6534_v24 }
 0x74f   :  { %v5264_v2 = vpop.f32.mrb[26].mxu1 }
 0x750   :  { %v3410_v5 = vpop.f32.mrb[27].mxu1 }
 0x751   :  { %v3419_v39 = vpack.c.bf16 %v5264_v2, %v3410_v5 }
 0x753   :  { %4279 = vst [vmem:[#allocation15 + $0x60] sm:$0xff] %v3419_v39   ;;  %v3430_v16 = vunpack.c.l.bf16 %v3419_v39  ;;  %v3431_v32 = vunpack.c.h.bf16 %v3419_v39  ;;  %v5313_v21 = vpop.f32.mrb[28].mxu1 }
 0x754   :  { %v3697_v7 = vpop.f32.mrb[29].mxu1 }
 0x755   :  { %v3432_v22 = vmin.f32 %v3430_v16, %v3431_v32  ;;  %v3439_v8 = vmax.f32 %v3430_v16, %v3431_v32  ;;  %5346 = vmatprep.mubr.f32.mxu1 %v3697_v7 }
 0x756   :  { %5347 = vmatmul.mubr.f32.vlgmr.msra.gmra.mrb[30].mxu1 %v5313_v21 }
 0x757   :  { %v3433_v24 = vrot.slane %v3432_v22, 4  ;;  %v3440_v45 = vrot.slane %v3439_v8, 4 }
 0x758   :  { %v5306_v9 = vpop.f32.mrb[26].mxu0 }
 0x759   :  { %v3591_v61 = vpop.f32.mrb[27].mxu0  ;;  %v3434_v53 = vmin.f32 %v3432_v22, %v3433_v24  ;;  %v3441_v23 = vmax.f32 %v3439_v8, %v3440_v45 }
 0x75a   :  { %v3600_v48 = vpack.c.bf16 %v5306_v9, %v3591_v61 }
 0x75b   :  { %v3435_v27 = vrot.slane %v3434_v53, 2  ;;  %v3442_v11 = vrot.slane %v3441_v23, 2 }
 0x75c   :  { %4284 = vst [vmem:[#allocation15 + $0x68] sm:$0xff] %v3600_v48   ;;  %v3611_v13 = vunpack.c.l.bf16 %v3600_v48  ;;  %v3612_v52 = vunpack.c.h.bf16 %v3600_v48  ;;  %v5355_v46 = vpop.f32.mrb[28].mxu0 }
 0x75d   :  { %v3878_v38 = vpop.f32.mrb[29].mxu0  ;;  %v3443_v3 = vmax.f32 %v3441_v23, %v3442_v11  ;;  %v3436_v4 = vmin.f32 %v3434_v53, %v3435_v27 }
 0x75e   :  { %v3613_v1 = vmin.f32 %v3611_v13, %v3612_v52  ;;  %v3620_v59 = vmax.f32 %v3611_v13, %v3612_v52  ;;  %5388 = vmatprep.mubr.f32.mxu0 %v3878_v38 }
 0x75f   :  { %5389 = vmatmul.mubr.f32.vlgmr.msra.gmra.mrb[30].mxu0 %v5355_v46  ;;  %v3437_v6 = vrot.slane %v3436_v4, 1  ;;  %v3444_v41 = vrot.slane %v3443_v3, 1 }
 0x760   :  { %v3614_v57 = vrot.slane %v3613_v1, 4  ;;  %v3621_v10 = vrot.slane %v3620_v59, 4 }
 0x761   :  { %v3438_v20 = vmin.f32 %v3436_v4, %v3437_v6  ;;  %v3445_v50 = vmax.f32 %v3443_v3, %v3444_v41 }
 0x762   :  { %v3615_v0 = vmin.f32 %v3613_v1, %v3614_v57  ;;  %v3622_v56 = vmax.f32 %v3620_v59, %v3621_v10 }
 0x763   :  { %v7395_v30 = vmin.f32 %v3265_v63, %v3438_v20  ;;  %v7400_v35 = vmax.f32 %v3266_v40, %v3445_v50 }
 0x764   :  { %v3623_v26 = vrot.slane %v3622_v56, 2  ;;  %v3616_v60 = vrot.slane %v3615_v0, 2 }
 0x766   :  { %v3617_v33 = vmin.f32 %v3615_v0, %v3616_v60  ;;  %v3624_v31 = vmax.f32 %v3622_v56, %v3623_v26 }
 0x768   :  { %v3618_v17 = vrot.slane %v3617_v33, 1  ;;  %v3625_v14 = vrot.slane %v3624_v31, 1 }
 0x76a   :  { %v3619_v34 = vmin.f32 %v3617_v33, %v3618_v17  ;;  %v3626_v36 = vmax.f32 %v3624_v31, %v3625_v14 }
 0x76c   :  { %v3627_v15 = vmin.f32 %v7395_v30, %v3619_v34  ;;  %v3628_v43 = vmax.f32 %v7400_v35, %v3626_v36 }
 0x829   :  { %v5348_v37 = vpop.f32.mrb[30].mxu1 }
 0x82a   :  { %v3772_v51 = vpop.f32.mrb[31].mxu1 }
 0x82b   :  { %v3781_v25 = vpack.c.bf16 %v5348_v37, %v3772_v51 }
 0x82d   :  { %4289 = vst [vmem:[#allocation15 + $0x70] sm:$0xff] %v3781_v25   ;;  %v3792_v12 = vunpack.c.l.bf16 %v3781_v25  ;;  %v3793_v18 = vunpack.c.h.bf16 %v3781_v25 }
 0x82f   :  { %v3794_v49 = vmin.f32 %v3792_v12, %v3793_v18  ;;  %v3801_v58 = vmax.f32 %v3792_v12, %v3793_v18 }
 0x832   :  { %v5390_v44 = vpop.f32.mrb[30].mxu0 }
 0x833   :  { %v3953_v47 = vpop.f32.mrb[31].mxu0 }
 0x834   :  { %v3962_v42 = vpack.c.bf16 %v5390_v44, %v3953_v47 }
 0x836   :  { %4294 = vst [vmem:[#allocation15 + $0x78] sm:$0xff] %v3962_v42   ;;  %v3973_v19 = vunpack.c.l.bf16 %v3962_v42  ;;  %v3974_v29 = vunpack.c.h.bf16 %v3962_v42 }
 0x837   :  { %6105 = shalt.err (!%p6102_p0)
}
 0x838   :  { %s6106_s17 = scalar_lea.hbm %s7457_s6, 2048 }
 0x839   :  { %p6107_p1 = scmp.ne.s32.totalorder %s7457_s6, %s6106_s17  ;;  %p6110_p2 = scmp.lt.u32.totalorder %s6106_s17, %s7457_s6 }
 0x83b   :  { %p6112_p3 = pnand %p6110_p2, %p6107_p1 }
 0x83d   :  { %6115 = shalt.err (!%p6112_p3)
}
 0x83e   :  { %4004 = dma.vmem_to_hbm [thread:$0]  %s3999_s14, 2048, %s7457_s6, [#allocation5], %s6184_s4, %s6184_s4, %s6185_s20   ;;  %v3795_v62 = vrot.slane %v3794_v49, 4  ;;  %v3802_v28 = vrot.slane %v3801_v58, 4  ;;  %v3975_v54 = vmin.f32 %v3973_v19, %v3974_v29  ;;  %v3982_v55 = vmax.f32 %v3973_v19, %v3974_v29 }
 0x83f   :  { %s6187_s6 = smov [#allocation16]   ;;  %s6188_s25 = smov [#allocation18]  }
 0x840   :  { %v3803_v63 = vmax.f32 %v3801_v58, %v3802_v28  ;;  %v3983_v40 = vrot.slane %v3982_v55, 4  ;;  %v3796_v2 = vmin.f32 %v3794_v49, %v3795_v62  ;;  %v3976_v5 = vrot.slane %v3975_v54, 4  ;;  %s4011_s24 = sshll.u32 %s6187_s6, 4  ;;  %s4021_s26 = sshll.u32 %s6188_s25, 4  ;;  %s4012_s24 = int_to_ptr.vmem [resolvable:$true] %s4011_s24  ;;  %s7419_s26 = int_to_ptr.vmem [resolvable:$true] %s4021_s26 }
 0x841   :  { %s6116_s27 = scalar_lea.vmem %s4012_s24, 16  ;;  %s6120_s4 = scalar_lea.vmem %s4012_s24, 32 }
 0x842   :  { %v3797_v9 = vrot.slane %v3796_v2, 2  ;;  %v3977_v39 = vmin.f32 %v3975_v54, %v3976_v5  ;;  %v3804_v61 = vrot.slane %v3803_v63, 2  ;;  %v3984_v16 = vmax.f32 %v3982_v55, %v3983_v40  ;;  %p6117_p4 = scmp.ne.s32.totalorder %s4012_s24, %s6116_s27  ;;  %p6121_p5 = scmp.lt.s32.totalorder %s4012_s24, %s4012_s24 }
 0x843   :  { %p6122_p6 = scmp.lt.s32.totalorder %s6120_s4, %s6116_s27 }
 0x844   :  { %v3798_v32 = vmin.f32 %v3796_v2, %v3797_v9  ;;  %v3978_v48 = vrot.slane %v3977_v39, 2  ;;  %v3805_v21 = vmax.f32 %v3803_v63, %v3804_v61  ;;  %v3985_v7 = vrot.slane %v3984_v16, 2 }
 0x845   :  { %p6123_p7 = por %p6122_p6, %p6121_p5 }
 0x846   :  { %v3799_v22 = vrot.slane %v3798_v32, 1  ;;  %v3979_v8 = vmin.f32 %v3977_v39, %v3978_v48  ;;  %v3806_v13 = vrot.slane %v3805_v21, 1  ;;  %v3986_v52 = vmax.f32 %v3984_v16, %v3985_v7 }
 0x847   :  { %p6124_p8 = pnand %p6123_p7, %p6117_p4 }
 0x848   :  { %v3800_v46 = vmin.f32 %v3798_v32, %v3799_v22  ;;  %v3980_v38 = vrot.slane %v3979_v8, 1  ;;  %v3807_v24 = vmax.f32 %v3805_v21, %v3806_v13  ;;  %v3987_v45 = vrot.slane %v3986_v52, 1 }
 0x84a   :  { %v3808_v1 = vmin.f32 %v3627_v15, %v3800_v46  ;;  %v3981_v59 = vmin.f32 %v3979_v8, %v3980_v38  ;;  %v3809_v53 = vmax.f32 %v3628_v43, %v3807_v24  ;;  %v3988_v23 = vmax.f32 %v3986_v52, %v3987_v45 }
 0x84c   :  { %v3989_v57 = vmin.f32 %v3808_v1, %v3981_v59  ;;  %v3990_v10 = vmax.f32 %v3809_v53, %v3988_v23 }
 0x84e   :  { %3991 = vst [vmem:[#allocation16] sm:$0x1] %v3989_v57  ;;  %3992 = vst [vmem:[#allocation18] sm:$0x1] %v3990_v10 }
 0x84f   :  { %6127 = shalt.err (!%p6124_p8)
}
 0x850   :  { %s6128_s29 = scalar_lea.hbm %s7458_s7, 16 }
 0x851   :  { %p6129_p9 = scmp.ne.s32.totalorder %s7458_s7, %s6128_s29  ;;  %p6132_p10 = scmp.lt.u32.totalorder %s6128_s29, %s7458_s7 }
 0x853   :  { %p6134_p11 = pnand %p6132_p10, %p6129_p9 }
 0x855   :  { %6137 = shalt.err (!%p6134_p11)
}
 0x856   :  { %4014 = dma.vmem_to_hbm [thread:$0]  %s4012_s24, 16, %s7458_s7, [#allocation17]  }
 0x857   :  { %s6138_s11 = scalar_lea.vmem %s7419_s26, 16  ;;  %s6142_s12 = scalar_lea.vmem %s7419_s26, 32 }
 0x858   :  { %p6139_p12 = scmp.ne.s32.totalorder %s7419_s26, %s6138_s11  ;;  %p6143_p13 = scmp.lt.s32.totalorder %s7419_s26, %s7419_s26 }
 0x859   :  { %p6144_p0 = scmp.lt.s32.totalorder %s6142_s12, %s6138_s11 }
 0x85b   :  { %p6145_p1 = por %p6144_p0, %p6143_p13 }
 0x85d   :  { %p6146_p2 = pnand %p6145_p1, %p6139_p12 }
 0x85f   :  { %6149 = shalt.err (!%p6146_p2)
}
 0x860   :  { %s6150_s2 = scalar_lea.hbm %s7459_s8, 16 }
 0x861   :  { %p6151_p3 = scmp.ne.s32.totalorder %s7459_s8, %s6150_s2  ;;  %p6154_p4 = scmp.lt.u32.totalorder %s6150_s2, %s7459_s8 }
 0x863   :  { %p6156_p5 = pnand %p6154_p4, %p6151_p3 }
 0x865   :  { %6159 = shalt.err (!%p6156_p5)
}
 0x866   :  { %4024 = dma.vmem_to_hbm [thread:$0]  %s7419_s26, 16, %s7459_s8, [#allocation17]  }
 0x867   :  { %6170 = dma.done.wait [#allocation5], 2048  }
 0x868   :  { %6171 = vsyncadd [#allocation5], 4294965248 }
 0x869   :  { %6172 = dma.done.wait [#allocation17], 32  }
 0x86a   :  { %6173 = vsyncadd [#allocation17], 4294967264 }
 0x86b   :  { %4034 = vsyncpa [#allocation4], 1 }
 0x86c   :  { %4035 = vsyncpa [#allocation11], 1 }
 0x86d   :  { %4036 = vsyncpa [#allocation14], 1 }
 0x86e   :  { %4037 = vsyncpa [#allocation5], 1 }
 0x86f   :  { %4038 = vsyncpa [#allocation17], 1 }
 0x870   :  { %4039 = vsyncpa [#allocation6], 1 }
 0x871   :  { %4040 = vsyncpa [#allocation8], 1 }

</bundles_post_ra>
